<compile_context>
chip_gen: v6e
topology: v6e:2x2x1
jax: 0.10.0
libtpu: 0.0.40
codegen_flags: <defaults>
</compile_context>

<pallas_src>
import functools

import jax
import jax.numpy as jnp
from jax import lax
from jax.experimental import pallas as pl
from jax.experimental.pallas import tpu as pltpu


_NEG_INF = -1e9
_VMEM_BUDGET = 40 << 20      # stay well under v7x's 64 MiB physical VMEM


# ----------------------------------------------------------------------------
# Fused kernel factory: LayerNorm + fused QKV projection + multi-head attention.
# Block = (block_b, S, D) of the input; grid iterates over batch tiles.
# ----------------------------------------------------------------------------
def _make_kernel(head_size, att_size, has_bias, has_mask):
    out_dim = head_size * att_size

    def kernel(*refs):
        idx = 0
        x_ref = refs[idx]; idx += 1
        bias_ref = None
        mask_ref = None
        if has_bias:
            bias_ref = refs[idx]; idx += 1
        if has_mask:
            mask_ref = refs[idx]; idx += 1
        ln_w_ref, ln_b_ref, wqkv_ref, bqkv_ref, o_ref = refs[idx:]

        bt, seq, dim = x_ref.shape

        # ---- LayerNorm over the flattened (bt*S, D) rows -------------------
        x = x_ref[...].reshape(bt * seq, dim).astype(jnp.float32)
        mu = jnp.mean(x, axis=-1, keepdims=True)
        var = jnp.mean(jnp.square(x - mu), axis=-1, keepdims=True)
        y = (x - mu) * lax.rsqrt(var + 1e-5) * ln_w_ref[0] + ln_b_ref[0]

        # ---- fused Q/K/V projection (scale pre-folded into Q columns) ------
        # bf16 operands, f32 accumulation, lane-dense (D, 3*out_dim) matmul.
        qkv = jnp.dot(y.astype(jnp.bfloat16), wqkv_ref[...],
                      preferred_element_type=jnp.float32) + bqkv_ref[0]
        qkv = qkv.reshape(bt, seq, 3 * out_dim)

        if has_bias:
            bias = bias_ref[...].astype(jnp.float32)      # (bb, Hb, S, S)
        if has_mask:
            km3 = mask_ref[...].astype(jnp.float32)       # (bt, 1, S)
            key_is_pad = km3 == 0.0                       # (bt, 1, S) bool
            km = km3[:, 0, :]                             # (bt, S)

        heads_out = []
        for h in range(head_size):                        # static unroll, H small
            q_sl = slice(h * att_size, (h + 1) * att_size)
            k_sl = slice(out_dim + h * att_size, out_dim + (h + 1) * att_size)
            v_sl = slice(2 * out_dim + h * att_size,
                         2 * out_dim + (h + 1) * att_size)
            qh = qkv[:, :, q_sl]                          # (bt, S, dk) (pre-scaled)
            kh = qkv[:, :, k_sl]
            vh = qkv[:, :, v_sl]

            s = jnp.einsum('bqd,bkd->bqk', qh, kh,
                           preferred_element_type=jnp.float32)   # (bt, S, S)
            if has_mask:
                # torch order: masked_fill BEFORE adding attn_bias.
                s = jnp.where(key_is_pad, _NEG_INF, s)
            if has_bias:
                bh = bias[:, h] if bias.shape[1] > 1 else bias[:, 0]
                s = s + bh                                # broadcast over batch
            s = s - jnp.max(s, axis=-1, keepdims=True)
            p = jnp.exp(s)
            p = p * pl.reciprocal(jnp.sum(p, axis=-1, keepdims=True), approx=True)

            heads_out.append(jnp.einsum('bqk,bkd->bqd', p, vh,
                                        preferred_element_type=jnp.float32))

        o = jnp.concatenate(heads_out, axis=-1)           # (bt, S, out_dim)
        if has_mask:
            o = o * km[:, :, None]                        # torch query-mask multiply
        o_ref[...] = o.astype(o_ref.dtype)                # single 128-lane dense store

    return kernel


# ----------------------------------------------------------------------------
# Tiling helpers (chip-aware block_b + padded VMEM accounting).
# ----------------------------------------------------------------------------
def _pad(n, m):
    return ((n + m - 1) // m) * m


def _vmem_bytes(bt, seq, dim, out_dim, bias_bt, bias_h, has_bias, has_mask):
    """Double-buffered VMEM footprint estimate with (8,128) tile padding
    (the (..,S,S) bias tile pads its last dim to 128 lanes)."""
    x_t = bt * _pad(seq, 8) * _pad(dim, 128) * 4
    o_t = bt * _pad(seq, 8) * _pad(out_dim, 128) * 4
    b_t = bias_bt * bias_h * _pad(seq, 8) * _pad(seq, 128) * 2 if has_bias else 0
    m_t = bt * _pad(1, 8) * _pad(seq, 128) * 4 if has_mask else 0
    w_t = _pad(dim, 8) * _pad(3 * out_dim, 128) * 2
    v_t = 3 * _pad(1, 8) * _pad(max(dim, 3 * out_dim), 128) * 4
    return 2 * (x_t + o_t + b_t + m_t + w_t + v_t)


def _tensorcores_per_device():
    try:
        kind = (jax.devices()[0].device_kind or "").lower()
    except Exception:
        return 1
    # v7x has 2 TensorCores per chip; v5e/v6e have 1 (do not halve bt there).
    return 2 if "7" in kind else 1


def _pick_block_b(batch, seq, dim, out_dim, bias_bt_full, bias_h,
                  has_bias, has_mask, target_rows=256):
    """Batch elements per grid step: aim for >= target_rows rows into the QKV
    matmul, keep >= 2 grid steps only on 2-TC chips, tile batch exactly, and
    respect the padded VMEM budget."""
    min_grid = _tensorcores_per_device()
    bt = max(1, min(batch, -(-target_rows // max(seq, 1))))
    if min_grid > 1 and batch >= min_grid:
        bt = min(bt, max(1, batch // min_grid))
    while batch % bt:
        bt -= 1

    def est(b):
        bb = b if bias_bt_full else 1
        return _vmem_bytes(b, seq, dim, out_dim, bb, bias_h, has_bias, has_mask)

    while bt > 1 and est(bt) > _VMEM_BUDGET:
        bt -= 1
        while batch % bt:
            bt -= 1
    return bt


# ----------------------------------------------------------------------------
# One-time parameter transform for the kernel (scale fold + bf16 pre-cast).
# ----------------------------------------------------------------------------
def prepare_params(params, *, head_size, att_size):
    """Fold the attention scale into the Q columns of the fused QKV weight/bias
    and pre-cast the weight to bf16.  One-time weight transform; the f32
    reference uses the raw params."""
    out_dim = head_size * att_size
    scale = att_size ** (-0.5)
    col_scale = jnp.concatenate(
        [jnp.full((out_dim,), scale, jnp.float32),
         jnp.ones((2 * out_dim,), jnp.float32)])
    return dict(
        ln_w=params["ln_w"].astype(jnp.float32),
        ln_b=params["ln_b"].astype(jnp.float32),
        wqkv=(params["wqkv"].astype(jnp.float32) * col_scale[None, :]
              ).astype(jnp.bfloat16),
        bqkv=params["bqkv"].astype(jnp.float32) * col_scale,
    )


# ----------------------------------------------------------------------------
# Wrapper.
# ----------------------------------------------------------------------------
def encoder_layer_simple_forward(prepared, x, attn_bias=None, mask=None, *,
                                 head_size, att_size=None, block_b=None):
    """x: (B, S, D); attn_bias: (B|1, H|1, S, S) or None; mask: (B, S) or None
    (nonzero = keep).  `prepared` comes from prepare_params."""
    batch, seq, dim = x.shape
    if att_size is None:
        att_size = dim // head_size
    out_dim = head_size * att_size

    has_bias = attn_bias is not None
    has_mask = mask is not None

    bias_bt_full = False
    bias_h = head_size
    if has_bias:
        assert attn_bias.ndim == 4 and attn_bias.shape[-2:] == (seq, seq)
        assert attn_bias.shape[0] in (1, batch)
        assert attn_bias.shape[1] in (1, head_size)
        bias_bt_full = attn_bias.shape[0] == batch
        bias_h = attn_bias.shape[1]

    bt = block_b if block_b is not None else _pick_block_b(
        batch, seq, dim, out_dim, bias_bt_full, bias_h, has_bias, has_mask)
    grid = (batch // bt,)
    vec = lambda a: a.reshape(1, -1)

    inputs = [x]
    in_specs = [pl.BlockSpec((bt, seq, dim), lambda i: (i, 0, 0))]

    if has_bias:
        # True (unbroadcast) shape, bf16 DMA; broadcast + f32 cast in-kernel.
        inputs.append(attn_bias.astype(jnp.bfloat16))
        bias_bt = bt if bias_bt_full else 1
        if bias_bt_full:
            in_specs.append(pl.BlockSpec((bias_bt, bias_h, seq, seq),
                                         lambda i: (i, 0, 0, 0)))
        else:
            in_specs.append(pl.BlockSpec((bias_bt, bias_h, seq, seq),
                                         lambda i: (0, 0, 0, 0)))
    else:
        bias_bt = 0

    if has_mask:
        inputs.append(mask.astype(jnp.float32).reshape(batch, 1, seq))
        in_specs.append(pl.BlockSpec((bt, 1, seq), lambda i: (i, 0, 0)))

    wqkv = prepared["wqkv"]
    if wqkv.dtype != jnp.bfloat16:          # trace-time check; normally a no-op
        wqkv = wqkv.astype(jnp.bfloat16)
    inputs += [vec(prepared["ln_w"]), vec(prepared["ln_b"]),
               wqkv, vec(prepared["bqkv"])]
    in_specs += [
        pl.BlockSpec((1, dim), lambda i: (0, 0)),
        pl.BlockSpec((1, dim), lambda i: (0, 0)),
        pl.BlockSpec((dim, 3 * out_dim), lambda i: (0, 0)),
        pl.BlockSpec((1, 3 * out_dim), lambda i: (0, 0)),
    ]

    vmem_limit = int(min(
        64 << 20,
        max(32 << 20, 4 * _vmem_bytes(bt, seq, dim, out_dim, bias_bt, bias_h,
                                      has_bias, has_mask))))

    kernel = _make_kernel(head_size, att_size, has_bias, has_mask)
    return pl.pallas_call(
        kernel,
        out_shape=jax.ShapeDtypeStruct((batch, seq, out_dim), jnp.float32),
        grid=grid,
        in_specs=in_specs,
        out_specs=pl.BlockSpec((bt, seq, out_dim), lambda i: (i, 0, 0)),
        compiler_params=pltpu.CompilerParams(
            dimension_semantics=("parallel",),
            vmem_limit_bytes=vmem_limit),
    )(*inputs)


# ----------------------------------------------------------------------------
# Pure-JAX reference (mirrors the torch forward, f32) for a tolerance check.
# ----------------------------------------------------------------------------
def encoder_layer_simple_reference(params, x, attn_bias=None, mask=None, *,
                                   head_size, att_size=None):
    batch, seq, dim = x.shape
    if att_size is None:
        att_size = dim // head_size
    out_dim = head_size * att_size

    mu = jnp.mean(x, axis=-1, keepdims=True)
    var = jnp.mean(jnp.square(x - mu), axis=-1, keepdims=True)
    y = (x - mu) * lax.rsqrt(var + 1e-5) * params["ln_w"] + params["ln_b"]

    qkv = y @ params["wqkv"] + params["bqkv"]
    q, k, v = jnp.split(qkv, 3, axis=-1)
    heads = lambda a: a.reshape(batch, seq, head_size, att_size).transpose(0, 2, 1, 3)
    q, k, v = heads(q) * att_size ** (-0.5), heads(k), heads(v)

    s = q @ k.transpose(0, 1, 3, 2)
    if mask is not None:
        s = jnp.where((mask == 0)[:, None, None, :], _NEG_INF, s)
    if attn_bias is not None:
        s = s + attn_bias
    p = jax.nn.softmax(s, axis=-1)
    o = p @ v
    if mask is not None:
        o = o * mask.astype(o.dtype)[:, None, :, None]
    return o.transpose(0, 2, 1, 3).reshape(batch, seq, out_dim)


# ----------------------------------------------------------------------------
# Deterministic synthetic parameters (no checkpoint load).
# ----------------------------------------------------------------------------
def init_params(key, hidden_dim, head_size, att_size):
    out_dim = head_size * att_size
    ks = jax.random.split(key, 5)

    def lin(k, kin, kout):
        kw, kb = jax.random.split(k)
        w = jax.random.normal(kw, (kin, kout), jnp.float32) / jnp.sqrt(kin)
        b = 0.01 * jax.random.normal(kb, (kout,), jnp.float32)
        return w, b

    ln_w = 1.0 + 0.1 * jax.random.normal(ks[0], (hidden_dim,), jnp.float32)
    ln_b = 0.01 * jax.random.normal(ks[1], (hidden_dim,), jnp.float32)
    wq, bq = lin(ks[2], hidden_dim, out_dim)
    wk, bk = lin(ks[3], hidden_dim, out_dim)
    wv, bv = lin(ks[4], hidden_dim, out_dim)
    # NOTE: MultiHeadAttention.output_layer is unused (enable_out_layer=False).
    return dict(ln_w=ln_w, ln_b=ln_b,
                wqkv=jnp.concatenate([wq, wk, wv], axis=1),
                bqkv=jnp.concatenate([bq, bk, bv]))


if __name__ == "__main__":
    hidden_dim, head_size = 128, 4                 # EncoderLayerSimple defaults
    att_size = hidden_dim // head_size             # att_size=None -> 32, out_dim=128
    batch, seq = 8, 16

    key = jax.random.PRNGKey(0)
    kp, kx, kb = jax.random.split(key, 3)
    params = init_params(kp, hidden_dim, head_size, att_size)
    prepared = prepare_params(params, head_size=head_size, att_size=att_size)

    x = jax.random.normal(kx, (batch, seq, hidden_dim), jnp.float32)
    attn_bias = 0.1 * jax.random.normal(kb, (batch, head_size, seq, seq), jnp.float32)
    lengths = jnp.array([16, 12, 16, 9, 16, 14, 16, 11], jnp.int32)
    mask = (jnp.arange(seq)[None, :] < lengths[:, None]).astype(jnp.float32)

    fwd = jax.jit(functools.partial(encoder_layer_simple_forward,
                                    head_size=head_size, att_size=att_size))

    # Masked + biased path (exercises masked_fill-before-bias and query-mask).
    out = jax.block_until_ready(fwd(prepared, x, attn_bias, mask))
    assert out.shape == (batch, seq, head_size * att_size), out.shape
    assert bool(jnp.all(jnp.isfinite(out)))
    ref = encoder_layer_simple_reference(params, x, attn_bias, mask,
                                         head_size=head_size, att_size=att_size)
    # bf16 QKV matmul + approx-reciprocal softmax => small deviation from f32 ref.
    assert float(jnp.max(jnp.abs(out - ref))) < 1e-1

    # No-bias / no-mask kernel variant (no zeros DMA for the missing bias).
    out2 = jax.block_until_ready(fwd(prepared, x))
    ref2 = encoder_layer_simple_reference(params, x,
                                          head_size=head_size, att_size=att_size)
    assert float(jnp.max(jnp.abs(out2 - ref2))) < 1e-1

    print("KERNEL_OK")
</pallas_src>

<mosaic_0001>
module attributes {stable_mosaic.version = 11 : i64} {
  func.func @kernel(%arg0: i32, %arg1: memref<8x16x128xf32, #tpu.memory_space<vmem>>, %arg2: memref<8x4x16x16xbf16, #tpu.memory_space<vmem>>, %arg3: memref<8x1x16xf32, #tpu.memory_space<vmem>>, %arg4: memref<1x128xf32, #tpu.memory_space<vmem>>, %arg5: memref<1x128xf32, #tpu.memory_space<vmem>>, %arg6: memref<128x384xbf16, #tpu.memory_space<vmem>>, %arg7: memref<1x384xf32, #tpu.memory_space<vmem>>, %arg8: memref<8x16x128xf32, #tpu.memory_space<vmem>>) attributes {dimension_semantics = [#tpu.dimension_semantics<parallel>], iteration_bounds = array<i64: 1>, scalar_prefetch = 0 : i64, scratch_operands = 0 : i64, tpu.core_type = #tpu.core_type<tc>, window_params = [{transform_indices = @transform_0, window_bounds = array<i64: 8, 16, 128>}, {transform_indices = @transform_1, window_bounds = array<i64: 8, 4, 16, 16>}, {transform_indices = @transform_2, window_bounds = array<i64: 8, 1, 16>}, {pipeline_mode = #tpu.pipeline_mode<synchronous>, transform_indices = @transform_3, window_bounds = array<i64: 1, 128>}, {pipeline_mode = #tpu.pipeline_mode<synchronous>, transform_indices = @transform_4, window_bounds = array<i64: 1, 128>}, {pipeline_mode = #tpu.pipeline_mode<synchronous>, transform_indices = @transform_5, window_bounds = array<i64: 128, 384>}, {pipeline_mode = #tpu.pipeline_mode<synchronous>, transform_indices = @transform_6, window_bounds = array<i64: 1, 384>}, {transform_indices = @transform_7, window_bounds = array<i64: 8, 16, 128>}]} {
    %c0 = arith.constant 0 : index
    %c0_0 = arith.constant 0 : index
    %c0_1 = arith.constant 0 : index
    %0 = vector.load %arg1[%c0, %c0_0, %c0_1] : memref<8x16x128xf32, #tpu.memory_space<vmem>>, vector<8x16x128xf32>
    %1 = vector.shape_cast %0 : vector<8x16x128xf32> to vector<128x128xf32>
    %cst = arith.constant dense<0.000000e+00> : vector<128xf32>
    %2 = vector.multi_reduction <add>, %1, %cst [1] : vector<128x128xf32> to vector<128xf32>
    %3 = vector.shape_cast %2 : vector<128xf32> to vector<128x1xf32>
    %cst_2 = arith.constant 1.280000e+02 : f32
    %4 = vector.broadcast %cst_2 : f32 to vector<128x1xf32>
    %5 = arith.divf %3, %4 : vector<128x1xf32>
    %6 = vector.broadcast %5 : vector<128x1xf32> to vector<128x128xf32>
    %7 = arith.subf %1, %6 : vector<128x128xf32>
    %8 = arith.mulf %7, %7 : vector<128x128xf32>
    %cst_3 = arith.constant dense<0.000000e+00> : vector<128xf32>
    %9 = vector.multi_reduction <add>, %8, %cst_3 [1] : vector<128x128xf32> to vector<128xf32>
    %10 = vector.shape_cast %9 : vector<128xf32> to vector<128x1xf32>
    %cst_4 = arith.constant 1.280000e+02 : f32
    %11 = vector.broadcast %cst_4 : f32 to vector<128x1xf32>
    %12 = arith.divf %10, %11 : vector<128x1xf32>
    %13 = vector.broadcast %5 : vector<128x1xf32> to vector<128x128xf32>
    %14 = arith.subf %1, %13 : vector<128x128xf32>
    %cst_5 = arith.constant 9.99999974E-6 : f32
    %15 = vector.broadcast %cst_5 : f32 to vector<128x1xf32>
    %16 = arith.addf %12, %15 : vector<128x1xf32>
    %17 = math.rsqrt %16 : vector<128x1xf32>
    %18 = vector.broadcast %17 : vector<128x1xf32> to vector<128x128xf32>
    %19 = arith.mulf %14, %18 : vector<128x128xf32>
    %c0_6 = arith.constant 0 : index
    %c0_7 = arith.constant 0 : index
    %20 = vector.load %arg4[%c0_6, %c0_7] : memref<1x128xf32, #tpu.memory_space<vmem>>, vector<1x128xf32>
    %21 = vector.shape_cast %20 : vector<1x128xf32> to vector<128xf32>
    %22 = vector.shape_cast %21 : vector<128xf32> to vector<1x128xf32>
    %23 = vector.broadcast %22 : vector<1x128xf32> to vector<128x128xf32>
    %24 = arith.mulf %19, %23 : vector<128x128xf32>
    %c0_8 = arith.constant 0 : index
    %c0_9 = arith.constant 0 : index
    %25 = vector.load %arg5[%c0_8, %c0_9] : memref<1x128xf32, #tpu.memory_space<vmem>>, vector<1x128xf32>
    %26 = vector.shape_cast %25 : vector<1x128xf32> to vector<128xf32>
    %27 = vector.shape_cast %26 : vector<128xf32> to vector<1x128xf32>
    %28 = vector.broadcast %27 : vector<1x128xf32> to vector<128x128xf32>
    %29 = arith.addf %24, %28 : vector<128x128xf32>
    %30 = arith.truncf %29 : vector<128x128xf32> to vector<128x128xbf16>
    %c0_10 = arith.constant 0 : index
    %c0_11 = arith.constant 0 : index
    %31 = vector.load %arg6[%c0_10, %c0_11] : memref<128x384xbf16, #tpu.memory_space<vmem>>, vector<128x384xbf16>
    %cst_12 = arith.constant dense<0.000000e+00> : vector<128x384xf32>
    %32 = tpu.matmul %30, %31, %cst_12 {dimension_numbers = #tpu.dot_dimension_numbers<[1], [0], [0], [1], [0, 0, 1, 1], [], []>} : vector<128x128xbf16>, vector<128x384xbf16>, vector<128x384xf32> -> vector<128x384xf32>
    %c0_13 = arith.constant 0 : index
    %c0_14 = arith.constant 0 : index
    %33 = vector.load %arg7[%c0_13, %c0_14] : memref<1x384xf32, #tpu.memory_space<vmem>>, vector<1x384xf32>
    %34 = vector.shape_cast %33 : vector<1x384xf32> to vector<384xf32>
    %35 = vector.shape_cast %34 : vector<384xf32> to vector<1x384xf32>
    %36 = vector.broadcast %35 : vector<1x384xf32> to vector<128x384xf32>
    %37 = arith.addf %32, %36 : vector<128x384xf32>
    %38 = vector.shape_cast %37 : vector<128x384xf32> to vector<8x16x384xf32>
    %c0_15 = arith.constant 0 : index
    %c0_16 = arith.constant 0 : index
    %c0_17 = arith.constant 0 : index
    %c0_18 = arith.constant 0 : index
    %39 = vector.load %arg2[%c0_15, %c0_16, %c0_17, %c0_18] : memref<8x4x16x16xbf16, #tpu.memory_space<vmem>>, vector<8x4x16x16xbf16>
    %40 = arith.extf %39 : vector<8x4x16x16xbf16> to vector<8x4x16x16xf32>
    %c0_19 = arith.constant 0 : index
    %c0_20 = arith.constant 0 : index
    %c0_21 = arith.constant 0 : index
    %41 = vector.load %arg3[%c0_19, %c0_20, %c0_21] : memref<8x1x16xf32, #tpu.memory_space<vmem>>, vector<8x1x16xf32>
    %cst_22 = arith.constant 0.000000e+00 : f32
    %42 = vector.broadcast %cst_22 : f32 to vector<8x1x16xf32>
    %43 = arith.cmpf oeq, %41, %42 : vector<8x1x16xf32>
    %44 = vector.shape_cast %41 : vector<8x1x16xf32> to vector<8x16xf32>
    %45 = vector.extract_strided_slice %38 {offsets = [0, 0, 0], sizes = [8, 16, 32], strides = [1, 1, 1]} : vector<8x16x384xf32> to vector<8x16x32xf32>
    %46 = vector.extract_strided_slice %38 {offsets = [0, 0, 128], sizes = [8, 16, 32], strides = [1, 1, 1]} : vector<8x16x384xf32> to vector<8x16x32xf32>
    %47 = vector.extract_strided_slice %38 {offsets = [0, 0, 256], sizes = [8, 16, 32], strides = [1, 1, 1]} : vector<8x16x384xf32> to vector<8x16x32xf32>
    "tpu.trace_start"() <{level = 10 : i32, message = "bqd,bkd->bqk"}> : () -> ()
    %cst_23 = arith.constant dense<0.000000e+00> : vector<8x16x16xf32>
    %48 = tpu.matmul %45, %46, %cst_23 {dimension_numbers = #tpu.dot_dimension_numbers<[2], [2], [1], [1], [0, 0, 0, 1, 1, 1], [0], [0]>} : vector<8x16x32xf32>, vector<8x16x32xf32>, vector<8x16x16xf32> -> vector<8x16x16xf32>
    %cst_24 = arith.constant -1.000000e+09 : f32
    "tpu.trace_stop"() : () -> ()
    %49 = vector.shape_cast %43 : vector<8x1x16xi1> to vector<8x1x16xi1>
    %50 = vector.broadcast %49 : vector<8x1x16xi1> to vector<8x16x16xi1>
    %51 = vector.broadcast %cst_24 : f32 to vector<8x16x16xf32>
    %52 = arith.select %50, %51, %48 : vector<8x16x16xi1>, vector<8x16x16xf32>
    %53 = vector.extract_strided_slice %40 {offsets = [0, 0, 0, 0], sizes = [8, 1, 16, 16], strides = [1, 1, 1, 1]} : vector<8x4x16x16xf32> to vector<8x1x16x16xf32>
    %54 = vector.shape_cast %53 : vector<8x1x16x16xf32> to vector<8x16x16xf32>
    %55 = arith.addf %52, %54 : vector<8x16x16xf32>
    %cst_25 = arith.constant dense<0xFF800000> : vector<8x16xf32>
    %56 = vector.multi_reduction <maximumf>, %55, %cst_25 [2] : vector<8x16x16xf32> to vector<8x16xf32>
    %57 = vector.shape_cast %56 : vector<8x16xf32> to vector<8x16x1xf32>
    %58 = vector.broadcast %57 : vector<8x16x1xf32> to vector<8x16x16xf32>
    %59 = arith.subf %55, %58 : vector<8x16x16xf32>
    %60 = math.exp %59 : vector<8x16x16xf32>
    %cst_26 = arith.constant dense<0.000000e+00> : vector<8x16xf32>
    %61 = vector.multi_reduction <add>, %60, %cst_26 [2] : vector<8x16x16xf32> to vector<8x16xf32>
    %62 = vector.shape_cast %61 : vector<8x16xf32> to vector<8x16x1xf32>
    %63 = tpu.reciprocal %62 {approx = true} : vector<8x16x1xf32> -> vector<8x16x1xf32>
    %64 = vector.broadcast %63 : vector<8x16x1xf32> to vector<8x16x16xf32>
    %65 = arith.mulf %60, %64 : vector<8x16x16xf32>
    "tpu.trace_start"() <{level = 10 : i32, message = "bqk,bkd->bqd"}> : () -> ()
    %cst_27 = arith.constant dense<0.000000e+00> : vector<8x16x32xf32>
    %66 = tpu.matmul %65, %47, %cst_27 {dimension_numbers = #tpu.dot_dimension_numbers<[2], [1], [1], [2], [0, 0, 0, 1, 1, 2], [0], [0]>} : vector<8x16x16xf32>, vector<8x16x32xf32>, vector<8x16x32xf32> -> vector<8x16x32xf32>
    "tpu.trace_stop"() : () -> ()
    %67 = vector.extract_strided_slice %38 {offsets = [0, 0, 32], sizes = [8, 16, 32], strides = [1, 1, 1]} : vector<8x16x384xf32> to vector<8x16x32xf32>
    %68 = vector.extract_strided_slice %38 {offsets = [0, 0, 160], sizes = [8, 16, 32], strides = [1, 1, 1]} : vector<8x16x384xf32> to vector<8x16x32xf32>
    %69 = vector.extract_strided_slice %38 {offsets = [0, 0, 288], sizes = [8, 16, 32], strides = [1, 1, 1]} : vector<8x16x384xf32> to vector<8x16x32xf32>
    "tpu.trace_start"() <{level = 10 : i32, message = "bqd,bkd->bqk"}> : () -> ()
    %cst_28 = arith.constant dense<0.000000e+00> : vector<8x16x16xf32>
    %70 = tpu.matmul %67, %68, %cst_28 {dimension_numbers = #tpu.dot_dimension_numbers<[2], [2], [1], [1], [0, 0, 0, 1, 1, 1], [0], [0]>} : vector<8x16x32xf32>, vector<8x16x32xf32>, vector<8x16x16xf32> -> vector<8x16x16xf32>
    %cst_29 = arith.constant -1.000000e+09 : f32
    "tpu.trace_stop"() : () -> ()
    %71 = vector.shape_cast %43 : vector<8x1x16xi1> to vector<8x1x16xi1>
    %72 = vector.broadcast %71 : vector<8x1x16xi1> to vector<8x16x16xi1>
    %73 = vector.broadcast %cst_29 : f32 to vector<8x16x16xf32>
    %74 = arith.select %72, %73, %70 : vector<8x16x16xi1>, vector<8x16x16xf32>
    %75 = vector.extract_strided_slice %40 {offsets = [0, 1, 0, 0], sizes = [8, 1, 16, 16], strides = [1, 1, 1, 1]} : vector<8x4x16x16xf32> to vector<8x1x16x16xf32>
    %76 = vector.shape_cast %75 : vector<8x1x16x16xf32> to vector<8x16x16xf32>
    %77 = arith.addf %74, %76 : vector<8x16x16xf32>
    %cst_30 = arith.constant dense<0xFF800000> : vector<8x16xf32>
    %78 = vector.multi_reduction <maximumf>, %77, %cst_30 [2] : vector<8x16x16xf32> to vector<8x16xf32>
    %79 = vector.shape_cast %78 : vector<8x16xf32> to vector<8x16x1xf32>
    %80 = vector.broadcast %79 : vector<8x16x1xf32> to vector<8x16x16xf32>
    %81 = arith.subf %77, %80 : vector<8x16x16xf32>
    %82 = math.exp %81 : vector<8x16x16xf32>
    %cst_31 = arith.constant dense<0.000000e+00> : vector<8x16xf32>
    %83 = vector.multi_reduction <add>, %82, %cst_31 [2] : vector<8x16x16xf32> to vector<8x16xf32>
    %84 = vector.shape_cast %83 : vector<8x16xf32> to vector<8x16x1xf32>
    %85 = tpu.reciprocal %84 {approx = true} : vector<8x16x1xf32> -> vector<8x16x1xf32>
    %86 = vector.broadcast %85 : vector<8x16x1xf32> to vector<8x16x16xf32>
    %87 = arith.mulf %82, %86 : vector<8x16x16xf32>
    "tpu.trace_start"() <{level = 10 : i32, message = "bqk,bkd->bqd"}> : () -> ()
    %cst_32 = arith.constant dense<0.000000e+00> : vector<8x16x32xf32>
    %88 = tpu.matmul %87, %69, %cst_32 {dimension_numbers = #tpu.dot_dimension_numbers<[2], [1], [1], [2], [0, 0, 0, 1, 1, 2], [0], [0]>} : vector<8x16x16xf32>, vector<8x16x32xf32>, vector<8x16x32xf32> -> vector<8x16x32xf32>
    "tpu.trace_stop"() : () -> ()
    %89 = vector.extract_strided_slice %38 {offsets = [0, 0, 64], sizes = [8, 16, 32], strides = [1, 1, 1]} : vector<8x16x384xf32> to vector<8x16x32xf32>
    %90 = vector.extract_strided_slice %38 {offsets = [0, 0, 192], sizes = [8, 16, 32], strides = [1, 1, 1]} : vector<8x16x384xf32> to vector<8x16x32xf32>
    %91 = vector.extract_strided_slice %38 {offsets = [0, 0, 320], sizes = [8, 16, 32], strides = [1, 1, 1]} : vector<8x16x384xf32> to vector<8x16x32xf32>
    "tpu.trace_start"() <{level = 10 : i32, message = "bqd,bkd->bqk"}> : () -> ()
    %cst_33 = arith.constant dense<0.000000e+00> : vector<8x16x16xf32>
    %92 = tpu.matmul %89, %90, %cst_33 {dimension_numbers = #tpu.dot_dimension_numbers<[2], [2], [1], [1], [0, 0, 0, 1, 1, 1], [0], [0]>} : vector<8x16x32xf32>, vector<8x16x32xf32>, vector<8x16x16xf32> -> vector<8x16x16xf32>
    %cst_34 = arith.constant -1.000000e+09 : f32
    "tpu.trace_stop"() : () -> ()
    %93 = vector.shape_cast %43 : vector<8x1x16xi1> to vector<8x1x16xi1>
    %94 = vector.broadcast %93 : vector<8x1x16xi1> to vector<8x16x16xi1>
    %95 = vector.broadcast %cst_34 : f32 to vector<8x16x16xf32>
    %96 = arith.select %94, %95, %92 : vector<8x16x16xi1>, vector<8x16x16xf32>
    %97 = vector.extract_strided_slice %40 {offsets = [0, 2, 0, 0], sizes = [8, 1, 16, 16], strides = [1, 1, 1, 1]} : vector<8x4x16x16xf32> to vector<8x1x16x16xf32>
    %98 = vector.shape_cast %97 : vector<8x1x16x16xf32> to vector<8x16x16xf32>
    %99 = arith.addf %96, %98 : vector<8x16x16xf32>
    %cst_35 = arith.constant dense<0xFF800000> : vector<8x16xf32>
    %100 = vector.multi_reduction <maximumf>, %99, %cst_35 [2] : vector<8x16x16xf32> to vector<8x16xf32>
    %101 = vector.shape_cast %100 : vector<8x16xf32> to vector<8x16x1xf32>
    %102 = vector.broadcast %101 : vector<8x16x1xf32> to vector<8x16x16xf32>
    %103 = arith.subf %99, %102 : vector<8x16x16xf32>
    %104 = math.exp %103 : vector<8x16x16xf32>
    %cst_36 = arith.constant dense<0.000000e+00> : vector<8x16xf32>
    %105 = vector.multi_reduction <add>, %104, %cst_36 [2] : vector<8x16x16xf32> to vector<8x16xf32>
    %106 = vector.shape_cast %105 : vector<8x16xf32> to vector<8x16x1xf32>
    %107 = tpu.reciprocal %106 {approx = true} : vector<8x16x1xf32> -> vector<8x16x1xf32>
    %108 = vector.broadcast %107 : vector<8x16x1xf32> to vector<8x16x16xf32>
    %109 = arith.mulf %104, %108 : vector<8x16x16xf32>
    "tpu.trace_start"() <{level = 10 : i32, message = "bqk,bkd->bqd"}> : () -> ()
    %cst_37 = arith.constant dense<0.000000e+00> : vector<8x16x32xf32>
    %110 = tpu.matmul %109, %91, %cst_37 {dimension_numbers = #tpu.dot_dimension_numbers<[2], [1], [1], [2], [0, 0, 0, 1, 1, 2], [0], [0]>} : vector<8x16x16xf32>, vector<8x16x32xf32>, vector<8x16x32xf32> -> vector<8x16x32xf32>
    "tpu.trace_stop"() : () -> ()
    %111 = vector.extract_strided_slice %38 {offsets = [0, 0, 96], sizes = [8, 16, 32], strides = [1, 1, 1]} : vector<8x16x384xf32> to vector<8x16x32xf32>
    %112 = vector.extract_strided_slice %38 {offsets = [0, 0, 224], sizes = [8, 16, 32], strides = [1, 1, 1]} : vector<8x16x384xf32> to vector<8x16x32xf32>
    %113 = vector.extract_strided_slice %38 {offsets = [0, 0, 352], sizes = [8, 16, 32], strides = [1, 1, 1]} : vector<8x16x384xf32> to vector<8x16x32xf32>
    "tpu.trace_start"() <{level = 10 : i32, message = "bqd,bkd->bqk"}> : () -> ()
    %cst_38 = arith.constant dense<0.000000e+00> : vector<8x16x16xf32>
    %114 = tpu.matmul %111, %112, %cst_38 {dimension_numbers = #tpu.dot_dimension_numbers<[2], [2], [1], [1], [0, 0, 0, 1, 1, 1], [0], [0]>} : vector<8x16x32xf32>, vector<8x16x32xf32>, vector<8x16x16xf32> -> vector<8x16x16xf32>
    %cst_39 = arith.constant -1.000000e+09 : f32
    "tpu.trace_stop"() : () -> ()
    %115 = vector.shape_cast %43 : vector<8x1x16xi1> to vector<8x1x16xi1>
    %116 = vector.broadcast %115 : vector<8x1x16xi1> to vector<8x16x16xi1>
    %117 = vector.broadcast %cst_39 : f32 to vector<8x16x16xf32>
    %118 = arith.select %116, %117, %114 : vector<8x16x16xi1>, vector<8x16x16xf32>
    %119 = vector.extract_strided_slice %40 {offsets = [0, 3, 0, 0], sizes = [8, 1, 16, 16], strides = [1, 1, 1, 1]} : vector<8x4x16x16xf32> to vector<8x1x16x16xf32>
    %120 = vector.shape_cast %119 : vector<8x1x16x16xf32> to vector<8x16x16xf32>
    %121 = arith.addf %118, %120 : vector<8x16x16xf32>
    %cst_40 = arith.constant dense<0xFF800000> : vector<8x16xf32>
    %122 = vector.multi_reduction <maximumf>, %121, %cst_40 [2] : vector<8x16x16xf32> to vector<8x16xf32>
    %123 = vector.shape_cast %122 : vector<8x16xf32> to vector<8x16x1xf32>
    %124 = vector.broadcast %123 : vector<8x16x1xf32> to vector<8x16x16xf32>
    %125 = arith.subf %121, %124 : vector<8x16x16xf32>
    %126 = math.exp %125 : vector<8x16x16xf32>
    %cst_41 = arith.constant dense<0.000000e+00> : vector<8x16xf32>
    %127 = vector.multi_reduction <add>, %126, %cst_41 [2] : vector<8x16x16xf32> to vector<8x16xf32>
    %128 = vector.shape_cast %127 : vector<8x16xf32> to vector<8x16x1xf32>
    %129 = tpu.reciprocal %128 {approx = true} : vector<8x16x1xf32> -> vector<8x16x1xf32>
    %130 = vector.broadcast %129 : vector<8x16x1xf32> to vector<8x16x16xf32>
    %131 = arith.mulf %126, %130 : vector<8x16x16xf32>
    "tpu.trace_start"() <{level = 10 : i32, message = "bqk,bkd->bqd"}> : () -> ()
    %cst_42 = arith.constant dense<0.000000e+00> : vector<8x16x32xf32>
    %132 = tpu.matmul %131, %113, %cst_42 {dimension_numbers = #tpu.dot_dimension_numbers<[2], [1], [1], [2], [0, 0, 0, 1, 1, 2], [0], [0]>} : vector<8x16x16xf32>, vector<8x16x32xf32>, vector<8x16x32xf32> -> vector<8x16x32xf32>
    "tpu.trace_stop"() : () -> ()
    %133 = tpu.concatenate %66, %88, %110, %132 in 2 : vector<8x16x32xf32>, vector<8x16x32xf32>, vector<8x16x32xf32>, vector<8x16x32xf32> -> vector<8x16x128xf32>
    %134 = vector.shape_cast %44 : vector<8x16xf32> to vector<8x16x1xf32>
    %135 = vector.broadcast %134 : vector<8x16x1xf32> to vector<8x16x128xf32>
    %136 = arith.mulf %133, %135 : vector<8x16x128xf32>
    %c0_43 = arith.constant 0 : index
    %c0_44 = arith.constant 0 : index
    %c0_45 = arith.constant 0 : index
    %137 = vector.load %arg8[%c0_43, %c0_44, %c0_45] : memref<8x16x128xf32, #tpu.memory_space<vmem>>, vector<8x16x128xf32>
    tpu.vector_store %arg8[%c0_43, %c0_44, %c0_45], %136 {strides = array<i32>} : memref<8x16x128xf32, #tpu.memory_space<vmem>>, vector<8x16x128xf32>,
    return
  }
  func.func @transform_0(%arg0: i32) -> (i32, i32, i32) {
    %c0_i32 = arith.constant 0 : i32
    %c0_i32_0 = arith.constant 0 : i32
    %c0_i32_1 = arith.constant 0 : i32
    return %arg0, %c0_i32, %c0_i32_0 : i32, i32, i32
  }
  func.func @transform_1(%arg0: i32) -> (i32, i32, i32, i32) {
    %c0_i32 = arith.constant 0 : i32
    %c0_i32_0 = arith.constant 0 : i32
    %c0_i32_1 = arith.constant 0 : i32
    %c0_i32_2 = arith.constant 0 : i32
    return %arg0, %c0_i32, %c0_i32_0, %c0_i32_1 : i32, i32, i32, i32
  }
  func.func @transform_2(%arg0: i32) -> (i32, i32, i32) {
    %c0_i32 = arith.constant 0 : i32
    %c0_i32_0 = arith.constant 0 : i32
    %c0_i32_1 = arith.constant 0 : i32
    return %arg0, %c0_i32, %c0_i32_0 : i32, i32, i32
  }
  func.func @transform_3(%arg0: i32) -> (i32, i32) {
    %c0_i32 = arith.constant 0 : i32
    %c0_i32_0 = arith.constant 0 : i32
    %c0_i32_1 = arith.constant 0 : i32
    return %c0_i32, %c0_i32_0 : i32, i32
  }
  func.func @transform_4(%arg0: i32) -> (i32, i32) {
    %c0_i32 = arith.constant 0 : i32
    %c0_i32_0 = arith.constant 0 : i32
    %c0_i32_1 = arith.constant 0 : i32
    return %c0_i32, %c0_i32_0 : i32, i32
  }
  func.func @transform_5(%arg0: i32) -> (i32, i32) {
    %c0_i32 = arith.constant 0 : i32
    %c0_i32_0 = arith.constant 0 : i32
    %c0_i32_1 = arith.constant 0 : i32
    return %c0_i32, %c0_i32_0 : i32, i32
  }
  func.func @transform_6(%arg0: i32) -> (i32, i32) {
    %c0_i32 = arith.constant 0 : i32
    %c0_i32_0 = arith.constant 0 : i32
    %c0_i32_1 = arith.constant 0 : i32
    return %c0_i32, %c0_i32_0 : i32, i32
  }
  func.func @transform_7(%arg0: i32) -> (i32, i32, i32) {
    %c0_i32 = arith.constant 0 : i32
    %c0_i32_0 = arith.constant 0 : i32
    %c0_i32_1 = arith.constant 0 : i32
    return %arg0, %c0_i32, %c0_i32_0 : i32, i32, i32
  }
}

</mosaic_0001>

<bundles_post_ra>
// kernel: encoder_layer_simple_forward.1
= control target key start
LH: loop header
LB: loop body
LE: loop exit
PB: predicated region body
PF: predicated region fallthrough
CT: control target
= control target key end

     0   :  { %s11887_s0 = inlined_call_operand.vmem [shape: f32[8,16,128], index: 0, kind: input, shape index: {}]   ;;  %s11888_s1 = inlined_call_operand.vmem [shape: bf16[8,4,16,16], index: 1, kind: input, shape index: {}]   ;;  %s11889_s2 = inlined_call_operand.vmem [shape: f32[8,1,16], index: 2, kind: input, shape index: {}]   ;;  %s11890_s3 = inlined_call_operand.vmem [shape: f32[1,128], index: 3, kind: input, shape index: {}]   ;;  %s11891_s4 = inlined_call_operand.vmem [shape: f32[1,128], index: 4, kind: input, shape index: {}]   ;;  %s11892_s5 = inlined_call_operand.vmem [shape: bf16[128,384], index: 5, kind: input, shape index: {}]   ;;  %s11893_s6 = inlined_call_operand.vmem [shape: f32[1,384], index: 6, kind: input, shape index: {}]   ;;  %s11894_s7 = inlined_call_operand.hbm [shape: f32[8,16,128], index: 7, kind: output, shape index: {}]  }
   0x1   :  { %v28_v0 = vld [vmem:[%s11887_s0] sm:$0xff]  ;;  %v30_v1 = vld [vmem:[%s11887_s0 + $0x10] sm:$0xff]  ;;  %v29_v2 = vld [vmem:[%s11887_s0 + $0x8] sm:$0xff] }
   0x2   :  { %44 = vadd.xlane.f32.xlu0 %v28_v0  ;;  %48 = vadd.xlane.f32.xlu1 %v30_v1  ;;  %v31_v3 = vld [vmem:[%s11887_s0 + $0x18] sm:$0xff]  ;;  %v32_v4 = vld [vmem:[%s11887_s0 + $0x20] sm:$0xff]  ;;  %v33_v5 = vld [vmem:[%s11887_s0 + $0x28] sm:$0xff] }
   0x3   :  { %v34_v6 = vld [vmem:[%s11887_s0 + $0x30] sm:$0xff]  ;;  %v35_v7 = vld [vmem:[%s11887_s0 + $0x38] sm:$0xff]  ;;  %v9266_v8 = vld [vmem:[%s11887_s0 + $0x40] sm:$0xff] }
   0x4   :  { %v9271_v9 = vld [vmem:[%s11887_s0 + $0x48] sm:$0xff] }
   0x6   :  { %46 = vadd.xlane.f32.xlu0 %v29_v2  ;;  %50 = vadd.xlane.f32.xlu1 %v31_v3 }
   0xa   :  { %52 = vadd.xlane.f32.xlu0 %v32_v4  ;;  %54 = vadd.xlane.f32.xlu1 %v33_v5 }
   0xe   :  { %56 = vadd.xlane.f32.xlu0 %v34_v6  ;;  %58 = vadd.xlane.f32.xlu1 %v35_v7 }
   0xf   :  { %12 = vsyncpa [#allocation3], 0  ;;  %v9278_v10 = vld [vmem:[%s11887_s0 + $0x50] sm:$0xff]  ;;  %v9283_v11 = vld [vmem:[%s11887_s0 + $0x58] sm:$0xff]  ;;  %vm806_vm0 = vcmask 261120   ;;  %s9193_s13 = smov 96  }
  0x10   :  { %v9290_v12 = vld [vmem:[%s11887_s0 + $0x60] sm:$0xff]  ;;  %v9295_v13 = vld [vmem:[%s11887_s0 + $0x68] sm:$0xff]  ;;  %v9302_v14 = vld [vmem:[%s11887_s0 + $0x70] sm:$0xff]  ;;  %vm1583_vm4 = vcmask 130048   ;;  %s9194_s17 = smov 64   ;;  %s9195_s10 = smov 32  }
  0x11   :  { %v9307_v15 = vld [vmem:[%s11887_s0 + $0x78] sm:$0xff]  ;;  %v8836_v17 = vld [vmem:[%s11892_s5 + $0xa8] ss:$12 sps:$4 sm:$0xff]  }
  0x12   :  { %60 = vadd.xlane.f32.xlu0 %v9266_v8  ;;  %62 = vadd.xlane.f32.xlu1 %v9271_v9  ;;  %v8834_v16 = vld [vmem:[%s11892_s5 + $0xac] ss:$12 sps:$4 sm:$0xff]   ;;  %v8837_v53 = vld [vmem:[%s11892_s5 + $0x94] ss:$12 sps:$4 sm:$0xff]   ;;  %v8839_v54 = vld [vmem:[%s11892_s5 + $0xb0] ss:$12 sps:$4 sm:$0xff]  }
  0x13   :  { %452 = vmatprep.subr.bf16.mxu0 %v8834_v16  ;;  %v8840_v55 = vld [vmem:[%s11892_s5 + $0x90] ss:$12 sps:$4 sm:$0xff]   ;;  %8347 = vmatprep.subr.bf16.mxu1 %v8839_v54 }
  0x14   :  { %453 = vmatpush1.bf16.msra.mxu0 %v8836_v17  ;;  %8348 = vmatpush3.bf16.msra.mxu1 %v8839_v54 }
  0x15   :  { %454 = vmatprep.subr.bf16.mxu0 %v8837_v53 }
  0x16   :  { %64 = vadd.xlane.f32.xlu0 %v9278_v10  ;;  %66 = vadd.xlane.f32.xlu1 %v9283_v11 }
  0x18   :  { %455 = vmatpush1.bf16.msra.mxu0 %v8840_v55 }
  0x1a   :  { %68 = vadd.xlane.f32.xlu0 %v9290_v12  ;;  %70 = vadd.xlane.f32.xlu1 %v9295_v13 }
  0x1e   :  { %72 = vadd.xlane.f32.xlu0 %v9302_v14  ;;  %74 = vadd.xlane.f32.xlu1 %v9307_v15 }
  0x8b   :  { %v45_v18 = vpop.xlane.xlu0 %44  ;;  %v49_v19 = vpop.xlane.xlu1 %48 }
  0x8c   :  { %v77_v20 = vmul.f32 0.0078125, %v45_v18  ;;  %v79_v21 = vmul.f32 0.0078125, %v49_v19 }
  0x8e   :  { %v9317_v22 = vsub.f32 %v28_v0, %v77_v20  ;;  %v9319_v23 = vsub.f32 %v30_v1, %v79_v21  ;;  %v8841_v0 = vld [vmem:[%s11892_s5 + $0x7c] ss:$12 sps:$4 sm:$0xff]   ;;  %v8843_v1 = vld [vmem:[%s11892_s5 + $0x98] ss:$12 sps:$4 sm:$0xff]   ;;  %v8848_v20 = vld [vmem:[%s11892_s5 + $0x60] ss:$12 sps:$4 sm:$0xff]  }
  0x8f   :  { %v47_v24 = vpop.xlane.xlu0 %46  ;;  %v51_v25 = vpop.xlane.xlu1 %50  ;;  %456 = vmatprep.subr.bf16.mxu0 %v8841_v0  ;;  %8349 = vmatprep.subr.bf16.mxu1 %v8843_v1 }
  0x90   :  { %v78_v26 = vmul.f32 0.0078125, %v47_v24  ;;  %v109_v27 = vmul.f32 %v9317_v22, %v9317_v22  ;;  %v80_v28 = vmul.f32 0.0078125, %v51_v25  ;;  %v111_v29 = vmul.f32 %v9319_v23, %v9319_v23  ;;  %8350 = vmatpush3.bf16.msra.mxu1 %v8843_v1 }
  0x92   :  { %125 = vadd.xlane.f32.xlu0 %v109_v27  ;;  %v9325_v30 = vsub.f32 %v29_v2, %v78_v26  ;;  %v9327_v31 = vsub.f32 %v31_v3, %v80_v28 }
  0x93   :  { %v53_v32 = vpop.xlane.xlu0 %52  ;;  %v55_v33 = vpop.xlane.xlu1 %54 }
  0x94   :  { %v81_v34 = vmul.f32 0.0078125, %v53_v32  ;;  %v110_v35 = vmul.f32 %v9325_v30, %v9325_v30  ;;  %v82_v36 = vmul.f32 0.0078125, %v55_v33  ;;  %v112_v37 = vmul.f32 %v9327_v31, %v9327_v31  ;;  %v8852_v33 = vld [vmem:[%s11892_s5 + $0x48] ss:$12 sps:$4 sm:$0xff]  }
  0x96   :  { %129 = vadd.xlane.f32.xlu0 %v111_v29  ;;  %127 = vadd.xlane.f32.xlu1 %v110_v35  ;;  %v9333_v38 = vsub.f32 %v32_v4, %v81_v34  ;;  %v9335_v39 = vsub.f32 %v33_v5, %v82_v36  ;;  %v8844_v5 = vld [vmem:[%s11892_s5 + $0x78] ss:$12 sps:$4 sm:$0xff]   ;;  %v8853_v35 = vld [vmem:[%s11892_s5 + $0x34] ss:$12 sps:$4 sm:$0xff]   ;;  %v8856_v36 = vld [vmem:[%s11892_s5 + $0x30] ss:$12 sps:$4 sm:$0xff]  }
  0x97   :  { %v57_v40 = vpop.xlane.xlu0 %56  ;;  %v59_v41 = vpop.xlane.xlu1 %58  ;;  %457 = vmatpush1.bf16.msra.mxu0 %v8844_v5 }
  0x98   :  { %v83_v42 = vmul.f32 0.0078125, %v57_v40  ;;  %v113_v43 = vmul.f32 %v9333_v38, %v9333_v38  ;;  %v84_v44 = vmul.f32 0.0078125, %v59_v41  ;;  %v114_v45 = vmul.f32 %v9335_v39, %v9335_v39  ;;  %v8859_v40 = vld [vmem:[%s11892_s5 + $0x38] ss:$12 sps:$4 sm:$0xff]  }
  0x99   :  { %v8860_v41 = vld [vmem:[%s11892_s5 + $0x18] ss:$12 sps:$4 sm:$0xff]  }
  0x9a   :  { %131 = vadd.xlane.f32.xlu1 %v112_v37  ;;  %133 = vadd.xlane.f32.xlu0 %v113_v43  ;;  %v9341_v46 = vsub.f32 %v34_v6, %v83_v42  ;;  %v9343_v47 = vsub.f32 %v35_v7, %v84_v44  ;;  %v8857_v37 = vld [vmem:[%s11892_s5 + $0x1c] ss:$12 sps:$4 sm:$0xff]   ;;  %v8861_v42 = vld [vmem:[%s11892_s5 + $0x4] ss:$12 sps:$4 sm:$0xff]   ;;  %v8863_v43 = vld [vmem:[%s11892_s5 + $0x20] ss:$12 sps:$4 sm:$0xff]  }
  0x9b   :  { %v61_v48 = vpop.xlane.xlu0 %60  ;;  %v63_v49 = vpop.xlane.xlu1 %62  ;;  %v8864_v44 = vld [vmem:[%s11892_s5] ss:$12 sps:$4 sm:$0xff]  }
  0x9c   :  { %v85_v50 = vmul.f32 0.0078125, %v61_v48  ;;  %v115_v51 = vmul.f32 %v9341_v46, %v9341_v46  ;;  %v86_v52 = vmul.f32 0.0078125, %v63_v49  ;;  %v116_v56 = vmul.f32 %v9343_v47, %v9343_v47 }
  0x9d   :  { %v11895_v48 = vmov 0  }
  0x9e   :  { %135 = vadd.xlane.f32.xlu1 %v114_v45  ;;  %137 = vadd.xlane.f32.xlu0 %v115_v51  ;;  %v9359_v57 = vsub.f32 %v9266_v8, %v85_v50  ;;  %v9362_v58 = vsub.f32 %v9271_v9, %v86_v52  ;;  %v8865_v45 = vld [vmem:[%s11892_s5 + $0x8] ss:$12 sps:$4 sm:$0xff]  }
  0x9f   :  { %v65_v59 = vpop.xlane.xlu0 %64  ;;  %v67_v60 = vpop.xlane.xlu1 %66  ;;  %484 = vmatprep.mubr.bf16.mxu0 %v11895_v48 }
  0xa0   :  { %v87_v61 = vmul.f32 0.0078125, %v65_v59  ;;  %v117_v62 = vmul.f32 %v9359_v57, %v9359_v57  ;;  %v88_v63 = vmul.f32 0.0078125, %v67_v60  ;;  %v118_v2 = vmul.f32 %v9362_v58, %v9362_v58 }
  0xa2   :  { %139 = vadd.xlane.f32.xlu1 %v116_v56  ;;  %141 = vadd.xlane.f32.xlu0 %v117_v62  ;;  %v9375_v3 = vsub.f32 %v9278_v10, %v87_v61  ;;  %v9378_v4 = vsub.f32 %v9283_v11, %v88_v63  ;;  %v8845_v10 = vld [vmem:[%s11892_s5 + $0x64] ss:$12 sps:$4 sm:$0xff]   ;;  %v8847_v11 = vld [vmem:[%s11892_s5 + $0x80] ss:$12 sps:$4 sm:$0xff]  }
  0xa3   :  { %v69_v6 = vpop.xlane.xlu0 %68  ;;  %v71_v7 = vpop.xlane.xlu1 %70  ;;  %458 = vmatprep.subr.bf16.mxu0 %v8845_v10  ;;  %8351 = vmatprep.subr.bf16.mxu1 %v8847_v11 }
  0xa4   :  { %v89_v8 = vmul.f32 0.0078125, %v69_v6  ;;  %v119_v9 = vmul.f32 %v9375_v3, %v9375_v3  ;;  %v90_v16 = vmul.f32 0.0078125, %v71_v7  ;;  %v120_v17 = vmul.f32 %v9378_v4, %v9378_v4  ;;  %459 = vmatpush1.bf16.msra.mxu0 %v8848_v20  ;;  %8352 = vmatpush3.bf16.msra.mxu1 %v8847_v11 }
  0xa6   :  { %143 = vadd.xlane.f32.xlu1 %v118_v2  ;;  %145 = vadd.xlane.f32.xlu0 %v119_v9  ;;  %v9394_v18 = vsub.f32 %v9290_v12, %v89_v8  ;;  %v9397_v19 = vsub.f32 %v9295_v13, %v90_v16  ;;  %v8849_v12 = vld [vmem:[%s11892_s5 + $0x4c] ss:$12 sps:$4 sm:$0xff]   ;;  %v8851_v13 = vld [vmem:[%s11892_s5 + $0x68] ss:$12 sps:$4 sm:$0xff]  }
  0xa7   :  { %v73_v21 = vpop.xlane.xlu0 %72  ;;  %v75_v24 = vpop.xlane.xlu1 %74  ;;  %460 = vmatprep.subr.bf16.mxu0 %v8849_v12  ;;  %8353 = vmatprep.subr.bf16.mxu1 %v8851_v13 }
  0xa8   :  { %v91_v25 = vmul.f32 0.0078125, %v73_v21  ;;  %v121_v26 = vmul.f32 %v9394_v18, %v9394_v18  ;;  %v92_v27 = vmul.f32 0.0078125, %v75_v24  ;;  %v122_v28 = vmul.f32 %v9397_v19, %v9397_v19  ;;  %461 = vmatpush1.bf16.msra.mxu0 %v8852_v33  ;;  %8354 = vmatpush3.bf16.msra.mxu1 %v8851_v13 }
  0xa9   :  { %462 = vmatprep.subr.bf16.mxu0 %v8853_v35 }
  0xaa   :  { %147 = vadd.xlane.f32.xlu1 %v120_v17  ;;  %149 = vadd.xlane.f32.xlu0 %v121_v26  ;;  %v9413_v29 = vsub.f32 %v9302_v14, %v91_v25  ;;  %v9416_v32 = vsub.f32 %v9307_v15, %v92_v27  ;;  %v8855_v14 = vld [vmem:[%s11892_s5 + $0x50] ss:$12 sps:$4 sm:$0xff]   ;;  %v9460_v26 = vld [vmem:[%s11890_s3] ss:$0 sm:$0xff] }
  0xab   :  { %8355 = vmatprep.subr.bf16.mxu1 %v8855_v14 }
  0xac   :  { %v123_v34 = vmul.f32 %v9413_v29, %v9413_v29  ;;  %v124_v15 = vmul.f32 %v9416_v32, %v9416_v32  ;;  %463 = vmatpush1.bf16.msra.mxu0 %v8856_v36  ;;  %8356 = vmatpush3.bf16.msra.mxu1 %v8855_v14 }
  0xad   :  { %464 = vmatprep.subr.bf16.mxu0 %v8857_v37  ;;  %8357 = vmatprep.subr.bf16.mxu1 %v8859_v40 }
  0xae   :  { %151 = vadd.xlane.f32.xlu1 %v122_v28  ;;  %153 = vadd.xlane.f32.xlu0 %v123_v34 }
  0xb0   :  { %465 = vmatpush1.bf16.msra.mxu0 %v8860_v41  ;;  %8358 = vmatpush3.bf16.msra.mxu1 %v8859_v40 }
  0xb1   :  { %466 = vmatprep.subr.bf16.mxu0 %v8861_v42  ;;  %8359 = vmatprep.subr.bf16.mxu1 %v8863_v43 }
  0xb2   :  { %155 = vadd.xlane.f32.xlu1 %v124_v15 }
  0xb4   :  { %467 = vmatpush1.bf16.msra.mxu0 %v8864_v44  ;;  %8360 = vmatpush3.bf16.msra.mxu1 %v8863_v43 }
  0xb5   :  { %8361 = vmatprep.subr.bf16.mxu1 %v8865_v45 }
  0xb8   :  { %8362 = vmatpush3.bf16.msra.mxu1 %v8865_v45 }
 0x11b   :  { %v126_v49 = vpop.xlane.xlu0 %125 }
 0x11c   :  { %v157_v50 = vmul.f32 0.0078125, %v126_v49 }
 0x11e   :  { %v173_v51 = vadd.f32 1e-05, %v157_v50 }
 0x11f   :  { %v128_v52 = vpop.xlane.xlu1 %127  ;;  %v130_v53 = vpop.xlane.xlu0 %129 }
 0x120   :  { %8866 = vrsqrt.f32 %v173_v51  ;;  %v158_v54 = vmul.f32 0.0078125, %v128_v52  ;;  %v159_v55 = vmul.f32 0.0078125, %v130_v53 }
 0x122   :  { %v174_v56 = vadd.f32 1e-05, %v158_v54  ;;  %v175_v59 = vadd.f32 1e-05, %v159_v55 }
 0x123   :  { %v132_v60 = vpop.xlane.xlu1 %131  ;;  %v134_v61 = vpop.xlane.xlu0 %133 }
 0x124   :  { %8868 = vrsqrt.f32 %v174_v56  ;;  %v160_v62 = vmul.f32 0.0078125, %v132_v60  ;;  %v161_v63 = vmul.f32 0.0078125, %v134_v61 }
 0x125   :  { %8870 = vrsqrt.f32 %v175_v59 }
 0x126   :  { %v176_v0 = vadd.f32 1e-05, %v160_v62  ;;  %v177_v1 = vadd.f32 1e-05, %v161_v63 }
 0x127   :  { %v136_v2 = vpop.xlane.xlu1 %135  ;;  %v138_v5 = vpop.xlane.xlu0 %137 }
 0x128   :  { %8872 = vrsqrt.f32 %v176_v0  ;;  %v162_v6 = vmul.f32 0.0078125, %v136_v2  ;;  %v163_v7 = vmul.f32 0.0078125, %v138_v5 }
 0x129   :  { %8874 = vrsqrt.f32 %v177_v1 }
 0x12a   :  { %v178_v8 = vadd.f32 1e-05, %v162_v6  ;;  %v179_v9 = vadd.f32 1e-05, %v163_v7 }
 0x12b   :  { %v140_v16 = vpop.xlane.xlu1 %139  ;;  %v142_v10 = vpop.xlane.xlu0 %141 }
 0x12c   :  { %8876 = vrsqrt.f32 %v178_v8  ;;  %v164_v11 = vmul.f32 0.0078125, %v140_v16  ;;  %v165_v17 = vmul.f32 0.0078125, %v142_v10 }
 0x12d   :  { %v8867_v20 = vpop.eup %8866  ;;  %8878 = vrsqrt.f32 %v179_v9 }
 0x12e   :  { %v180_v21 = vadd.f32 1e-05, %v164_v11  ;;  %v181_v24 = vadd.f32 1e-05, %v165_v17  ;;  %v205_v25 = vmul.f32 %v8867_v20, %v9317_v22  ;;  %v9467_v22 = vld [vmem:[%s11891_s4] ss:$0 sm:$0xff] }
 0x12f   :  { %v144_v27 = vpop.xlane.xlu1 %143  ;;  %v146_v12 = vpop.xlane.xlu0 %145 }
 0x130   :  { %8880 = vrsqrt.f32 %v180_v21  ;;  %v166_v13 = vmul.f32 0.0078125, %v144_v27  ;;  %v167_v28 = vmul.f32 0.0078125, %v146_v12  ;;  %v228_v34 = vmul.f32 %v9460_v26, %v205_v25 }
 0x131   :  { %v8869_v33 = vpop.eup %8868  ;;  %8882 = vrsqrt.f32 %v181_v24 }
 0x132   :  { %v8871_v35 = vpop.eup %8870  ;;  %v182_v14 = vadd.f32 1e-05, %v166_v13  ;;  %v183_v15 = vadd.f32 1e-05, %v167_v28  ;;  %v206_v36 = vmul.f32 %v8869_v33, %v9325_v30  ;;  %v251_v49 = vadd.f32 %v9467_v22, %v228_v34 }
 0x133   :  { %v148_v37 = vpop.xlane.xlu1 %147  ;;  %v150_v40 = vpop.xlane.xlu0 %149  ;;  %v207_v41 = vmul.f32 %v8871_v35, %v9319_v23 }
 0x134   :  { %8884 = vrsqrt.f32 %v182_v14  ;;  %v168_v42 = vmul.f32 0.0078125, %v148_v37  ;;  %v169_v43 = vmul.f32 0.0078125, %v150_v40  ;;  %v229_v44 = vmul.f32 %v9460_v26, %v206_v36 }
 0x135   :  { %v8873_v45 = vpop.eup %8872  ;;  %8886 = vrsqrt.f32 %v183_v15  ;;  %v230_v23 = vmul.f32 %v9460_v26, %v207_v41 }
 0x136   :  { %v8875_v50 = vpop.eup %8874  ;;  %v184_v30 = vadd.f32 1e-05, %v168_v42  ;;  %v185_v51 = vadd.f32 1e-05, %v169_v43  ;;  %v252_v52 = vadd.f32 %v9467_v22, %v229_v44  ;;  %v208_v53 = vmul.f32 %v8873_v45, %v9327_v31 }
 0x137   :  { %v152_v54 = vpop.xlane.xlu1 %151  ;;  %v154_v55 = vpop.xlane.xlu0 %153  ;;  %v209_v56 = vmul.f32 %v8875_v50, %v9333_v38  ;;  %v253_v38 = vadd.f32 %v9467_v22, %v230_v23 }
 0x138   :  { %8888 = vrsqrt.f32 %v184_v30  ;;  %v170_v59 = vmul.f32 0.0078125, %v152_v54  ;;  %v171_v60 = vmul.f32 0.0078125, %v154_v55  ;;  %v267_v61 = vpack.c.bf16 %v252_v52, %v251_v49 }
 0x139   :  { %v8877_v62 = vpop.eup %8876  ;;  %8890 = vrsqrt.f32 %v185_v51  ;;  %v231_v63 = vmul.f32 %v9460_v26, %v208_v53  ;;  %v232_v5 = vmul.f32 %v9460_v26, %v209_v56 }
 0x13a   :  { %v8879_v0 = vpop.eup %8878  ;;  %v186_v1 = vadd.f32 1e-05, %v170_v59  ;;  %v187_v2 = vadd.f32 1e-05, %v171_v60  ;;  %485 = vmatmul.mubr.bf16.vlgmr.msra.gmra.mxu0 %v267_v61  ;;  %8363 = vmatprep.mubr.bf16.mxu1 %v267_v61  ;;  %v210_v31 = vmul.f32 %v8877_v62, %v9335_v39 }
 0x13b   :  { %v156_v6 = vpop.xlane.xlu1 %155  ;;  %v254_v7 = vadd.f32 %v9467_v22, %v231_v63  ;;  %494 = vmatprep.mubr.bf16.mxu0 %v11895_v48  ;;  %v211_v8 = vmul.f32 %v8879_v0, %v9341_v46  ;;  %v255_v21 = vadd.f32 %v9467_v22, %v232_v5 }
 0x13c   :  { %8892 = vrsqrt.f32 %v186_v1  ;;  %v172_v9 = vmul.f32 0.0078125, %v156_v6  ;;  %v233_v16 = vmul.f32 %v9460_v26, %v210_v31 }
 0x13d   :  { %v8881_v10 = vpop.eup %8880  ;;  %8894 = vrsqrt.f32 %v187_v2  ;;  %v268_v11 = vpack.c.bf16 %v254_v7, %v253_v38  ;;  %v234_v39 = vmul.f32 %v9460_v26, %v211_v8 }
 0x13e   :  { %v8883_v17 = vpop.eup %8882  ;;  %v188_v20 = vadd.f32 1e-05, %v172_v9  ;;  %v256_v24 = vadd.f32 %v9467_v22, %v233_v16  ;;  %v212_v25 = vmul.f32 %v8881_v10, %v9343_v47 }
 0x13f   :  { %8364 = vmatmul.mubr.bf16.vlgmr.msra.gmra.mxu1 %v268_v11  ;;  %v213_v46 = vmul.f32 %v8883_v17, %v9359_v57  ;;  %v257_v28 = vadd.f32 %v9467_v22, %v234_v39 }
 0x140   :  { %8896 = vrsqrt.f32 %v188_v20  ;;  %v269_v27 = vpack.c.bf16 %v256_v24, %v255_v21  ;;  %v235_v12 = vmul.f32 %v9460_v26, %v212_v25 }
 0x141   :  { %v8885_v13 = vpop.eup %8884  ;;  %v236_v14 = vmul.f32 %v9460_v26, %v213_v46 }
 0x142   :  { %v8887_v33 = vpop.eup %8886  ;;  %495 = vmatmul.mubr.bf16.gmra.mxu0 %v268_v11  ;;  %8367 = vmatprep.mubr.bf16.mxu1 %v269_v27  ;;  %v258_v34 = vadd.f32 %v9467_v22, %v235_v12  ;;  %v214_v35 = vmul.f32 %v8885_v13, %v9362_v58 }
 0x143   :  { %504 = vmatprep.mubr.bf16.mxu0 %v11895_v48  ;;  %v215_v47 = vmul.f32 %v8887_v33, %v9375_v3  ;;  %v259_v41 = vadd.f32 %v9467_v22, %v236_v14 }
 0x144   :  { %v270_v57 = vpack.c.bf16 %v258_v34, %v257_v28  ;;  %v237_v15 = vmul.f32 %v9460_v26, %v214_v35 }
 0x145   :  { %v8889_v36 = vpop.eup %8888  ;;  %v238_v37 = vmul.f32 %v9460_v26, %v215_v47 }
 0x146   :  { %v8891_v40 = vpop.eup %8890  ;;  %v260_v42 = vadd.f32 %v9467_v22, %v237_v15  ;;  %v216_v43 = vmul.f32 %v8889_v36, %v9378_v4 }
 0x147   :  { %8368 = vmatmul.mubr.bf16.gmra.mxu1 %v270_v57  ;;  %v217_v58 = vmul.f32 %v8891_v40, %v9394_v18  ;;  %v261_v49 = vadd.f32 %v9467_v22, %v238_v37 }
 0x148   :  { %v271_v44 = vpack.c.bf16 %v260_v42, %v259_v41  ;;  %v239_v45 = vmul.f32 %v9460_v26, %v216_v43 }
 0x149   :  { %v8893_v3 = vpop.eup %8892  ;;  %v240_v52 = vmul.f32 %v9460_v26, %v217_v58 }
 0x14a   :  { %v8895_v50 = vpop.eup %8894  ;;  %505 = vmatmul.mubr.bf16.gmra.mxu0 %v269_v27  ;;  %8371 = vmatprep.mubr.bf16.mxu1 %v271_v44  ;;  %v262_v30 = vadd.f32 %v9467_v22, %v239_v45  ;;  %v218_v51 = vmul.f32 %v8893_v3, %v9397_v19 }
 0x14b   :  { %514 = vmatprep.mubr.bf16.mxu0 %v11895_v48  ;;  %v219_v4 = vmul.f32 %v8895_v50, %v9413_v29  ;;  %v263_v55 = vadd.f32 %v9467_v22, %v240_v52 }
 0x14c   :  { %v272_v18 = vpack.c.bf16 %v262_v30, %v261_v49  ;;  %v241_v53 = vmul.f32 %v9460_v26, %v218_v51 }
 0x14d   :  { %v8897_v54 = vpop.eup %8896  ;;  %v242_v59 = vmul.f32 %v9460_v26, %v219_v4 }
 0x14e   :  { %v264_v23 = vadd.f32 %v9467_v22, %v241_v53  ;;  %v220_v56 = vmul.f32 %v8897_v54, %v9416_v32  ;;  %v309_v32 = vlaneseq }
 0x14f   :  { %8372 = vmatmul.mubr.bf16.gmra.mxu1 %v272_v18  ;;  %v265_v29 = vadd.f32 %v9467_v22, %v242_v59 }
 0x150   :  { %v273_v19 = vpack.c.bf16 %v264_v23, %v263_v55  ;;  %v243_v60 = vmul.f32 %v9460_v26, %v220_v56  ;;  %v310_v26 = vshrl.u32 %v309_v32, 7 }
 0x152   :  { %515 = vmatmul.mubr.bf16.gmra.mxu0 %v270_v57  ;;  %8375 = vmatprep.mubr.bf16.mxu1 %v273_v19  ;;  %v266_v61 = vadd.f32 %v9467_v22, %v243_v60  ;;  %v9521_v63 = vsub.s32 0, %v310_v26  ;;  %v307_v22 = vld [vmem:[%s11893_s6] sm:$0x7]  ;;  %v315_v0 = vsub.s32 1, %v310_v26  ;;  %v319_v11 = vsub.s32 2, %v310_v26 }
 0x153   :  { %524 = vmatprep.mubr.bf16.mxu0 %v11895_v48 }
 0x154   :  { %v274_v62 = vpack.c.bf16 %v266_v61, %v265_v29  ;;  %v9527_v1 = vrot.slane %v307_v22, %v9521_v63  ;;  %v9529_v2 = vrot.slane %v307_v22, %v315_v0  ;;  %v9567_v25 = vrot.slane %v307_v22, %v319_v11 }
 0x157   :  { %8376 = vmatmul.mubr.bf16.gmra.mxu1 %v274_v62 }
 0x15a   :  { %525 = vmatmul.mubr.bf16.gmra.mxu0 %v271_v44 }
 0x15b   :  { %534 = vmatprep.mubr.bf16.mxu0 %v11895_v48 }
 0x162   :  { %535 = vmatmul.mubr.bf16.gmra.mxu0 %v272_v18 }
 0x163   :  { %544 = vmatprep.mubr.bf16.mxu0 %v11895_v48 }
 0x16a   :  { %545 = vmatmul.mubr.bf16.gmra.mxu0 %v273_v19 }
 0x16b   :  { %554 = vmatprep.mubr.bf16.mxu0 %v11895_v48 }
 0x172   :  { %555 = vmatmul.mubr.bf16.gmra.mxu0 %v274_v62 }
 0x1fa   :  { %v486_v31 = vpop.f32.mrf.mxu0 }
 0x1fb   :  { %v9532_v5 = vadd.f32 %v486_v31, %v9527_v1 }
 0x1fc   :  { %v488_v6 = vpop.f32.mrf.mxu0 }
 0x1fd   :  { %v9535_v38 = vadd.f32 %v488_v6, %v9529_v2  ;;  %2408 = vrot.lane.b32.xlu0 %v9532_v5, %s9193_s13  ;;  %8383 = vmatprep.mubr.msk.f32.mxu1 %vm806_vm0, %v9532_v5 }
 0x1fe   :  { %v490_v7 = vpop.f32.mrf.mxu0 }
 0x1ff   :  { %v9541_v8 = vpop.f32.mrf.mxu1  ;;  %2412 = vrot.lane.b32.xlu1 %v9535_v38, %s9193_s13  ;;  %v9578_v33 = vadd.f32 %v490_v7, %v9527_v1 }
 0x200   :  { %v492_v9 = vpop.f32.mrf.mxu0 }
 0x201   :  { %v9546_v16 = vadd.f32 %v492_v9, %v9529_v2  ;;  %v9548_v10 = vpop.f32.mrf.mxu1  ;;  %12003 = vst [vmem:[#allocation8_spill] sm:$0xff] %v9578_v33 }
 0x202   :  { %v496_v39 = vpop.f32.mrf.mxu0 }
 0x203   :  { %v9551_v17 = vadd.f32 %v496_v39, %v9527_v1  ;;  %v9553_v20 = vpop.f32.mrf.mxu1  ;;  %8379 = vmatprep.subr.msk.mxu1 %vm806_vm0, %v9546_v16  ;;  %2414 = vrot.lane.b32.xlu0 %v9546_v16, %s9193_s13 }
 0x204   :  { %v498_v21 = vpop.f32.mrf.mxu0  ;;  %8380 = vmatpush3.xpose.msk.msra.mxu1 %vm806_vm0, %v9546_v16 }
 0x205   :  { %12000 = vst [vmem:[#allocation5_spill] sm:$0xff] %v9551_v17  ;;  %v9561_v24 = vpop.f32.mrf.mxu1  ;;  %8381 = vmatprep.subr.msk.mxu1 %vm806_vm0, %v9535_v38  ;;  %2499 = vrot.lane.b32.xlu1 %v9551_v17, %s9193_s13  ;;  %v9570_v27 = vadd.f32 %v498_v21, %v9529_v2 }
 0x206   :  { %v500_v46 = vpop.f32.mrf.mxu0 }
 0x207   :  { %12001 = vst [vmem:[#allocation6_spill] sm:$0xff] %v9570_v27  ;;  %v8369_v12 = vpop.f32.mrf.mxu1  ;;  %v9610_v43 = vadd.f32 %v500_v46, %v9527_v1 }
 0x208   :  { %v9573_v13 = vadd.f32 %v8369_v12, %v9567_v25  ;;  %v502_v28 = vpop.f32.mrf.mxu0  ;;  %8382 = vmatpush3.xpose.msk.msra.mxu1 %vm806_vm0, %v9535_v38 }
 0x209   :  { %v9581_v34 = vadd.f32 %v502_v28, %v9529_v2  ;;  %v615_v35 = vpop.f32.mrf.mxu1  ;;  %2503 = vrot.lane.b32.xlu1 %v9570_v27, %s9193_s13  ;;  %12006 = vst [vmem:[#allocation11_spill] sm:$0xff] %v9610_v43 }
 0x20a   :  { %12002 = vst [vmem:[#allocation7_spill] sm:$0xff] %v9573_v13  ;;  %v9586_v14 = vadd.f32 %v615_v35, %v9567_v25  ;;  %v506_v47 = vpop.f32.mrf.mxu0 }
 0x20b   :  { %12004 = vst [vmem:[#allocation9_spill] sm:$0xff] %v9581_v34  ;;  %v9588_v57 = vpop.f32.mrf.mxu1  ;;  %8384 = vmatmul.mubr.msk.f32.vlgmr.msra.gmra.mxu1 %vm806_vm0, %v9578_v33  ;;  %8386 = vmatprep.subr.msk.mxu1 %vm806_vm0, %v9581_v34  ;;  %v9616_v45 = vadd.f32 %v506_v47, %v9527_v1 }
 0x20c   :  { %v508_v15 = vpop.f32.mrf.mxu0  ;;  %8387 = vmatpush3.xpose.msk.msra.mxu1 %vm806_vm0, %v9581_v34  ;;  %8390 = vmatprep.mubr.msk.f32.mxu1 %vm806_vm0, %v9551_v17 }
 0x20d   :  { %v9598_v36 = vpop.f32.mrf.mxu1  ;;  %2505 = vrot.lane.b32.xlu1 %v9581_v34, %s9193_s13  ;;  %8388 = vmatprep.subr.msk.mxu1 %vm806_vm0, %v9570_v27  ;;  %12007 = vst [vmem:[#allocation12_spill] sm:$0xff] %v9616_v45  ;;  %v9626_v30 = vadd.f32 %v508_v15, %v9529_v2 }
 0x20e   :  { %v510_v37 = vpop.f32.mrf.mxu0 }
 0x20f   :  { %v8373_v40 = vpop.f32.mrf.mxu1  ;;  %12009 = vst [vmem:[#allocation14_spill] sm:$0xff] %v9626_v30  ;;  %v9651_v19 = vadd.f32 %v510_v37, %v9527_v1 }
 0x210   :  { %v9605_v41 = vadd.f32 %v8373_v40, %v9567_v25  ;;  %v512_v42 = vpop.f32.mrf.mxu0  ;;  %8389 = vmatpush3.xpose.msk.msra.mxu1 %vm806_vm0, %v9570_v27 }
 0x211   :  { %v9613_v58 = vadd.f32 %v512_v42, %v9529_v2  ;;  %v631_v44 = vpop.f32.mrf.mxu1 }
 0x212   :  { %12005 = vst [vmem:[#allocation10_spill] sm:$0xff] %v9605_v41  ;;  %v9619_v3 = vadd.f32 %v631_v44, %v9567_v25  ;;  %v516_v49 = vpop.f32.mrf.mxu0 }
 0x213   :  { %v8374_v50 = vpop.f32.mrf.mxu1  ;;  %2596 = vrot.lane.b32.xlu0 %v9613_v58, %s9193_s13  ;;  %8391 = vmatmul.mubr.msk.f32.vlgmr.msra.gmra.mxu1 %vm806_vm0, %v9610_v43  ;;  %v9657_v61 = vadd.f32 %v516_v49, %v9527_v1 }
 0x214   :  { %12008 = vst [vmem:[#allocation13_spill] sm:$0xff] %v9619_v3  ;;  %v9629_v51 = vadd.f32 %v8374_v50, %v9567_v25  ;;  %8393 = vmatprep.subr.msk.mxu1 %vm806_vm0, %v9613_v58  ;;  %v518_v52 = vpop.f32.mrf.mxu0  ;;  %8397 = vmatprep.mubr.msk.f32.mxu1 %vm806_vm0, %v9616_v45 }
 0x215   :  { %v634_v4 = vpop.f32.mrf.mxu1  ;;  %8394 = vmatpush3.xpose.msk.msra.mxu1 %vm806_vm0, %v9613_v58  ;;  %12014 = vst [vmem:[#allocation19_spill] sm:$0xff] %v9657_v61  ;;  %v9667_v26 = vadd.f32 %v518_v52, %v9529_v2 }
 0x216   :  { %12010 = vst [vmem:[#allocation15_spill] sm:$0xff] %v9629_v51  ;;  %v9638_v18 = vadd.f32 %v634_v4, %v9567_v25  ;;  %8395 = vmatprep.subr.msk.mxu1 %vm806_vm0, %v9626_v30  ;;  %v520_v53 = vpop.f32.mrf.mxu0 }
 0x217   :  { %v8377_v54 = vpop.f32.mrf.mxu1  ;;  %12015 = vst [vmem:[#allocation20_spill] sm:$0xff] %v9667_v26  ;;  %v9688_v9 = vadd.f32 %v520_v53, %v9527_v1 }
 0x218   :  { %v9643_v55 = vadd.f32 %v8377_v54, %v9567_v25  ;;  %v522_v23 = vpop.f32.mrf.mxu0 }
 0x219   :  { %v9646_v56 = vadd.f32 %v522_v23, %v9529_v2  ;;  %v647_v59 = vpop.f32.mrf.mxu1  ;;  %8396 = vmatpush3.xpose.msk.msra.mxu1 %vm806_vm0, %v9626_v30 }
 0x21a   :  { %12011 = vst [vmem:[#allocation16_spill] sm:$0xff] %v9643_v55  ;;  %v9654_v60 = vadd.f32 %v647_v59, %v9567_v25  ;;  %v526_v29 = vpop.f32.mrf.mxu0 }
 0x21b   :  { %12012 = vst [vmem:[#allocation17_spill] sm:$0xff] %v9646_v56  ;;  %v9660_v62 = vadd.f32 %v526_v29, %v9527_v1  ;;  %v8378_v32 = vpop.f32.mrf.mxu1  ;;  %2687 = vrot.lane.b32.xlu1 %v9646_v56, %s9193_s13  ;;  %8400 = vmatprep.subr.msk.mxu1 %vm806_vm0, %v9646_v56  ;;  %v9756_v29 = vadd.f32 %v9561_v24, %v9567_v25 }
 0x21c   :  { %12013 = vst [vmem:[#allocation18_spill] sm:$0xff] %v9654_v60  ;;  %v9670_v22 = vadd.f32 %v8378_v32, %v9567_v25  ;;  %8398 = vmatmul.mubr.msk.f32.vlgmr.msra.gmra.mxu1 %vm806_vm0, %v9651_v19  ;;  %v528_v0 = vpop.f32.mrf.mxu0  ;;  %v9783_v24 = vadd.f32 %v9598_v36, %v9567_v25  ;;  %v9802_v36 = vadd.f32 %v9541_v8, %v9567_v25 }
 0x21d   :  { %8401 = vmatpush3.xpose.msk.msra.mxu1 %vm806_vm0, %v9646_v56  ;;  %8404 = vmatprep.mubr.msk.f32.mxu1 %vm806_vm0, %v9657_v61  ;;  %v9691_v39 = vadd.f32 %v528_v0, %v9529_v2 }
 0x21e   :  { %12016 = vst [vmem:[#allocation21_spill] sm:$0xff] %v9670_v22  ;;  %8402 = vmatprep.subr.msk.mxu1 %vm806_vm0, %v9667_v26  ;;  %8411 = vmatprep.mubr.msk.f32.mxu0 %vm806_vm0, %v9660_v62  ;;  %v530_v31 = vpop.f32.mrf.mxu0  ;;  %12020 = vst [vmem:[#allocation25_spill] sm:$0xff] %v9802_v36  ;;  %v8059_v22 = vld [vmem:[%s11888_s1 + $0x80] sm:$0xff]  }
 0x21f   :  { %v9709_v35 = vadd.f32 %v530_v31, %v9527_v1 }
 0x220   :  { %v532_v6 = vpop.f32.mrf.mxu0 }
 0x221   :  { %v9683_v7 = vadd.f32 %v532_v6, %v9529_v2  ;;  %8403 = vmatpush3.xpose.msk.msra.mxu1 %vm806_vm0, %v9667_v26  ;;  %v9769_v6 = vadd.f32 %v9548_v10, %v9567_v25 }
 0x222   :  { %v536_v11 = vpop.f32.mrf.mxu0 }
 0x223   :  { %v9694_v21 = vadd.f32 %v536_v11, %v9527_v1  ;;  %8407 = vmatprep.subr.msk.mxu0 %vm806_vm0, %v9683_v7  ;;  %12017 = vst [vmem:[#allocation22_spill] sm:$0xff] %v9769_v6 }
 0x224   :  { %8405 = vmatmul.mubr.msk.f32.vlgmr.msra.gmra.mxu1 %vm806_vm0, %v9688_v9  ;;  %v538_v46 = vpop.f32.mrf.mxu0  ;;  %8408 = vmatpush3.xpose.msk.msra.mxu0 %vm806_vm0, %v9683_v7 }
 0x225   :  { %8409 = vmatprep.subr.msk.mxu0 %vm806_vm0, %v9691_v39  ;;  %8418 = vmatprep.mubr.msk.f32.mxu1 %vm806_vm0, %v9694_v21  ;;  %v9715_v37 = vadd.f32 %v538_v46, %v9529_v2  ;;  %v791_v46 = vld [vmem:[%s11889_s2 + $0x1] sm:$0x1] }
 0x226   :  { %v540_v12 = vpop.f32.mrf.mxu0  ;;  %vm799_vm2 = vcmp.eq.f32.partialorder %v791_v46, 0.0 }
 0x227   :  { %v9733_v50 = vadd.f32 %v540_v12, %v9527_v1  ;;  %v7917_v12 = vld [vmem:[%s11888_s1] sm:$0xff]  }
 0x228   :  { %v542_v28 = vpop.f32.mrf.mxu0  ;;  %8410 = vmatpush3.xpose.msk.msra.mxu0 %vm806_vm0, %v9691_v39 }
 0x229   :  { %v9712_v47 = vadd.f32 %v542_v28, %v9529_v2  ;;  %v9825_v28 = vpop.f32.mrf.mxu1 }
 0x22a   :  { %v546_v15 = vpop.f32.mrf.mxu0 }
 0x22b   :  { %v9718_v40 = vadd.f32 %v546_v15, %v9527_v1  ;;  %8412 = vmatmul.mubr.msk.f32.vlgmr.msra.gmra.mxu0 %vm806_vm0, %v9709_v35  ;;  %8414 = vmatprep.subr.msk.mxu1 %vm806_vm0, %v9712_v47  ;;  %v7919_v15 = vunpack.c.h.bf16 %v7917_v12 }
 0x22c   :  { %v548_v42 = vpop.f32.mrf.mxu0  ;;  %8415 = vmatpush3.xpose.msk.msra.mxu1 %vm806_vm0, %v9712_v47 }
 0x22d   :  { %8416 = vmatprep.subr.msk.mxu1 %vm806_vm0, %v9715_v37  ;;  %8425 = vmatprep.mubr.msk.f32.mxu0 %vm806_vm0, %v9718_v40  ;;  %v9739_v53 = vadd.f32 %v548_v42, %v9529_v2  ;;  %v12022_v42 = vmov 0 }
 0x22e   :  { %v550_v44 = vpop.f32.mrf.mxu0 }
 0x22f   :  { %v9761_v0 = vadd.f32 %v550_v44, %v9527_v1  ;;  %v1504_v44 = vsel %vm799_vm2, 1, %v11895_v48 }
 0x230   :  { %v552_v49 = vpop.f32.mrf.mxu0  ;;  %8417 = vmatpush3.xpose.msk.msra.mxu1 %vm806_vm0, %v9715_v37 }
 0x231   :  { %v9736_v52 = vadd.f32 %v552_v49, %v9529_v2 }
 0x232   :  { %v556_v4 = vpop.f32.mrf.mxu0 }
 0x233   :  { %v9742_v54 = vadd.f32 %v556_v4, %v9527_v1  ;;  %8419 = vmatmul.mubr.msk.f32.vlgmr.msra.gmra.mxu1 %vm806_vm0, %v9733_v50  ;;  %8421 = vmatprep.subr.msk.mxu0 %vm806_vm0, %v9736_v52  ;;  %v7918_v4 = vunpack.c.l.bf16 %v7917_v12 }
 0x234   :  { %v558_v23 = vpop.f32.mrf.mxu0  ;;  %8422 = vmatpush3.xpose.msk.msra.mxu0 %vm806_vm0, %v9736_v52 }
 0x235   :  { %8423 = vmatprep.subr.msk.mxu0 %vm806_vm0, %v9739_v53  ;;  %8432 = vmatprep.mubr.msk.f32.mxu1 %vm806_vm0, %v9742_v54  ;;  %v9772_v11 = vadd.f32 %v558_v23, %v9529_v2 }
 0x236   :  { %v560_v59 = vpop.f32.mrf.mxu0 }
 0x237   :  { %v9797_v10 = vadd.f32 %v560_v59, %v9527_v1  ;;  %v790_v1 = vld [vmem:[%s11889_s2] sm:$0x1] }
 0x238   :  { %v562_v32 = vpop.f32.mrf.mxu0  ;;  %8424 = vmatpush3.xpose.msk.msra.mxu0 %vm806_vm0, %v9739_v53  ;;  %vm798_vm1 = vcmp.eq.f32.partialorder %v790_v1, 0.0  ;;  %v1518_v1 = vrot.slane %v1504_v44, %v9521_v63  ;;  %v12025_v44 = vmov 0 }
 0x239   :  { %v9764_v31 = vadd.f32 %v562_v32, %v9529_v2  ;;  %8435 = vmatprep.subr.mxu0 %v9756_v29  ;;  %v9791_v2 = vadd.f32 %v9553_v20, %v9567_v25  ;;  %12019 = vst [vmem:[#allocation24_spill] sm:$0xff] %v9797_v10  ;;  %v9809_v20 = vadd.f32 %v9588_v57, %v9567_v25  ;;  %v1503_v8 = vsel %vm798_vm1, 1, %v11895_v48 }
 0x23a   :  { %v1514_v57 = vrot.slane %v1503_v8, %v9521_v63  ;;  %v792_v8 = vld [vmem:[%s11889_s2 + $0x2] sm:$0x1]  ;;  %vm9849_vm6 = vcmp.eq.s32.totalorder %v1518_v1, 1  ;;  %v793_v1 = vld [vmem:[%s11889_s2 + $0x3] sm:$0x1] }
 0x23b   :  { %8426 = vmatmul.mubr.msk.f32.vlgmr.msra.gmra.mxu0 %vm806_vm0, %v9761_v0  ;;  %8428 = vmatprep.subr.msk.mxu1 %vm806_vm0, %v9764_v31  ;;  %12018 = vst [vmem:[#allocation23_spill] sm:$0xff] %v9791_v2  ;;  %12021 = vst [vmem:[#allocation26_spill] sm:$0xff] %v9809_v20  ;;  %vm800_vm5 = vcmp.eq.f32.partialorder %v792_v8, 0.0  ;;  %v12026_v44 = vsel %vm9849_vm6, 4294967295, %v12025_v44  ;;  %vm801_vm7 = vcmp.eq.f32.partialorder %v793_v1, 0.0 }
 0x23c   :  { %8429 = vmatpush3.xpose.msk.msra.mxu1 %vm806_vm0, %v9764_v31  ;;  %8436 = vmatpush3.msra.mxu0 %v9756_v29  ;;  %vm9827_vm3 = vcmp.eq.s32.totalorder %v1514_v57, 1  ;;  %v8047_v57 = vld [vmem:[%s11888_s1 + $0x20] sm:$0xff]   ;;  %12027 = vst [vmem:[#allocation28_spill] sm:$0xff] %v12026_v44 }
 0x23d   :  { %8430 = vmatprep.subr.msk.mxu1 %vm806_vm0, %v9772_v11  ;;  %8437 = vmatprep.subr.mxu0 %v9769_v6  ;;  %v12023_v42 = vsel %vm9827_vm3, 4294967295, %v12022_v42  ;;  %v7934_v48 = vunpack.c.l.bf16 %v8047_v57 }
 0x23e   :  { %8438 = vmatpush3.msra.mxu0 %v9769_v6  ;;  %12024 = vst [vmem:[#allocation27_spill] sm:$0xff] %v12023_v42  ;;  %v12028_v42 = vmov 0  }
 0x23f   :  { %8449 = vmatprep.subr.mxu0 %v9783_v24  ;;  %v1505_v56 = vsel %vm800_vm5, 1, %v12028_v42 }
 0x240   :  { %8431 = vmatpush3.xpose.msk.msra.mxu1 %vm806_vm0, %v9772_v11  ;;  %v1522_v17 = vrot.slane %v1505_v56, %v9521_v63 }
 0x241   :  { %8442 = vmatprep.subr.mxu1 %v9791_v2 }
 0x242   :  { %vm9873_vm8 = vcmp.eq.s32.totalorder %v1522_v17, 1 }
 0x243   :  { %8433 = vmatmul.mubr.msk.f32.vlgmr.msra.gmra.mxu1 %vm806_vm0, %v9797_v10 }
 0x244   :  { %8443 = vmatpush3.msra.mxu1 %v9791_v2 }
 0x245   :  { %8444 = vmatprep.subr.mxu1 %v9802_v36 }
 0x246   :  { %8445 = vmatpush3.msra.mxu1 %v9802_v36 }
 0x247   :  { %8456 = vmatprep.subr.mxu1 %v9809_v20  ;;  %v8067_v20 = vld [vmem:[%s11888_s1 + $0xc0] sm:$0xff]  }
 0x2cb   :  { %v8385_v49 = vpop.f32.mrf.mxu1 }
 0x2cc   :  { %v1552_v23 = vsel %vm9827_vm3, -1e+09, %v8385_v49  ;;  %v7935_v49 = vunpack.c.h.bf16 %v8047_v57 }
 0x2cd   :  { %v9834_v59 = vadd.f32 %v7919_v15, %v1552_v23  ;;  %v885_v32 = vpop.f32.mrf.mxu1 }
 0x2ce   :  { %v1551_v46 = vsel %vm9827_vm3, -1e+09, %v885_v32 }
 0x2cf   :  { %v9845_v12 = vadd.f32 %v7918_v4, %v1551_v46  ;;  %v1587_v15 = vsel %vm1583_vm4, %v9834_v59, -inf }
 0x2d0   :  { %1588 = vmax.xlane.f32.xlu0 %v1587_v15 }
 0x2d1   :  { %v1584_v32 = vsel %vm1583_vm4, %v9845_v12, -inf }
 0x2d3   :  { %v8392_v23 = vpop.f32.mrf.mxu1 }
 0x2d4   :  { %v1554_v4 = vsel %vm9849_vm6, -1e+09, %v8392_v23  ;;  %1585 = vmax.xlane.f32.xlu0 %v1584_v32  ;;  %v12029_v32 = vmov 0 }
 0x2d5   :  { %v9858_v46 = vadd.f32 %v7935_v49, %v1554_v4  ;;  %v972_v15 = vpop.f32.mrf.mxu1  ;;  %v8051_v49 = vld [vmem:[%s11888_s1 + $0x40] sm:$0xff]   ;;  %v12030_v32 = vsel %vm9873_vm8, 4294967295, %v12029_v32 }
 0x2d6   :  { %v1553_v8 = vsel %vm9849_vm6, -1e+09, %v972_v15  ;;  %v7951_v23 = vunpack.c.h.bf16 %v8051_v49  ;;  %12031 = vst [vmem:[#allocation29_spill] sm:$0xff] %v12030_v32  ;;  %v7950_v15 = vunpack.c.l.bf16 %v8051_v49 }
 0x2d7   :  { %v9866_v27 = vadd.f32 %v7934_v48, %v1553_v8  ;;  %v1593_v57 = vsel %vm1583_vm4, %v9858_v46, -inf  ;;  %v1506_v48 = vsel %vm801_vm7, 1, %v12028_v42  ;;  %v794_v8 = vld [vmem:[%s11889_s2 + $0x4] sm:$0x1] }
 0x2d8   :  { %1594 = vmax.xlane.f32.xlu1 %v1593_v57  ;;  %v1526_v44 = vrot.slane %v1506_v48, %v9521_v63  ;;  %vm802_vm9 = vcmp.eq.f32.partialorder %v794_v8, 0.0 }
 0x2d9   :  { %v1590_v4 = vsel %vm1583_vm4, %v9866_v27, -inf  ;;  %v1507_v48 = vsel %vm802_vm9, 1, %v12028_v42 }
 0x2da   :  { %vm9897_vm10 = vcmp.eq.s32.totalorder %v1526_v44, 1 }
 0x2dc   :  { %v8399_v56 = vpop.f32.mrf.mxu1  ;;  %1591 = vmax.xlane.f32.xlu1 %v1590_v4  ;;  %v8055_v4 = vld [vmem:[%s11888_s1 + $0x60] sm:$0xff]  }
 0x2dd   :  { %v1556_v1 = vsel %vm9873_vm8, -1e+09, %v8399_v56  ;;  %v7967_v56 = vunpack.c.h.bf16 %v8055_v4  ;;  %v7966_v32 = vunpack.c.l.bf16 %v8055_v4 }
 0x2de   :  { %v9885_v57 = vadd.f32 %v7951_v23, %v1556_v1  ;;  %v1059_v17 = vpop.f32.mrf.mxu1  ;;  %v12032_v23 = vmov 0 }
 0x2df   :  { %v1555_v34 = vsel %vm9873_vm8, -1e+09, %v1059_v17  ;;  %v12033_v23 = vsel %vm9897_vm10, 4294967295, %v12032_v23 }
 0x2e0   :  { %v9893_v49 = vadd.f32 %v7950_v15, %v1555_v34  ;;  %v1599_v55 = vsel %vm1583_vm4, %v9885_v57, -inf  ;;  %12034 = vst [vmem:[#allocation30_spill] sm:$0xff] %v12033_v23  ;;  %v795_v34 = vld [vmem:[%s11889_s2 + $0x5] sm:$0x1] }
 0x2e1   :  { %1600 = vmax.xlane.f32.xlu0 %v1599_v55  ;;  %v1530_v55 = vrot.slane %v1507_v48, %v9521_v63  ;;  %vm803_vm11 = vcmp.eq.f32.partialorder %v795_v34, 0.0  ;;  %v12035_v48 = vmov 0  ;;  %v796_v34 = vld [vmem:[%s11889_s2 + $0x6] sm:$0x1] }
 0x2e2   :  { %v1596_v17 = vsel %vm1583_vm4, %v9893_v49, -inf  ;;  %vm804_vm13 = vcmp.eq.f32.partialorder %v796_v34, 0.0 }
 0x2e3   :  { %vm9921_vm12 = vcmp.eq.s32.totalorder %v1530_v55, 1 }
 0x2e4   :  { %v8406_v1 = vpop.f32.mrf.mxu1  ;;  %v12036_v48 = vsel %vm9921_vm12, 4294967295, %v12035_v48 }
 0x2e5   :  { %v1558_v15 = vsel %vm9897_vm10, -1e+09, %v8406_v1  ;;  %1597 = vmax.xlane.f32.xlu0 %v1596_v17  ;;  %v7983_v1 = vunpack.c.h.bf16 %v8059_v22  ;;  %12037 = vst [vmem:[#allocation31_spill] sm:$0xff] %v12036_v48 }
 0x2e6   :  { %v9910_v44 = vadd.f32 %v7967_v56, %v1558_v15  ;;  %v1146_v8 = vpop.f32.mrf.mxu1  ;;  %v1508_v56 = vsel %vm803_vm11, 1, %v12028_v42  ;;  %v7982_v15 = vunpack.c.l.bf16 %v8059_v22  ;;  %v8063_v22 = vld [vmem:[%s11888_s1 + $0xa0] sm:$0xff]  }
 0x2e7   :  { %v1557_v4 = vsel %vm9897_vm10, -1e+09, %v1146_v8  ;;  %v1534_v8 = vrot.slane %v1508_v56, %v9521_v63  ;;  %v1509_v56 = vsel %vm804_vm13, 1, %v12028_v42  ;;  %v7998_v48 = vunpack.c.l.bf16 %v8063_v22 }
 0x2e8   :  { %v9917_v41 = vadd.f32 %v7966_v32, %v1557_v4  ;;  %v1605_v51 = vsel %vm1583_vm4, %v9910_v44, -inf }
 0x2e9   :  { %1606 = vmax.xlane.f32.xlu1 %v1605_v51  ;;  %vm9945_vm14 = vcmp.eq.s32.totalorder %v1534_v8, 1 }
 0x2ea   :  { %v1602_v32 = vsel %vm1583_vm4, %v9917_v41, -inf }
 0x2eb   :  { %v8413_v17 = vpop.f32.mrf.mxu0 }
 0x2ec   :  { %v1560_v23 = vsel %vm9921_vm12, -1e+09, %v8413_v17 }
 0x2ed   :  { %v9933_v51 = vadd.f32 %v7983_v1, %v1560_v23  ;;  %1603 = vmax.xlane.f32.xlu1 %v1602_v32  ;;  %v1233_v55 = vpop.f32.mrf.mxu0  ;;  %v7999_v23 = vunpack.c.h.bf16 %v8063_v22  ;;  %v12038_v1 = vmov 0 }
 0x2ee   :  { %v1559_v4 = vsel %vm9921_vm12, -1e+09, %v1233_v55  ;;  %v12039_v1 = vsel %vm9945_vm14, 4294967295, %v12038_v1 }
 0x2ef   :  { %v9941_v17 = vadd.f32 %v7982_v15, %v1559_v4  ;;  %v1611_v13 = vsel %vm1583_vm4, %v9933_v51, -inf  ;;  %12040 = vst [vmem:[#allocation32_spill] sm:$0xff] %v12039_v1 }
 0x2f0   :  { %1612 = vmax.xlane.f32.xlu0 %v1611_v13  ;;  %v1538_v13 = vrot.slane %v1509_v56, %v9521_v63 }
 0x2f1   :  { %v1608_v55 = vsel %vm1583_vm4, %v9941_v17, -inf }
 0x2f2   :  { %vm9966_vm15 = vcmp.eq.s32.totalorder %v1538_v13, 1 }
 0x2f3   :  { %v8420_v32 = vpop.f32.mrf.mxu1 }
 0x2f4   :  { %v1562_v15 = vsel %vm9945_vm14, -1e+09, %v8420_v32  ;;  %1609 = vmax.xlane.f32.xlu0 %v1608_v55  ;;  %v8015_v32 = vunpack.c.h.bf16 %v8067_v20 }
 0x2f5   :  { %v9954_v4 = vadd.f32 %v7999_v23, %v1562_v15  ;;  %v1320_v34 = vpop.f32.mrf.mxu1  ;;  %v12041_v23 = vmov 0  ;;  %v8014_v15 = vunpack.c.l.bf16 %v8067_v20  ;;  %v797_v20 = vld [vmem:[%s11889_s2 + $0x7] sm:$0x1] }
 0x2f6   :  { %v1561_v8 = vsel %vm9945_vm14, -1e+09, %v1320_v34  ;;  %v12042_v23 = vsel %vm9966_vm15, 4294967295, %v12041_v23  ;;  %vm805_vm1 = vcmp.eq.f32.partialorder %v797_v20, 0.0 }
 0x2f7   :  { %v9962_v36 = vadd.f32 %v7998_v48, %v1561_v8  ;;  %v1617_v22 = vsel %vm1583_vm4, %v9954_v4, -inf  ;;  %12043 = vst [vmem:[#allocation33_spill] sm:$0xff] %v12042_v23 }
 0x2f8   :  { %1618 = vmax.xlane.f32.xlu1 %v1617_v22 }
 0x2f9   :  { %v1614_v56 = vsel %vm1583_vm4, %v9962_v36, -inf }
 0x2fb   :  { %v8427_v55 = vpop.f32.mrf.mxu0 }
 0x2fc   :  { %v1564_v34 = vsel %vm9966_vm15, -1e+09, %v8427_v55  ;;  %1615 = vmax.xlane.f32.xlu1 %v1614_v56  ;;  %v8071_v55 = vld [vmem:[%s11888_s1 + $0xe0] sm:$0xff]  }
 0x2fd   :  { %v9974_v48 = vadd.f32 %v8015_v32, %v1564_v34  ;;  %v1407_v8 = vpop.f32.mrf.mxu0  ;;  %v8031_v34 = vunpack.c.h.bf16 %v8071_v55  ;;  %v8030_v20 = vunpack.c.l.bf16 %v8071_v55 }
 0x2fe   :  { %v1563_v22 = vsel %vm9966_vm15, -1e+09, %v1407_v8 }
 0x2ff   :  { %v9978_v1 = vadd.f32 %v8014_v15, %v1563_v22  ;;  %v1623_v13 = vsel %vm1583_vm4, %v9974_v48, -inf  ;;  %v12044_v15 = vmov 0 }
 0x300   :  { %1624 = vmax.xlane.f32.xlu0 %v1623_v13 }
 0x301   :  { %v1620_v6 = vsel %vm1583_vm4, %v9978_v1, -inf }
 0x303   :  { %v8434_v56 = vpop.f32.mrf.mxu1 }
 0x304   :  { %1621 = vmax.xlane.f32.xlu0 %v1620_v6  ;;  %v1510_v6 = vsel %vm805_vm1, 1, %v12028_v42 }
 0x305   :  { %v1542_v32 = vrot.slane %v1510_v6, %v9521_v63  ;;  %v1494_v22 = vpop.f32.mrf.mxu1 }
 0x307   :  { %vm10002_vm2 = vcmp.eq.s32.totalorder %v1542_v32, 1 }
 0x308   :  { %v12045_v15 = vsel %vm10002_vm2, 4294967295, %v12044_v15  ;;  %v1566_v8 = vsel %vm10002_vm2, -1e+09, %v8434_v56  ;;  %v1565_v63 = vsel %vm10002_vm2, -1e+09, %v1494_v22  ;;  %v10022_v56 = vpop.permute.xlu0 %2408 }
 0x309   :  { %12046 = vst [vmem:[#allocation34_spill] sm:$0xff] %v12045_v15  ;;  %v10008_v13 = vadd.f32 %v8031_v34, %v1566_v8  ;;  %v10012_v42 = vadd.f32 %v8030_v20, %v1565_v63 }
 0x30b   :  { %v1629_v6 = vsel %vm1583_vm4, %v10008_v13, -inf  ;;  %v1626_v32 = vsel %vm1583_vm4, %v10012_v42, -inf }
 0x30c   :  { %v10026_v34 = vpop.permute.xlu0 %2414 }
 0x30d   :  { %2501 = vrot.lane.b32.xlu1 %v9610_v43, %s9193_s13 }
 0x310   :  { %v10030_v22 = vpop.permute.xlu0 %2596 }
 0x311   :  { %2685 = vrot.lane.b32.xlu1 %v9667_v26, %s9193_s13  ;;  %12049 = vst [vmem:[#allocation37_spill] sm:$0xff] %v10030_v22 }
 0x31a   :  { %2410 = vrot.lane.b32.xlu0 %v9578_v33, %s9193_s13 }
 0x31e   :  { %2594 = vrot.lane.b32.xlu0 %v9626_v30, %s9193_s13 }
 0x322   :  { %2590 = vrot.lane.b32.xlu0 %v9616_v45, %s9193_s13  ;;  %v10018_v45 = vpop.permute.xlu1 %2412 }
 0x326   :  { %v10024_v55 = vpop.permute.xlu1 %2499 }
 0x327   :  { %12047 = vst [vmem:[#allocation35_spill] sm:$0xff] %v10024_v55 }
 0x32a   :  { %v10028_v8 = vpop.permute.xlu1 %2503 }
 0x32b   :  { %12048 = vst [vmem:[#allocation36_spill] sm:$0xff] %v10028_v8 }
 0x32e   :  { %v10032_v20 = vpop.permute.xlu1 %2505 }
 0x332   :  { %v10035_v15 = vpop.permute.xlu1 %2687 }
 0x335   :  { %1630 = vmax.xlane.f32.xlu1 %v1629_v6 }
 0x339   :  { %1627 = vmax.xlane.f32.xlu1 %v1626_v32 }
 0x34a   :  { %2681 = vrot.lane.b32.xlu1 %v9657_v61, %s9193_s13 }
 0x359   :  { %v1589_v63 = vpop.xlane.xlu0 %1588 }
 0x35a   :  { %v1633_v6 = vsub.f32 %v9834_v59, %v1589_v63 }
 0x35c   :  { %v1650_v32 = vmul.f32 1.442695, %v1633_v6 }
 0x35d   :  { %v1586_v30 = vpop.xlane.xlu0 %1585 }
 0x35e   :  { %8898 = vpow2.f32 %v1650_v32  ;;  %v1632_v61 = vsub.f32 %v9845_v12, %v1586_v30 }
 0x360   :  { %v1648_v33 = vmul.f32 1.442695, %v1632_v61 }
 0x361   :  { %v1595_v26 = vpop.xlane.xlu1 %1594 }
 0x362   :  { %8900 = vpow2.f32 %v1648_v33  ;;  %v1635_v43 = vsub.f32 %v9858_v46, %v1595_v26 }
 0x364   :  { %v1654_v23 = vmul.f32 1.442695, %v1635_v43 }
 0x365   :  { %v1592_v8 = vpop.xlane.xlu1 %1591 }
 0x366   :  { %8902 = vpow2.f32 %v1654_v23  ;;  %v1634_v55 = vsub.f32 %v9866_v27, %v1592_v8 }
 0x368   :  { %v1652_v22 = vmul.f32 1.442695, %v1634_v55 }
 0x36a   :  { %8904 = vpow2.f32 %v1652_v22  ;;  %v1601_v59 = vpop.xlane.xlu0 %1600 }
 0x36b   :  { %v10040_v63 = vpop.eup %8898  ;;  %v1637_v6 = vsub.f32 %v9885_v57, %v1601_v59 }
 0x36c   :  { %v1683_v30 = vsel %vm1583_vm4, %v10040_v63, 0.0 }
 0x36d   :  { %v1658_v61 = vmul.f32 1.442695, %v1637_v6  ;;  %1684 = vadd.xlane.f32.xlu0 %v1683_v30 }
 0x36e   :  { %v1598_v33 = vpop.xlane.xlu0 %1597 }
 0x36f   :  { %v10045_v12 = vpop.eup %8900  ;;  %8906 = vpow2.f32 %v1658_v61  ;;  %v1636_v43 = vsub.f32 %v9893_v49, %v1598_v33 }
 0x370   :  { %v1680_v27 = vsel %vm1583_vm4, %v10045_v12, 0.0 }
 0x371   :  { %v1656_v26 = vmul.f32 1.442695, %v1636_v43  ;;  %1681 = vadd.xlane.f32.xlu0 %v1680_v27 }
 0x372   :  { %v1607_v46 = vpop.xlane.xlu1 %1606 }
 0x373   :  { %v10050_v23 = vpop.eup %8902  ;;  %8908 = vpow2.f32 %v1656_v26  ;;  %v1639_v57 = vsub.f32 %v9910_v44, %v1607_v46 }
 0x374   :  { %v1689_v55 = vsel %vm1583_vm4, %v10050_v23, 0.0 }
 0x375   :  { %v1662_v8 = vmul.f32 1.442695, %v1639_v57  ;;  %1690 = vadd.xlane.f32.xlu1 %v1689_v55 }
 0x376   :  { %v1604_v22 = vpop.xlane.xlu1 %1603 }
 0x377   :  { %v10055_v32 = vpop.eup %8904  ;;  %8910 = vpow2.f32 %v1662_v8  ;;  %v1638_v49 = vsub.f32 %v9917_v41, %v1604_v22 }
 0x378   :  { %v1686_v59 = vsel %vm1583_vm4, %v10055_v32, 0.0 }
 0x379   :  { %v1660_v6 = vmul.f32 1.442695, %v1638_v49  ;;  %1687 = vadd.xlane.f32.xlu1 %v1686_v59  ;;  %v1613_v30 = vpop.xlane.xlu0 %1612 }
 0x37a   :  { %v1641_v61 = vsub.f32 %v9933_v51, %v1613_v30 }
 0x37b   :  { %8912 = vpow2.f32 %v1660_v6 }
 0x37c   :  { %v10061_v44 = vpop.eup %8906  ;;  %v1666_v33 = vmul.f32 1.442695, %v1641_v61 }
 0x37d   :  { %v1695_v43 = vsel %vm1583_vm4, %v10061_v44, 0.0  ;;  %v1610_v27 = vpop.xlane.xlu0 %1609 }
 0x37e   :  { %8914 = vpow2.f32 %v1666_v33  ;;  %1696 = vadd.xlane.f32.xlu0 %v1695_v43  ;;  %v1640_v41 = vsub.f32 %v9941_v17, %v1610_v27 }
 0x380   :  { %v10066_v26 = vpop.eup %8908  ;;  %v1664_v46 = vmul.f32 1.442695, %v1640_v41 }
 0x381   :  { %v1619_v57 = vpop.xlane.xlu1 %1618  ;;  %v1692_v55 = vsel %vm1583_vm4, %v10066_v26, 0.0 }
 0x382   :  { %8916 = vpow2.f32 %v1664_v46  ;;  %v1643_v51 = vsub.f32 %v9954_v4, %v1619_v57  ;;  %1693 = vadd.xlane.f32.xlu0 %v1692_v55 }
 0x384   :  { %v10071_v8 = vpop.eup %8910  ;;  %v1670_v22 = vmul.f32 1.442695, %v1643_v51 }
 0x385   :  { %v1616_v49 = vpop.xlane.xlu1 %1615  ;;  %v1701_v59 = vsel %vm1583_vm4, %v10071_v8, 0.0 }
 0x386   :  { %8918 = vpow2.f32 %v1670_v22  ;;  %v1642_v17 = vsub.f32 %v9962_v36, %v1616_v49  ;;  %1702 = vadd.xlane.f32.xlu1 %v1701_v59 }
 0x388   :  { %v10076_v6 = vpop.eup %8912  ;;  %v1668_v30 = vmul.f32 1.442695, %v1642_v17 }
 0x389   :  { %v1698_v61 = vsel %vm1583_vm4, %v10076_v6, 0.0  ;;  %v1625_v33 = vpop.xlane.xlu0 %1624 }
 0x38a   :  { %8920 = vpow2.f32 %v1668_v30  ;;  %1699 = vadd.xlane.f32.xlu1 %v1698_v61  ;;  %v1645_v4 = vsub.f32 %v9974_v48, %v1625_v33  ;;  %v10110_v33 = vpop.permute.xlu1 %2501 }
 0x38b   :  { %v10081_v43 = vpop.eup %8914 }
 0x38c   :  { %v1674_v27 = vmul.f32 1.442695, %v1645_v4  ;;  %v1707_v41 = vsel %vm1583_vm4, %v10081_v43, 0.0 }
 0x38d   :  { %1708 = vadd.xlane.f32.xlu0 %v1707_v41  ;;  %v1622_v36 = vpop.xlane.xlu0 %1621 }
 0x38e   :  { %8922 = vpow2.f32 %v1674_v27  ;;  %v1644_v46 = vsub.f32 %v9978_v1, %v1622_v36  ;;  %v10114_v4 = vpop.permute.xlu1 %2685 }
 0x38f   :  { %v10086_v57 = vpop.eup %8916 }
 0x390   :  { %v1672_v55 = vmul.f32 1.442695, %v1644_v46  ;;  %v1704_v51 = vsel %vm1583_vm4, %v10086_v57, 0.0 }
 0x391   :  { %1705 = vadd.xlane.f32.xlu0 %v1704_v51 }
 0x392   :  { %8924 = vpow2.f32 %v1672_v55 }
 0x393   :  { %v10090_v48 = vpop.eup %8918 }
 0x394   :  { %v1713_v22 = vsel %vm1583_vm4, %v10090_v48, 0.0 }
 0x395   :  { %1714 = vadd.xlane.f32.xlu1 %v1713_v22 }
 0x397   :  { %v10094_v49 = vpop.eup %8920 }
 0x398   :  { %v1710_v59 = vsel %vm1583_vm4, %v10094_v49, 0.0 }
 0x399   :  { %1711 = vadd.xlane.f32.xlu1 %v1710_v59 }
 0x39b   :  { %v10098_v1 = vpop.eup %8922 }
 0x39c   :  { %v1719_v17 = vsel %vm1583_vm4, %v10098_v1, 0.0 }
 0x39d   :  { %1720 = vadd.xlane.f32.xlu0 %v1719_v17  ;;  %v10148_v17 = vpop.permute.xlu0 %2410 }
 0x39f   :  { %v10102_v30 = vpop.eup %8924 }
 0x3a0   :  { %v1716_v61 = vsel %vm1583_vm4, %v10102_v30, 0.0 }
 0x3a1   :  { %1717 = vadd.xlane.f32.xlu0 %v1716_v61  ;;  %v10158_v61 = vpop.permute.xlu0 %2594 }
 0x3aa   :  { %2869 = vrot.lane.b32.xlu1 %v9712_v47, %s9193_s13 }
 0x3ae   :  { %2683 = vrot.lane.b32.xlu1 %v9688_v9, %s9193_s13 }
 0x3b7   :  { %2778 = vrot.lane.b32.xlu0 %v9683_v7, %s9193_s13 }
 0x3bb   :  { %2592 = vrot.lane.b32.xlu0 %v9651_v19, %s9193_s13 }
 0x3be   :  { %v1631_v27 = vpop.xlane.xlu1 %1630 }
 0x3bf   :  { %v1647_v41 = vsub.f32 %v10008_v13, %v1631_v27  ;;  %2776 = vrot.lane.b32.xlu0 %v9691_v39, %s9193_s13  ;;  %v10162_v27 = vadd.f32 %v9825_v28, %v9567_v25 }
 0x3c1   :  { %v1678_v36 = vmul.f32 1.442695, %v1647_v41  ;;  %12050 = vst [vmem:[#allocation38_spill] sm:$0xff] %v10162_v27  ;;  %v10168_v41 = vpop.permute.xlu0 %2590 }
 0x3c2   :  { %v1628_v46 = vpop.xlane.xlu1 %1627 }
 0x3c3   :  { %8926 = vpow2.f32 %v1678_v36  ;;  %v1646_v55 = vsub.f32 %v10012_v42, %v1628_v46  ;;  %2772 = vrot.lane.b32.xlu0 %v9660_v62, %s9193_s13 }
 0x3c5   :  { %v1676_v51 = vmul.f32 1.442695, %v1646_v55 }
 0x3c6   :  { %v10178_v25 = vpop.permute.xlu1 %2681 }
 0x3c7   :  { %8928 = vpow2.f32 %v1676_v51  ;;  %2960 = vrot.lane.b32.xlu0 %v9736_v52, %s9193_s13 }
 0x3cb   :  { %2774 = vrot.lane.b32.xlu0 %v9709_v35, %s9193_s13 }
 0x3cf   :  { %2958 = vrot.lane.b32.xlu0 %v9739_v53, %s9193_s13 }
 0x3d0   :  { %v10130_v13 = vpop.eup %8926 }
 0x3d1   :  { %v1725_v22 = vsel %vm1583_vm4, %v10130_v13, 0.0 }
 0x3d2   :  { %1726 = vadd.xlane.f32.xlu1 %v1725_v22 }
 0x3d3   :  { %2954 = vrot.lane.b32.xlu0 %v9718_v40, %s9193_s13 }
 0x3d4   :  { %v10136_v42 = vpop.eup %8928 }
 0x3d5   :  { %v1722_v59 = vsel %vm1583_vm4, %v10136_v42, 0.0 }
 0x3d6   :  { %1723 = vadd.xlane.f32.xlu1 %v1722_v59  ;;  %v12051_v59 = vld [vmem:[#allocation22_spill] sm:$0xff] }
 0x3d7   :  { %2956 = vrot.lane.b32.xlu0 %v9761_v0, %s9193_s13 }
 0x3db   :  { %3348 = vrot.lane.b32.xlu0 %v9756_v29, %s9193_s13 }
 0x3df   :  { %3526 = vrot.lane.b32.xlu0 %v9783_v24, %s9193_s13 }
 0x3e3   :  { %3524 = vrot.lane.b32.xlu0 %v9586_v14, %s9193_s13 }
 0x3e7   :  { %2867 = vrot.lane.b32.xlu1 %v9715_v37, %s9193_s13  ;;  %3704 = vrot.lane.b32.xlu0 %v9638_v18, %s9193_s13 }
 0x3eb   :  { %2863 = vrot.lane.b32.xlu1 %v9694_v21, %s9193_s13  ;;  %3702 = vrot.lane.b32.xlu0 %v9619_v3, %s9193_s13 }
 0x3ef   :  { %3051 = vrot.lane.b32.xlu1 %v9764_v31, %s9193_s13  ;;  %3882 = vrot.lane.b32.xlu0 %v10162_v27, %s9193_s13 }
 0x3f3   :  { %2865 = vrot.lane.b32.xlu1 %v9733_v50, %s9193_s13  ;;  %3880 = vrot.lane.b32.xlu0 %v9654_v60, %s9193_s13 }
 0x3f6   :  { %v1685_v36 = vpop.xlane.xlu0 %1684 }
 0x3f7   :  { %3049 = vrot.lane.b32.xlu1 %v9772_v11, %s9193_s13  ;;  %4062 = vrot.lane.b32.xlu0 %v9546_v16, %s9194_s17  ;;  %8930 = vrcp.f32 %v1685_v36 }
 0x3fa   :  { %v1682_v28 = vpop.xlane.xlu0 %1681 }
 0x3fb   :  { %8932 = vrcp.f32 %v1682_v28  ;;  %3045 = vrot.lane.b32.xlu1 %v9742_v54, %s9193_s13  ;;  %4060 = vrot.lane.b32.xlu0 %v9535_v38, %s9194_s17 }
 0x3fe   :  { %v1691_v46 = vpop.xlane.xlu1 %1690 }
 0x3ff   :  { %3047 = vrot.lane.b32.xlu1 %v9797_v10, %s9193_s13  ;;  %4056 = vrot.lane.b32.xlu0 %v9532_v5, %s9194_s17  ;;  %8934 = vrcp.f32 %v1691_v46 }
 0x402   :  { %v1688_v55 = vpop.xlane.xlu1 %1687 }
 0x403   :  { %8936 = vrcp.f32 %v1688_v55  ;;  %3437 = vrot.lane.b32.xlu1 %v9791_v2, %s9193_s13  ;;  %4244 = vrot.lane.b32.xlu0 %v9613_v58, %s9194_s17  ;;  %v12052_v55 = vld [vmem:[#allocation25_spill] sm:$0xff] }
 0x404   :  { %v8931_v51 = vpop.eup %8930 }
 0x405   :  { %v1745_v10 = vmul.f32 %v8931_v51, %v10040_v63  ;;  %v12053_v63 = vld [vmem:[#allocation26_spill] sm:$0xff] }
 0x407   :  { %v1697_v22 = vpop.xlane.xlu0 %1696  ;;  %3346 = vrot.lane.b32.xlu1 %v12051_v59, %s9193_s13 }
 0x408   :  { %v8933_v36 = vpop.eup %8932  ;;  %8938 = vrcp.f32 %v1697_v22 }
 0x409   :  { %v1744_v28 = vmul.f32 %v8933_v36, %v10045_v12  ;;  %v12054_v36 = vld [vmem:[#allocation7_spill] sm:$0xff] }
 0x40b   :  { %v1694_v46 = vpop.xlane.xlu0 %1693  ;;  %3435 = vrot.lane.b32.xlu1 %v12052_v55, %s9193_s13  ;;  %8439 = vmatprep.mubr.msk.f32.mxu0 %vm1583_vm4, %v1744_v28 }
 0x40c   :  { %8940 = vrcp.f32 %v1694_v46  ;;  %8440 = vmatmul.mubr.msk.f32.vlgmr.msra.gmra.mxu0 %vm1583_vm4, %v1745_v10  ;;  %v8935_v59 = vpop.eup %8934 }
 0x40d   :  { %8450 = vmatpush3.msra.mxu0 %v9783_v24  ;;  %v1747_v22 = vmul.f32 %v8935_v59, %v10050_v23 }
 0x40e   :  { %8451 = vmatprep.subr.mxu0 %v9586_v14 }
 0x40f   :  { %v1703_v2 = vpop.xlane.xlu1 %1702  ;;  %8452 = vmatpush3.msra.mxu0 %v9586_v14  ;;  %3615 = vrot.lane.b32.xlu1 %v12053_v63, %s9193_s13 }
 0x410   :  { %v8937_v12 = vpop.eup %8936  ;;  %8463 = vmatprep.subr.mxu0 %v9638_v18  ;;  %8942 = vrcp.f32 %v1703_v2 }
 0x411   :  { %v1746_v51 = vmul.f32 %v8937_v12, %v10055_v32  ;;  %v12055_v32 = vld [vmem:[#allocation15_spill] sm:$0xff]  ;;  %v12056_v12 = vld [vmem:[#allocation10_spill] sm:$0xff] }
 0x413   :  { %v1700_v10 = vpop.xlane.xlu1 %1699  ;;  %3613 = vrot.lane.b32.xlu1 %v12054_v36, %s9193_s13  ;;  %8446 = vmatprep.mubr.msk.f32.mxu1 %vm1583_vm4, %v1746_v51 }
 0x414   :  { %8944 = vrcp.f32 %v1700_v10  ;;  %8447 = vmatmul.mubr.msk.f32.vlgmr.msra.gmra.mxu1 %vm1583_vm4, %v1747_v22  ;;  %v12057_v10 = vld [vmem:[#allocation21_spill] sm:$0xff] }
 0x415   :  { %8457 = vmatpush3.msra.mxu1 %v12053_v63  ;;  %v8939_v2 = vpop.eup %8938 }
 0x416   :  { %8458 = vmatprep.subr.mxu1 %v12054_v36  ;;  %v1709_v28 = vpop.xlane.xlu0 %1708  ;;  %v1749_v51 = vmul.f32 %v8939_v2, %v10061_v44 }
 0x417   :  { %8459 = vmatpush3.msra.mxu1 %v12054_v36  ;;  %3793 = vrot.lane.b32.xlu1 %v12055_v32, %s9193_s13  ;;  %8946 = vrcp.f32 %v1709_v28 }
 0x418   :  { %8470 = vmatprep.subr.mxu1 %v12055_v32 }
 0x419   :  { %v8941_v23 = vpop.eup %8940 }
 0x41a   :  { %v1706_v59 = vpop.xlane.xlu0 %1705  ;;  %v1748_v46 = vmul.f32 %v8941_v23, %v10066_v26  ;;  %v12058_v23 = vld [vmem:[#allocation16_spill] sm:$0xff] }
 0x41b   :  { %8948 = vrcp.f32 %v1706_v59  ;;  %3791 = vrot.lane.b32.xlu1 %v12056_v12, %s9193_s13 }
 0x41c   :  { %8453 = vmatprep.mubr.msk.f32.mxu0 %vm1583_vm4, %v1748_v46 }
 0x41d   :  { %8454 = vmatmul.mubr.msk.f32.vlgmr.msra.gmra.mxu0 %vm1583_vm4, %v1749_v51  ;;  %v8943_v28 = vpop.eup %8942 }
 0x41e   :  { %8464 = vmatpush3.msra.mxu0 %v9638_v18  ;;  %v1715_v22 = vpop.xlane.xlu1 %1714  ;;  %v1751_v59 = vmul.f32 %v8943_v28, %v10071_v8 }
 0x41f   :  { %8465 = vmatprep.subr.mxu0 %v9619_v3  ;;  %3971 = vrot.lane.b32.xlu1 %v12057_v10, %s9193_s13  ;;  %8950 = vrcp.f32 %v1715_v22  ;;  %v12059_v22 = vld [vmem:[#allocation9_spill] sm:$0xff] }
 0x420   :  { %8466 = vmatpush3.msra.mxu0 %v9619_v3 }
 0x421   :  { %v8945_v26 = vpop.eup %8944  ;;  %8477 = vmatprep.subr.mxu0 %v10162_v27 }
 0x422   :  { %v1712_v44 = vpop.xlane.xlu1 %1711  ;;  %v1750_v2 = vmul.f32 %v8945_v26, %v10076_v6 }
 0x423   :  { %8952 = vrcp.f32 %v1712_v44  ;;  %3969 = vrot.lane.b32.xlu1 %v12058_v23, %s9193_s13  ;;  %v12060_v44 = vld [vmem:[#allocation6_spill] sm:$0xff] }
 0x424   :  { %8460 = vmatprep.mubr.msk.f32.mxu1 %vm1583_vm4, %v1750_v2  ;;  %v8947_v51 = vpop.eup %8946 }
 0x425   :  { %8461 = vmatmul.mubr.msk.f32.vlgmr.msra.gmra.mxu1 %vm1583_vm4, %v1751_v59  ;;  %v1753_v26 = vmul.f32 %v8947_v51, %v10081_v43 }
 0x426   :  { %8471 = vmatpush3.msra.mxu1 %v12055_v32  ;;  %v1721_v46 = vpop.xlane.xlu0 %1720 }
 0x427   :  { %8472 = vmatprep.subr.mxu1 %v12056_v12  ;;  %4153 = vrot.lane.b32.xlu1 %v12059_v22, %s9194_s17  ;;  %8954 = vrcp.f32 %v1721_v46 }
 0x428   :  { %v8949_v6 = vpop.eup %8948  ;;  %8473 = vmatpush3.msra.mxu1 %v12056_v12 }
 0x429   :  { %8484 = vmatprep.subr.mxu1 %v12057_v10  ;;  %v1752_v8 = vmul.f32 %v8949_v6, %v10086_v57  ;;  %v12061_v57 = vld [vmem:[#allocation5_spill] sm:$0xff] }
 0x42a   :  { %v1718_v28 = vpop.xlane.xlu0 %1717 }
 0x42b   :  { %8956 = vrcp.f32 %v1718_v28  ;;  %4151 = vrot.lane.b32.xlu1 %v12060_v44, %s9194_s17  ;;  %8467 = vmatprep.mubr.msk.f32.mxu0 %vm1583_vm4, %v1752_v8  ;;  %v12062_v8 = vld [vmem:[#allocation17_spill] sm:$0xff] }
 0x42c   :  { %8468 = vmatmul.mubr.msk.f32.vlgmr.msra.gmra.mxu0 %vm1583_vm4, %v1753_v26  ;;  %v8951_v59 = vpop.eup %8950 }
 0x42d   :  { %8478 = vmatpush3.msra.mxu0 %v10162_v27  ;;  %v1755_v6 = vmul.f32 %v8951_v59, %v10090_v48 }
 0x42e   :  { %8479 = vmatprep.subr.mxu0 %v9654_v60  ;;  %v2779_v2 = vpop.permute.xlu0 %2778 }
 0x42f   :  { %8480 = vmatpush3.msra.mxu0 %v9654_v60  ;;  %4147 = vrot.lane.b32.xlu1 %v12061_v57, %s9194_s17 }
 0x430   :  { %v8953_v43 = vpop.eup %8952  ;;  %8491 = vmatprep.subr.msk.mxu0 %vm806_vm0, %v10026_v34 }
 0x431   :  { %v1754_v46 = vmul.f32 %v8953_v43, %v10094_v49 }
 0x432   :  { %v2593_v51 = vpop.permute.xlu0 %2592 }
 0x433   :  { %4335 = vrot.lane.b32.xlu1 %v12062_v8, %s9194_s17  ;;  %8474 = vmatprep.mubr.msk.f32.mxu1 %vm1583_vm4, %v1754_v46 }
 0x434   :  { %8475 = vmatmul.mubr.msk.f32.vlgmr.msra.gmra.mxu1 %vm1583_vm4, %v1755_v6  ;;  %v8955_v26 = vpop.eup %8954 }
 0x435   :  { %8485 = vmatpush3.msra.mxu1 %v12057_v10  ;;  %v1757_v59 = vmul.f32 %v8955_v26, %v10098_v1 }
 0x436   :  { %8486 = vmatprep.subr.mxu1 %v12058_v23  ;;  %v2777_v28 = vpop.permute.xlu0 %2776 }
 0x437   :  { %8487 = vmatpush3.msra.mxu1 %v12058_v23 }
 0x438   :  { %v8957_v57 = vpop.eup %8956  ;;  %8498 = vmatprep.subr.msk.mxu1 %vm806_vm0, %v10032_v20 }
 0x439   :  { %v1756_v48 = vmul.f32 %v8957_v57, %v10102_v30  ;;  %v12063_v30 = vld [vmem:[#allocation37_spill] sm:$0xff] }
 0x43a   :  { %v2773_v49 = vpop.permute.xlu0 %2772 }
 0x43b   :  { %8481 = vmatprep.mubr.msk.f32.mxu0 %vm1583_vm4, %v1756_v48 }
 0x43c   :  { %8482 = vmatmul.mubr.msk.f32.vlgmr.msra.gmra.mxu0 %vm1583_vm4, %v1757_v59 }
 0x43d   :  { %8492 = vmatpush3.xpose.msk.msra.mxu0 %vm806_vm0, %v10026_v34  ;;  %8495 = vmatprep.mubr.msk.f32.mxu0 %vm806_vm0, %v10022_v56  ;;  %v2870_v34 = vpop.permute.xlu1 %2869 }
 0x43e   :  { %8493 = vmatprep.subr.msk.mxu0 %vm806_vm0, %v10018_v45  ;;  %v2961_v43 = vpop.permute.xlu0 %2960 }
 0x441   :  { %8494 = vmatpush3.xpose.msk.msra.mxu0 %vm806_vm0, %v10018_v45 }
 0x442   :  { %8505 = vmatprep.subr.msk.mxu0 %vm806_vm0, %v12063_v30  ;;  %v2775_v1 = vpop.permute.xlu0 %2774 }
 0x444   :  { %8496 = vmatmul.mubr.msk.f32.vlgmr.msra.gmra.mxu0 %vm806_vm0, %v10148_v17 }
 0x445   :  { %8506 = vmatpush3.xpose.msk.msra.mxu0 %vm806_vm0, %v12063_v30  ;;  %8509 = vmatprep.mubr.msk.f32.mxu0 %vm806_vm0, %v10168_v41  ;;  %v12065_v30 = vld [vmem:[#allocation36_spill] sm:$0xff] }
 0x446   :  { %8507 = vmatprep.subr.msk.mxu0 %vm806_vm0, %v10158_v61  ;;  %v2959_v56 = vpop.permute.xlu0 %2958 }
 0x449   :  { %8508 = vmatpush3.xpose.msk.msra.mxu0 %vm806_vm0, %v10158_v61  ;;  %v2684_v61 = vpop.permute.xlu1 %2683 }
 0x44a   :  { %8519 = vmatprep.subr.msk.mxu0 %vm806_vm0, %v2779_v2  ;;  %v2955_v45 = vpop.permute.xlu0 %2954 }
 0x44c   :  { %8510 = vmatmul.mubr.msk.f32.vlgmr.msra.gmra.mxu0 %vm806_vm0, %v2593_v51 }
 0x44d   :  { %8520 = vmatpush3.xpose.msk.msra.mxu0 %vm806_vm0, %v2779_v2  ;;  %8523 = vmatprep.mubr.msk.f32.mxu0 %vm806_vm0, %v2773_v49 }
 0x44e   :  { %8521 = vmatprep.subr.msk.mxu0 %vm806_vm0, %v2777_v28  ;;  %v2957_v17 = vpop.permute.xlu0 %2956 }
 0x451   :  { %8522 = vmatpush3.xpose.msk.msra.mxu0 %vm806_vm0, %v2777_v28 }
 0x452   :  { %8533 = vmatprep.subr.msk.mxu0 %vm806_vm0, %v2961_v43  ;;  %v3349_v41 = vpop.permute.xlu0 %3348 }
 0x454   :  { %8524 = vmatmul.mubr.msk.f32.vlgmr.msra.gmra.mxu0 %vm806_vm0, %v2775_v1 }
 0x455   :  { %8534 = vmatpush3.xpose.msk.msra.mxu0 %vm806_vm0, %v2961_v43  ;;  %8537 = vmatprep.mubr.msk.f32.mxu0 %vm806_vm0, %v2955_v45  ;;  %v12064_v43 = vld [vmem:[#allocation35_spill] sm:$0xff] }
 0x456   :  { %8535 = vmatprep.subr.msk.mxu0 %vm806_vm0, %v2959_v56 }
 0x459   :  { %8536 = vmatpush3.xpose.msk.msra.mxu0 %vm806_vm0, %v2959_v56 }
 0x45a   :  { %8547 = vmatprep.subr.mxu0 %v3349_v41 }
 0x45b   :  { %v1727_v2 = vpop.xlane.xlu1 %1726 }
 0x45c   :  { %8538 = vmatmul.mubr.msk.f32.vlgmr.msra.gmra.mxu0 %vm806_vm0, %v2957_v17  ;;  %8958 = vrcp.f32 %v1727_v2 }
 0x45d   :  { %8548 = vmatpush3.msra.mxu0 %v3349_v41 }
 0x45f   :  { %v1724_v57 = vpop.xlane.xlu1 %1723 }
 0x460   :  { %8960 = vrcp.f32 %v1724_v57  ;;  %v8044_v57 = vld [vmem:[%s11888_s1 + $0x8] sm:$0xff]  }
 0x463   :  { %v2868_v46 = vpop.permute.xlu1 %2867 }
 0x467   :  { %v2864_v51 = vpop.permute.xlu1 %2863 }
 0x469   :  { %v8959_v28 = vpop.eup %8958 }
 0x46a   :  { %v1759_v59 = vmul.f32 %v8959_v28, %v10130_v13  ;;  %v7922_v28 = vunpack.c.l.bf16 %v8044_v57 }
 0x46b   :  { %v3052_v6 = vpop.permute.xlu1 %3051 }
 0x46d   :  { %v8961_v26 = vpop.eup %8960 }
 0x46e   :  { %v1758_v48 = vmul.f32 %v8961_v26, %v10136_v42 }
 0x46f   :  { %v2866_v49 = vpop.permute.xlu1 %2865 }
 0x470   :  { %8488 = vmatprep.mubr.msk.f32.mxu1 %vm1583_vm4, %v1758_v48 }
 0x471   :  { %8489 = vmatmul.mubr.msk.f32.vlgmr.msra.gmra.mxu1 %vm1583_vm4, %v1759_v59 }
 0x472   :  { %8499 = vmatpush3.xpose.msk.msra.mxu1 %vm806_vm0, %v10032_v20  ;;  %8502 = vmatprep.mubr.msk.f32.mxu1 %vm806_vm0, %v12064_v43 }
 0x473   :  { %8500 = vmatprep.subr.msk.mxu1 %vm806_vm0, %v12065_v30  ;;  %v3050_v1 = vpop.permute.xlu1 %3049 }
 0x476   :  { %8501 = vmatpush3.xpose.msk.msra.mxu1 %vm806_vm0, %v12065_v30 }
 0x477   :  { %8512 = vmatprep.subr.msk.mxu1 %vm806_vm0, %v10035_v15  ;;  %v3046_v13 = vpop.permute.xlu1 %3045 }
 0x479   :  { %8503 = vmatmul.mubr.msk.f32.vlgmr.msra.gmra.mxu1 %vm806_vm0, %v10110_v33  ;;  %v10332_v33 = vpop.permute.xlu0 %3526 }
 0x47a   :  { %8513 = vmatpush3.xpose.msk.msra.mxu1 %vm806_vm0, %v10035_v15  ;;  %8516 = vmatprep.mubr.msk.f32.mxu1 %vm806_vm0, %v10178_v25 }
 0x47b   :  { %8514 = vmatprep.subr.msk.mxu1 %vm806_vm0, %v10114_v4  ;;  %v3048_v20 = vpop.permute.xlu1 %3047 }
 0x47e   :  { %8515 = vmatpush3.xpose.msk.msra.mxu1 %vm806_vm0, %v10114_v4 }
 0x47f   :  { %8526 = vmatprep.subr.msk.mxu1 %vm806_vm0, %v2870_v34  ;;  %v3438_v42 = vpop.permute.xlu1 %3437 }
 0x481   :  { %8517 = vmatmul.mubr.msk.f32.vlgmr.msra.gmra.mxu1 %vm806_vm0, %v2684_v61 }
 0x482   :  { %8527 = vmatpush3.xpose.msk.msra.mxu1 %vm806_vm0, %v2870_v34  ;;  %8530 = vmatprep.mubr.msk.f32.mxu1 %vm806_vm0, %v2864_v51  ;;  %v7923_v51 = vunpack.c.h.bf16 %v8044_v57 }
 0x483   :  { %8528 = vmatprep.subr.msk.mxu1 %vm806_vm0, %v2868_v46  ;;  %v3347_v15 = vpop.permute.xlu1 %3346 }
 0x484   :  { %8549 = vmatprep.subr.mxu0 %v3347_v15 }
 0x485   :  { %8550 = vmatpush3.msra.mxu0 %v3347_v15 }
 0x486   :  { %8529 = vmatpush3.xpose.msk.msra.mxu1 %vm806_vm0, %v2868_v46  ;;  %8561 = vmatprep.subr.mxu0 %v10332_v33 }
 0x487   :  { %8540 = vmatprep.subr.msk.mxu1 %vm806_vm0, %v3052_v6  ;;  %v3436_v4 = vpop.permute.xlu1 %3435 }
 0x489   :  { %8531 = vmatmul.mubr.msk.f32.vlgmr.msra.gmra.mxu1 %vm806_vm0, %v2866_v49 }
 0x48a   :  { %8541 = vmatpush3.xpose.msk.msra.mxu1 %vm806_vm0, %v3052_v6  ;;  %8544 = vmatprep.mubr.msk.f32.mxu1 %vm806_vm0, %v3046_v13 }
 0x48b   :  { %8542 = vmatprep.subr.msk.mxu1 %vm806_vm0, %v3050_v1  ;;  %v10343_v25 = vpop.permute.xlu1 %3615 }
 0x48c   :  { %12066 = vst [vmem:[#allocation25_spill] sm:$0xff] %v10343_v25 }
 0x48e   :  { %8543 = vmatpush3.xpose.msk.msra.mxu1 %vm806_vm0, %v3050_v1 }
 0x48f   :  { %8554 = vmatprep.subr.mxu1 %v3438_v42 }
 0x491   :  { %8545 = vmatmul.mubr.msk.f32.vlgmr.msra.gmra.mxu1 %vm806_vm0, %v3048_v20 }
 0x492   :  { %8555 = vmatpush3.msra.mxu1 %v3438_v42 }
 0x493   :  { %8556 = vmatprep.subr.mxu1 %v3436_v4 }
 0x494   :  { %8557 = vmatpush3.msra.mxu1 %v3436_v4 }
 0x495   :  { %8568 = vmatprep.subr.mxu1 %v10343_v25 }
 0x4cc   :  { %v10346_v56 = vpop.f32.mrf.mxu0 }
 0x4cd   :  { %12067 = vst [vmem:[#allocation26_spill] sm:$0xff] %v10346_v56 }
 0x4ce   :  { %v10348_v45 = vpop.f32.mrf.mxu0 }
 0x4cf   :  { %12068 = vst [vmem:[#allocation7_spill] sm:$0xff] %v10348_v45 }
 0x4d4   :  { %v10377_v20 = vpop.f32.mrf.mxu1 }
 0x4d5   :  { %12076 = vst [vmem:[#allocation42_spill] sm:$0xff] %v10377_v20 }
 0x4d6   :  { %v10379_v42 = vpop.f32.mrf.mxu1 }
 0x4d7   :  { %12077 = vst [vmem:[#allocation43_spill] sm:$0xff] %v10379_v42 }
 0x4dd   :  { %v10350_v34 = vpop.f32.mrf.mxu0 }
 0x4de   :  { %12069 = vst [vmem:[#allocation37_spill] sm:$0xff] %v10350_v34 }
 0x4df   :  { %v10352_v17 = vpop.f32.mrf.mxu0 }
 0x4e0   :  { %12070 = vst [vmem:[#allocation35_spill] sm:$0xff] %v10352_v17 }
 0x4e5   :  { %v10381_v15 = vpop.f32.mrf.mxu1 }
 0x4e6   :  { %12078 = vst [vmem:[#allocation44_spill] sm:$0xff] %v10381_v15 }
 0x4e7   :  { %v10383_v4 = vpop.f32.mrf.mxu1 }
 0x4e8   :  { %12079 = vst [vmem:[#allocation45_spill] sm:$0xff] %v10383_v4 }
 0x4ec   :  { %v10354_v61 = vpop.f32.mrf.mxu0 }
 0x4ed   :  { %12071 = vst [vmem:[#allocation36_spill] sm:$0xff] %v10354_v61 }
 0x4ee   :  { %v10356_v41 = vpop.f32.mrf.mxu0 }
 0x4ef   :  { %12072 = vst [vmem:[#allocation39_spill] sm:$0xff] %v10356_v41 }
 0x4f4   :  { %v10385_v57 = vpop.f32.mrf.mxu1 }
 0x4f5   :  { %12080 = vst [vmem:[#allocation46_spill] sm:$0xff] %v10385_v57 }
 0x4fc   :  { %v10358_v2 = vpop.f32.mrf.mxu0 }
 0x4fd   :  { %12073 = vst [vmem:[#allocation40_spill] sm:$0xff] %v10358_v2 }
 0x4fe   :  { %v10363_v46 = vpop.f32.mrf.mxu0 }
 0x4ff   :  { %12074 = vst [vmem:[#allocation41_spill] sm:$0xff] %v10363_v46 }
 0x504   :  { %v8497_v6 = vpop.f32.mrf.mxu0 }
 0x505   :  { %v3137_v48 = vsel %vm9827_vm3, -1e+09, %v8497_v6 }
 0x506   :  { %v10367_v49 = vadd.f32 %v7923_v51, %v3137_v48  ;;  %v2490_v59 = vpop.f32.mrf.mxu0  ;;  %v10387_v51 = vpop.f32.mrf.mxu1  ;;  %v8052_v48 = vld [vmem:[%s11888_s1 + $0x48] sm:$0xff]  }
 0x507   :  { %v3136_v43 = vsel %vm9827_vm3, -1e+09, %v2490_v59  ;;  %12081 = vst [vmem:[#allocation47_spill] sm:$0xff] %v10387_v51 }
 0x508   :  { %v10371_v30 = vadd.f32 %v7922_v28, %v3136_v43  ;;  %v3171_v1 = vsel %vm1583_vm4, %v10367_v49, -inf  ;;  %v8048_v28 = vld [vmem:[%s11888_s1 + $0x28] sm:$0xff]  }
 0x509   :  { %3172 = vmax.xlane.f32.xlu0 %v3171_v1  ;;  %v7939_v1 = vunpack.c.h.bf16 %v8048_v28  ;;  %v7938_v56 = vunpack.c.l.bf16 %v8048_v28  ;;  %v7954_v28 = vunpack.c.l.bf16 %v8052_v48 }
 0x50a   :  { %v3168_v13 = vsel %vm1583_vm4, %v10371_v30, -inf }
 0x50c   :  { %v8511_v59 = vpop.f32.mrf.mxu0 }
 0x50d   :  { %3169 = vmax.xlane.f32.xlu0 %v3168_v13  ;;  %v7955_v13 = vunpack.c.h.bf16 %v8052_v48  ;;  %v3141_v57 = vsel %vm9873_vm8, -1e+09, %v8511_v59 }
 0x50e   :  { %v2672_v15 = vpop.f32.mrf.mxu0 }
 0x50f   :  { %v10410_v51 = vadd.f32 %v7955_v13, %v3141_v57 }
 0x511   :  { %v3183_v13 = vsel %vm1583_vm4, %v10410_v51, -inf }
 0x531   :  { %v10389_v6 = vpop.f32.mrf.mxu1 }
 0x532   :  { %12082 = vst [vmem:[#allocation48_spill] sm:$0xff] %v10389_v6 }
 0x533   :  { %v10397_v43 = vpop.f32.mrf.mxu1 }
 0x534   :  { %12083 = vst [vmem:[#allocation49_spill] sm:$0xff] %v10397_v43  ;;  %v8056_v43 = vld [vmem:[%s11888_s1 + $0x68] sm:$0xff]  }
 0x535   :  { %v7971_v57 = vunpack.c.h.bf16 %v8056_v43  ;;  %v7970_v4 = vunpack.c.l.bf16 %v8056_v43 }
 0x539   :  { %v8504_v45 = vpop.f32.mrf.mxu1 }
 0x53a   :  { %v3139_v6 = vsel %vm9849_vm6, -1e+09, %v8504_v45  ;;  %v3140_v45 = vsel %vm9873_vm8, -1e+09, %v2672_v15 }
 0x53b   :  { %v10403_v34 = vadd.f32 %v7939_v1, %v3139_v6  ;;  %v2581_v20 = vpop.f32.mrf.mxu1  ;;  %v8060_v6 = vld [vmem:[%s11888_s1 + $0x88] sm:$0xff]   ;;  %v10423_v48 = vadd.f32 %v7954_v28, %v3140_v45 }
 0x53c   :  { %v3138_v46 = vsel %vm9849_vm6, -1e+09, %v2581_v20  ;;  %v8525_v20 = vpop.f32.mrf.mxu0  ;;  %v8064_v45 = vld [vmem:[%s11888_s1 + $0xa8] sm:$0xff]  }
 0x53d   :  { %v10412_v41 = vadd.f32 %v7938_v56, %v3138_v46  ;;  %v3177_v59 = vsel %vm1583_vm4, %v10403_v34, -inf  ;;  %v7987_v56 = vunpack.c.h.bf16 %v8060_v6  ;;  %v3145_v17 = vsel %vm9921_vm12, -1e+09, %v8525_v20  ;;  %v8068_v20 = vld [vmem:[%s11888_s1 + $0xc8] sm:$0xff]  }
 0x53e   :  { %3178 = vmax.xlane.f32.xlu0 %v3177_v59  ;;  %v2854_v61 = vpop.f32.mrf.mxu0  ;;  %v8002_v8 = vunpack.c.l.bf16 %v8064_v45 }
 0x53f   :  { %v3174_v1 = vsel %vm1583_vm4, %v10412_v41, -inf  ;;  %v10438_v43 = vadd.f32 %v7987_v56, %v3145_v17  ;;  %v8003_v17 = vunpack.c.h.bf16 %v8064_v45  ;;  %v8019_v56 = vunpack.c.h.bf16 %v8068_v20 }
 0x540   :  { %3175 = vmax.xlane.f32.xlu1 %v3174_v1  ;;  %v7986_v1 = vunpack.c.l.bf16 %v8060_v6  ;;  %v3180_v6 = vsel %vm1583_vm4, %v10423_v48, -inf }
 0x541   :  { %v8518_v46 = vpop.f32.mrf.mxu1 }
 0x542   :  { %v3143_v59 = vsel %vm9897_vm10, -1e+09, %v8518_v46  ;;  %3184 = vmax.xlane.f32.xlu0 %v3183_v13  ;;  %v8539_v13 = vpop.f32.mrf.mxu0 }
 0x543   :  { %v10431_v2 = vadd.f32 %v7971_v57, %v3143_v59  ;;  %v2763_v26 = vpop.f32.mrf.mxu1  ;;  %v3149_v22 = vsel %vm9966_vm15, -1e+09, %v8539_v13 }
 0x544   :  { %v3142_v28 = vsel %vm9897_vm10, -1e+09, %v2763_v26  ;;  %v3144_v26 = vsel %vm9921_vm12, -1e+09, %v2854_v61  ;;  %v10465_v23 = vadd.f32 %v8019_v56, %v3149_v22  ;;  %v12090_v56 = vld [vmem:[#allocation11_spill] sm:$0xff] }
 0x545   :  { %v10443_v46 = vadd.f32 %v7970_v4, %v3142_v28  ;;  %v3189_v57 = vsel %vm1583_vm4, %v10431_v2, -inf  ;;  %v10451_v59 = vadd.f32 %v7986_v1, %v3144_v26  ;;  %v3195_v28 = vsel %vm1583_vm4, %v10438_v43, -inf }
 0x546   :  { %3190 = vmax.xlane.f32.xlu1 %v3189_v57  ;;  %3181 = vmax.xlane.f32.xlu0 %v3180_v6  ;;  %v3036_v57 = vpop.f32.mrf.mxu0  ;;  %v8018_v26 = vunpack.c.l.bf16 %v8068_v20  ;;  %v3207_v22 = vsel %vm1583_vm4, %v10465_v23, -inf }
 0x547   :  { %v3186_v4 = vsel %vm1583_vm4, %v10443_v46, -inf  ;;  %v3148_v13 = vsel %vm9966_vm15, -1e+09, %v3036_v57  ;;  %v12093_v57 = vld [vmem:[#allocation8_spill] sm:$0xff] }
 0x549   :  { %v8532_v42 = vpop.f32.mrf.mxu1 }
 0x54a   :  { %v3147_v61 = vsel %vm9945_vm14, -1e+09, %v8532_v42  ;;  %3187 = vmax.xlane.f32.xlu1 %v3186_v4  ;;  %3196 = vmax.xlane.f32.xlu0 %v3195_v28  ;;  %v3192_v42 = vsel %vm1583_vm4, %v10451_v59, -inf  ;;  %v12091_v28 = vld [vmem:[#allocation20_spill] sm:$0xff] }
 0x54b   :  { %v10461_v6 = vadd.f32 %v8003_v17, %v3147_v61  ;;  %v2945_v1 = vpop.f32.mrf.mxu1  ;;  %v10475_v17 = vadd.f32 %v8018_v26, %v3148_v13  ;;  %v12095_v26 = vld [vmem:[#allocation14_spill] sm:$0xff] }
 0x54c   :  { %v3146_v25 = vsel %vm9945_vm14, -1e+09, %v2945_v1 }
 0x54d   :  { %v10467_v10 = vadd.f32 %v8002_v8, %v3146_v25  ;;  %v3201_v45 = vsel %vm1583_vm4, %v10461_v6, -inf  ;;  %v3204_v8 = vsel %vm1583_vm4, %v10475_v17, -inf  ;;  %v10483_v25 = vpop.permute.xlu0 %3524 }
 0x54e   :  { %3202 = vmax.xlane.f32.xlu1 %v3201_v45  ;;  %3193 = vmax.xlane.f32.xlu0 %v3192_v42  ;;  %v12096_v45 = vld [vmem:[#allocation12_spill] sm:$0xff] }
 0x54f   :  { %v3198_v20 = vsel %vm1583_vm4, %v10467_v10, -inf }
 0x551   :  { %v10487_v4 = vpop.permute.xlu0 %3704 }
 0x552   :  { %3199 = vmax.xlane.f32.xlu1 %v3198_v20  ;;  %3208 = vmax.xlane.f32.xlu0 %v3207_v22  ;;  %v8072_v20 = vld [vmem:[%s11888_s1 + $0xe8] sm:$0xff]   ;;  %v8546_v22 = vpop.f32.mrf.mxu1 }
 0x553   :  { %v8034_v44 = vunpack.c.l.bf16 %v8072_v20 }
 0x554   :  { %v3127_v15 = vpop.f32.mrf.mxu1 }
 0x555   :  { %v10491_v61 = vpop.permute.xlu0 %3702 }
 0x556   :  { %3205 = vmax.xlane.f32.xlu0 %v3204_v8  ;;  %12092 = vst [vmem:[#allocation50_spill] sm:$0xff] %v10491_v61 }
 0x559   :  { %v10495_v1 = vpop.permute.xlu0 %3882 }
 0x55a   :  { %12094 = vst [vmem:[#allocation51_spill] sm:$0xff] %v10495_v1 }
 0x55d   :  { %v10501_v42 = vpop.permute.xlu0 %3880 }
 0x55e   :  { %12097 = vst [vmem:[#allocation52_spill] sm:$0xff] %v10501_v42 }
 0x561   :  { %v10503_v13 = vpop.permute.xlu0 %4062 }
 0x562   :  { %12098 = vst [vmem:[#allocation53_spill] sm:$0xff] %v10503_v13 }
 0x563   :  { %4149 = vrot.lane.b32.xlu1 %v12090_v56, %s9194_s17  ;;  %v3151_v56 = vsel %vm10002_vm2, -1e+09, %v8546_v22 }
 0x565   :  { %v10508_v8 = vpop.permute.xlu0 %4060 }
 0x566   :  { %12099 = vst [vmem:[#allocation54_spill] sm:$0xff] %v10508_v8 }
 0x567   :  { %4333 = vrot.lane.b32.xlu1 %v12091_v28, %s9194_s17 }
 0x569   :  { %v10516_v42 = vpop.permute.xlu0 %4056 }
 0x56a   :  { %12101 = vst [vmem:[#allocation55_spill] sm:$0xff] %v10516_v42 }
 0x56c   :  { %4058 = vrot.lane.b32.xlu0 %v12093_v57, %s9194_s17  ;;  %v8035_v57 = vunpack.c.h.bf16 %v8072_v20  ;;  %v10527_v20 = vpop.permute.xlu1 %3613 }
 0x56d   :  { %v10522_v8 = vpop.permute.xlu0 %4244  ;;  %12103 = vst [vmem:[#allocation57_spill] sm:$0xff] %v10527_v20 }
 0x56e   :  { %12102 = vst [vmem:[#allocation56_spill] sm:$0xff] %v10522_v8 }
 0x570   :  { %4242 = vrot.lane.b32.xlu0 %v12095_v26, %s9194_s17  ;;  %v10512_v26 = vadd.f32 %v8035_v57, %v3151_v56  ;;  %v10530_v42 = vpop.permute.xlu1 %3793 }
 0x571   :  { %12104 = vst [vmem:[#allocation58_spill] sm:$0xff] %v10530_v42 }
 0x572   :  { %v3213_v1 = vsel %vm1583_vm4, %v10512_v26, -inf }
 0x574   :  { %4238 = vrot.lane.b32.xlu0 %v12096_v45, %s9194_s17  ;;  %v3150_v45 = vsel %vm10002_vm2, -1e+09, %v3127_v15  ;;  %v10534_v8 = vpop.permute.xlu1 %3791 }
 0x575   :  { %v10518_v13 = vadd.f32 %v8034_v44, %v3150_v45  ;;  %12106 = vst [vmem:[#allocation59_spill] sm:$0xff] %v10534_v8 }
 0x577   :  { %v3210_v22 = vsel %vm1583_vm4, %v10518_v13, -inf }
 0x58b   :  { %3214 = vmax.xlane.f32.xlu1 %v3213_v1  ;;  %v12105_v1 = vld [vmem:[#allocation19_spill] sm:$0xff] }
 0x58f   :  { %3211 = vmax.xlane.f32.xlu1 %v3210_v22 }
 0x592   :  { %v3173_v56 = vpop.xlane.xlu0 %3172 }
 0x593   :  { %v3217_v57 = vsub.f32 %v10367_v49, %v3173_v56  ;;  %v10540_v56 = vpop.permute.xlu1 %3971 }
 0x594   :  { %12107 = vst [vmem:[#allocation60_spill] sm:$0xff] %v10540_v56 }
 0x595   :  { %v3234_v15 = vmul.f32 1.442695, %v3217_v57 }
 0x596   :  { %v3170_v28 = vpop.xlane.xlu0 %3169 }
 0x597   :  { %8962 = vpow2.f32 %v3234_v15  ;;  %v3216_v44 = vsub.f32 %v10371_v30, %v3170_v28  ;;  %v10546_v28 = vpop.permute.xlu1 %3969 }
 0x598   :  { %12108 = vst [vmem:[#allocation61_spill] sm:$0xff] %v10546_v28 }
 0x599   :  { %v3232_v45 = vmul.f32 1.442695, %v3216_v44 }
 0x59b   :  { %8964 = vpow2.f32 %v3232_v45  ;;  %v10548_v15 = vpop.permute.xlu1 %4153 }
 0x59c   :  { %12109 = vst [vmem:[#allocation62_spill] sm:$0xff] %v10548_v15 }
 0x59f   :  { %v10550_v44 = vpop.permute.xlu1 %4151 }
 0x5a0   :  { %4329 = vrot.lane.b32.xlu1 %v12105_v1, %s9194_s17  ;;  %12110 = vst [vmem:[#allocation63_spill] sm:$0xff] %v10550_v44 }
 0x5a3   :  { %v10552_v45 = vpop.permute.xlu1 %4147 }
 0x5a4   :  { %v10536_v22 = vpop.eup %8962  ;;  %12111 = vst [vmem:[#allocation64_spill] sm:$0xff] %v10552_v45 }
 0x5a5   :  { %v3267_v49 = vsel %vm1583_vm4, %v10536_v22, 0.0 }
 0x5a6   :  { %3268 = vadd.xlane.f32.xlu0 %v3267_v49 }
 0x5a7   :  { %v10554_v1 = vpop.permute.xlu1 %4335 }
 0x5a8   :  { %v10542_v57 = vpop.eup %8964  ;;  %12112 = vst [vmem:[#allocation65_spill] sm:$0xff] %v10554_v1 }
 0x5a9   :  { %v3264_v30 = vsel %vm1583_vm4, %v10542_v57, 0.0 }
 0x5aa   :  { %3265 = vadd.xlane.f32.xlu0 %v3264_v30 }
 0x5c7   :  { %v3179_v8 = vpop.xlane.xlu0 %3178 }
 0x5c8   :  { %v3219_v49 = vsub.f32 %v10403_v34, %v3179_v8 }
 0x5c9   :  { %v3176_v56 = vpop.xlane.xlu1 %3175 }
 0x5ca   :  { %v3238_v61 = vmul.f32 1.442695, %v3219_v49  ;;  %v3218_v42 = vsub.f32 %v10412_v41, %v3176_v56 }
 0x5cb   :  { %v3185_v20 = vpop.xlane.xlu0 %3184 }
 0x5cc   :  { %8966 = vpow2.f32 %v3238_v61  ;;  %v3236_v30 = vmul.f32 1.442695, %v3218_v42  ;;  %v3221_v28 = vsub.f32 %v10410_v51, %v3185_v20 }
 0x5ce   :  { %8968 = vpow2.f32 %v3236_v30  ;;  %v3242_v15 = vmul.f32 1.442695, %v3221_v28 }
 0x5cf   :  { %v3191_v12 = vpop.xlane.xlu1 %3190  ;;  %v3182_v44 = vpop.xlane.xlu0 %3181 }
 0x5d0   :  { %8970 = vpow2.f32 %v3242_v15  ;;  %v3223_v45 = vsub.f32 %v10431_v2, %v3191_v12  ;;  %v3220_v1 = vsub.f32 %v10423_v48, %v3182_v44 }
 0x5d2   :  { %v3246_v32 = vmul.f32 1.442695, %v3223_v45  ;;  %v3240_v34 = vmul.f32 1.442695, %v3220_v1 }
 0x5d3   :  { %v3188_v8 = vpop.xlane.xlu1 %3187  ;;  %v3197_v49 = vpop.xlane.xlu0 %3196 }
 0x5d4   :  { %8972 = vpow2.f32 %v3246_v32  ;;  %v3222_v41 = vsub.f32 %v10443_v46, %v3188_v8  ;;  %v3225_v61 = vsub.f32 %v10438_v43, %v3197_v49 }
 0x5d5   :  { %8974 = vpow2.f32 %v3240_v34 }
 0x5d6   :  { %v3244_v51 = vmul.f32 1.442695, %v3222_v41  ;;  %v3250_v42 = vmul.f32 1.442695, %v3225_v61 }
 0x5d7   :  { %v3203_v20 = vpop.xlane.xlu1 %3202  ;;  %v3194_v56 = vpop.xlane.xlu0 %3193 }
 0x5d8   :  { %8976 = vpow2.f32 %v3244_v51  ;;  %v3227_v28 = vsub.f32 %v10461_v6, %v3203_v20  ;;  %v3224_v12 = vsub.f32 %v10451_v59, %v3194_v56 }
 0x5d9   :  { %v10565_v2 = vpop.eup %8966  ;;  %8978 = vpow2.f32 %v3250_v42 }
 0x5da   :  { %v3254_v48 = vmul.f32 1.442695, %v3227_v28  ;;  %v3248_v1 = vmul.f32 1.442695, %v3224_v12  ;;  %v3273_v32 = vsel %vm1583_vm4, %v10565_v2, 0.0 }
 0x5db   :  { %v10569_v46 = vpop.eup %8968  ;;  %v3200_v43 = vpop.xlane.xlu1 %3199  ;;  %3274 = vadd.xlane.f32.xlu1 %v3273_v32 }
 0x5dc   :  { %v3209_v15 = vpop.xlane.xlu0 %3208  ;;  %8980 = vpow2.f32 %v3254_v48  ;;  %v3226_v44 = vsub.f32 %v10467_v10, %v3200_v43  ;;  %v3270_v34 = vsel %vm1583_vm4, %v10569_v46, 0.0 }
 0x5dd   :  { %v3229_v6 = vsub.f32 %v10465_v23, %v3209_v15  ;;  %v10573_v45 = vpop.eup %8970  ;;  %8982 = vpow2.f32 %v3248_v1 }
 0x5de   :  { %v3252_v59 = vmul.f32 1.442695, %v3226_v44  ;;  %v3279_v8 = vsel %vm1583_vm4, %v10573_v45, 0.0 }
 0x5df   :  { %v3258_v30 = vmul.f32 1.442695, %v3229_v6  ;;  %3271 = vadd.xlane.f32.xlu1 %v3270_v34  ;;  %3280 = vadd.xlane.f32.xlu0 %v3279_v8  ;;  %v10620_v34 = vpop.permute.xlu1 %4149 }
 0x5e0   :  { %v3206_v49 = vpop.xlane.xlu0 %3205  ;;  %8984 = vpow2.f32 %v3252_v59 }
 0x5e1   :  { %v3228_v41 = vsub.f32 %v10475_v17, %v3206_v49  ;;  %v10580_v10 = vpop.eup %8972  ;;  %8986 = vpow2.f32 %v3258_v30 }
 0x5e2   :  { %v10582_v23 = vpop.eup %8974  ;;  %v3285_v51 = vsel %vm1583_vm4, %v10580_v10, 0.0 }
 0x5e3   :  { %v3256_v61 = vmul.f32 1.442695, %v3228_v41  ;;  %3286 = vadd.xlane.f32.xlu1 %v3285_v51  ;;  %v3276_v42 = vsel %vm1583_vm4, %v10582_v23, 0.0  ;;  %v10626_v8 = vpop.permute.xlu1 %4333 }
 0x5e4   :  { %3277 = vadd.xlane.f32.xlu0 %v3276_v42 }
 0x5e5   :  { %8988 = vpow2.f32 %v3256_v61  ;;  %v10588_v20 = vpop.eup %8976 }
 0x5e6   :  { %v10590_v56 = vpop.eup %8978  ;;  %v3282_v17 = vsel %vm1583_vm4, %v10588_v20, 0.0 }
 0x5e7   :  { %3283 = vadd.xlane.f32.xlu1 %v3282_v17  ;;  %v3291_v28 = vsel %vm1583_vm4, %v10590_v56, 0.0 }
 0x5e8   :  { %3292 = vadd.xlane.f32.xlu0 %v3291_v28  ;;  %v10638_v28 = vpop.permute.xlu0 %4058 }
 0x5e9   :  { %v10596_v12 = vpop.eup %8980 }
 0x5ea   :  { %v10598_v48 = vpop.eup %8982  ;;  %v3297_v1 = vsel %vm1583_vm4, %v10596_v12, 0.0 }
 0x5eb   :  { %3298 = vadd.xlane.f32.xlu1 %v3297_v1  ;;  %v3288_v32 = vsel %vm1583_vm4, %v10598_v48, 0.0 }
 0x5ec   :  { %3289 = vadd.xlane.f32.xlu0 %v3288_v32 }
 0x5ed   :  { %v10604_v43 = vpop.eup %8984 }
 0x5ee   :  { %v10606_v15 = vpop.eup %8986  ;;  %v3294_v44 = vsel %vm1583_vm4, %v10604_v43, 0.0 }
 0x5ef   :  { %3295 = vadd.xlane.f32.xlu1 %v3294_v44  ;;  %v3303_v6 = vsel %vm1583_vm4, %v10606_v15, 0.0 }
 0x5f0   :  { %3304 = vadd.xlane.f32.xlu0 %v3303_v6 }
 0x5f2   :  { %v10612_v59 = vpop.eup %8988 }
 0x5f3   :  { %v3300_v30 = vsel %vm1583_vm4, %v10612_v59, 0.0 }
 0x5f4   :  { %3301 = vadd.xlane.f32.xlu0 %v3300_v30 }
 0x600   :  { %4517 = vrot.lane.b32.xlu1 %v9712_v47, %s9194_s17 }
 0x604   :  { %4331 = vrot.lane.b32.xlu1 %v9688_v9, %s9194_s17 }
 0x60a   :  { %4426 = vrot.lane.b32.xlu0 %v9683_v7, %s9194_s17 }
 0x60e   :  { %4240 = vrot.lane.b32.xlu0 %v9651_v19, %s9194_s17 }
 0x612   :  { %4424 = vrot.lane.b32.xlu0 %v9691_v39, %s9194_s17 }
 0x614   :  { %v3215_v49 = vpop.xlane.xlu1 %3214 }
 0x615   :  { %v3231_v41 = vsub.f32 %v10512_v26, %v3215_v49  ;;  %v10642_v26 = vpop.permute.xlu0 %4242 }
 0x616   :  { %4420 = vrot.lane.b32.xlu0 %v9660_v62, %s9194_s17 }
 0x617   :  { %v3262_v61 = vmul.f32 1.442695, %v3231_v41 }
 0x618   :  { %v3212_v51 = vpop.xlane.xlu1 %3211 }
 0x619   :  { %8990 = vpow2.f32 %v3262_v61  ;;  %v3230_v42 = vsub.f32 %v10518_v13, %v3212_v51  ;;  %v10654_v44 = vpop.permute.xlu0 %4238 }
 0x61a   :  { %4608 = vrot.lane.b32.xlu0 %v9736_v52, %s9194_s17 }
 0x61b   :  { %v3260_v17 = vmul.f32 1.442695, %v3230_v42 }
 0x61d   :  { %8992 = vpow2.f32 %v3260_v17 }
 0x61e   :  { %4422 = vrot.lane.b32.xlu0 %v9709_v35, %s9194_s17 }
 0x622   :  { %4606 = vrot.lane.b32.xlu0 %v9739_v53, %s9194_s17 }
 0x626   :  { %v10644_v1 = vpop.eup %8990  ;;  %4602 = vrot.lane.b32.xlu0 %v9718_v40, %s9194_s17 }
 0x627   :  { %v3309_v13 = vsel %vm1583_vm4, %v10644_v1, 0.0 }
 0x628   :  { %3310 = vadd.xlane.f32.xlu1 %v3309_v13  ;;  %v12116_v13 = vld [vmem:[#allocation15_spill] sm:$0xff] }
 0x62a   :  { %v10650_v32 = vpop.eup %8992  ;;  %4604 = vrot.lane.b32.xlu0 %v9761_v0, %s9194_s17 }
 0x62b   :  { %v3306_v6 = vsel %vm1583_vm4, %v10650_v32, 0.0 }
 0x62c   :  { %3307 = vadd.xlane.f32.xlu1 %v3306_v6 }
 0x62e   :  { %4994 = vrot.lane.b32.xlu0 %v9756_v29, %s9194_s17 }
 0x62f   :  { %v3269_v30 = vpop.xlane.xlu0 %3268 }
 0x630   :  { %8994 = vrcp.f32 %v3269_v30 }
 0x632   :  { %5168 = vrot.lane.b32.xlu0 %v9783_v24, %s9194_s17 }
 0x633   :  { %v3266_v49 = vpop.xlane.xlu0 %3265 }
 0x634   :  { %8996 = vrcp.f32 %v3266_v49  ;;  %v12117_v49 = vld [vmem:[#allocation10_spill] sm:$0xff] }
 0x636   :  { %5166 = vrot.lane.b32.xlu0 %v9586_v14, %s9194_s17 }
 0x63a   :  { %5342 = vrot.lane.b32.xlu0 %v9638_v18, %s9194_s17 }
 0x63d   :  { %4515 = vrot.lane.b32.xlu1 %v9715_v37, %s9194_s17  ;;  %v8995_v41 = vpop.eup %8994 }
 0x63e   :  { %5340 = vrot.lane.b32.xlu0 %v9619_v3, %s9194_s17  ;;  %v3329_v42 = vmul.f32 %v8995_v41, %v10536_v22  ;;  %v10706_v22 = vpop.permute.xlu1 %4329 }
 0x641   :  { %v8997_v61 = vpop.eup %8996  ;;  %4511 = vrot.lane.b32.xlu1 %v9694_v21, %s9194_s17 }
 0x642   :  { %5516 = vrot.lane.b32.xlu0 %v10162_v27, %s9194_s17  ;;  %v3328_v51 = vmul.f32 %v8997_v61, %v10542_v57 }
 0x644   :  { %8551 = vmatprep.mubr.msk.f32.mxu0 %vm1583_vm4, %v3328_v51 }
 0x645   :  { %4699 = vrot.lane.b32.xlu1 %v9764_v31, %s9194_s17  ;;  %8552 = vmatmul.mubr.msk.f32.vlgmr.msra.gmra.mxu0 %vm1583_vm4, %v3329_v42  ;;  %v12118_v42 = vld [vmem:[#allocation21_spill] sm:$0xff] }
 0x646   :  { %5514 = vrot.lane.b32.xlu0 %v9654_v60, %s9194_s17  ;;  %8562 = vmatpush3.msra.mxu0 %v10332_v33  ;;  %v12113_v33 = vld [vmem:[#allocation24_spill] sm:$0xff] }
 0x647   :  { %8563 = vmatprep.subr.mxu0 %v10483_v25 }
 0x648   :  { %8564 = vmatpush3.msra.mxu0 %v10483_v25  ;;  %v12115_v25 = vld [vmem:[#allocation22_spill] sm:$0xff] }
 0x649   :  { %8575 = vmatprep.subr.mxu0 %v10487_v4  ;;  %4513 = vrot.lane.b32.xlu1 %v9733_v50, %s9194_s17 }
 0x64a   :  { %5694 = vrot.lane.b32.xlu0 %v9546_v16, %s9195_s10  ;;  %v12114_v16 = vld [vmem:[#allocation23_spill] sm:$0xff] }
 0x64d   :  { %4697 = vrot.lane.b32.xlu1 %v9772_v11, %s9194_s17 }
 0x64e   :  { %5692 = vrot.lane.b32.xlu0 %v9535_v38, %s9195_s10 }
 0x651   :  { %4693 = vrot.lane.b32.xlu1 %v9742_v54, %s9194_s17 }
 0x652   :  { %5688 = vrot.lane.b32.xlu0 %v9532_v5, %s9195_s10 }
 0x655   :  { %4695 = vrot.lane.b32.xlu1 %v12113_v33, %s9194_s17 }
 0x656   :  { %5876 = vrot.lane.b32.xlu0 %v9613_v58, %s9195_s10 }
 0x659   :  { %5081 = vrot.lane.b32.xlu1 %v12114_v16, %s9194_s17 }
 0x65d   :  { %4992 = vrot.lane.b32.xlu1 %v12115_v25, %s9194_s17 }
 0x661   :  { %5079 = vrot.lane.b32.xlu1 %v12052_v55, %s9194_s17 }
 0x664   :  { %v3275_v38 = vpop.xlane.xlu1 %3274 }
 0x665   :  { %5255 = vrot.lane.b32.xlu1 %v12053_v63, %s9194_s17  ;;  %8998 = vrcp.f32 %v3275_v38 }
 0x668   :  { %v3272_v5 = vpop.xlane.xlu1 %3271  ;;  %v3281_v57 = vpop.xlane.xlu0 %3280 }
 0x669   :  { %9000 = vrcp.f32 %v3272_v5  ;;  %5253 = vrot.lane.b32.xlu1 %v12054_v36, %s9194_s17 }
 0x66a   :  { %9002 = vrcp.f32 %v3281_v57 }
 0x66c   :  { %v3287_v58 = vpop.xlane.xlu1 %3286 }
 0x66d   :  { %v3278_v17 = vpop.xlane.xlu0 %3277  ;;  %5429 = vrot.lane.b32.xlu1 %v12116_v13, %s9194_s17 }
 0x66e   :  { %9004 = vrcp.f32 %v3278_v17 }
 0x66f   :  { %9006 = vrcp.f32 %v3287_v58 }
 0x670   :  { %v3284_v6 = vpop.xlane.xlu1 %3283 }
 0x671   :  { %9008 = vrcp.f32 %v3284_v6  ;;  %v3293_v30 = vpop.xlane.xlu0 %3292  ;;  %5427 = vrot.lane.b32.xlu1 %v12117_v49, %s9194_s17  ;;  %v12119_v6 = vld [vmem:[#allocation16_spill] sm:$0xff] }
 0x672   :  { %v8999_v61 = vpop.eup %8998  ;;  %9010 = vrcp.f32 %v3293_v30 }
 0x673   :  { %v3331_v58 = vmul.f32 %v8999_v61, %v10565_v2  ;;  %v12122_v61 = vld [vmem:[#allocation9_spill] sm:$0xff] }
 0x674   :  { %v3299_v41 = vpop.xlane.xlu1 %3298 }
 0x675   :  { %v3290_v51 = vpop.xlane.xlu0 %3289  ;;  %5603 = vrot.lane.b32.xlu1 %v12118_v42, %s9194_s17  ;;  %v12120_v42 = vld [vmem:[#allocation25_spill] sm:$0xff] }
 0x676   :  { %v9001_v38 = vpop.eup %9000  ;;  %9012 = vrcp.f32 %v3290_v51  ;;  %v12121_v51 = vld [vmem:[#allocation57_spill] sm:$0xff] }
 0x677   :  { %v3330_v5 = vmul.f32 %v9001_v38, %v10569_v46  ;;  %9014 = vrcp.f32 %v3299_v41  ;;  %v9003_v30 = vpop.eup %9002 }
 0x678   :  { %v3296_v57 = vpop.xlane.xlu1 %3295  ;;  %v3333_v38 = vmul.f32 %v9003_v30, %v10573_v45 }
 0x679   :  { %9016 = vrcp.f32 %v3296_v57  ;;  %v3305_v17 = vpop.xlane.xlu0 %3304  ;;  %5601 = vrot.lane.b32.xlu1 %v12119_v6, %s9194_s17  ;;  %8558 = vmatprep.mubr.msk.f32.mxu1 %vm1583_vm4, %v3330_v5  ;;  %v12123_v57 = vld [vmem:[#allocation58_spill] sm:$0xff] }
 0x67a   :  { %8559 = vmatmul.mubr.msk.f32.vlgmr.msra.gmra.mxu1 %vm1583_vm4, %v3331_v58  ;;  %9018 = vrcp.f32 %v3305_v17  ;;  %v12125_v58 = vld [vmem:[#allocation6_spill] sm:$0xff] }
 0x67b   :  { %v9005_v60 = vpop.eup %9004  ;;  %8569 = vmatpush3.msra.mxu1 %v12120_v42 }
 0x67c   :  { %8570 = vmatprep.subr.mxu1 %v12121_v51  ;;  %v3332_v46 = vmul.f32 %v9005_v60, %v10582_v23  ;;  %v9007_v41 = vpop.eup %9006  ;;  %v12124_v23 = vld [vmem:[#allocation50_spill] sm:$0xff] }
 0x67d   :  { %8571 = vmatpush3.msra.mxu1 %v12121_v51  ;;  %v3302_v2 = vpop.xlane.xlu0 %3301  ;;  %5785 = vrot.lane.b32.xlu1 %v12122_v61, %s9195_s10  ;;  %v3335_v45 = vmul.f32 %v9007_v41, %v10580_v10  ;;  %v12126_v51 = vld [vmem:[#allocation51_spill] sm:$0xff]  ;;  %v12128_v10 = vld [vmem:[#allocation5_spill] sm:$0xff] }
 0x67e   :  { %v9009_v5 = vpop.eup %9008  ;;  %9020 = vrcp.f32 %v3302_v2  ;;  %8565 = vmatprep.mubr.msk.f32.mxu0 %vm1583_vm4, %v3332_v46  ;;  %8582 = vmatprep.subr.mxu1 %v12123_v57  ;;  %v12127_v46 = vld [vmem:[#allocation59_spill] sm:$0xff] }
 0x67f   :  { %8566 = vmatmul.mubr.msk.f32.vlgmr.msra.gmra.mxu0 %vm1583_vm4, %v3333_v38  ;;  %v3334_v60 = vmul.f32 %v9009_v5, %v10588_v20  ;;  %v9011_v17 = vpop.eup %9010  ;;  %v12129_v38 = vld [vmem:[#allocation60_spill] sm:$0xff] }
 0x680   :  { %8576 = vmatpush3.msra.mxu0 %v10487_v4  ;;  %v3337_v41 = vmul.f32 %v9011_v17, %v10590_v56  ;;  %v12130_v5 = vld [vmem:[#allocation52_spill] sm:$0xff]  ;;  %v12133_v17 = vld [vmem:[#allocation61_spill] sm:$0xff] }
 0x681   :  { %8577 = vmatprep.subr.mxu0 %v12124_v23  ;;  %v4427_v42 = vpop.permute.xlu0 %4426  ;;  %5783 = vrot.lane.b32.xlu1 %v12125_v58, %s9195_s10 }
 0x682   :  { %8578 = vmatpush3.msra.mxu0 %v12124_v23  ;;  %8572 = vmatprep.mubr.msk.f32.mxu1 %vm1583_vm4, %v3334_v60  ;;  %v12131_v60 = vld [vmem:[#allocation17_spill] sm:$0xff] }
 0x683   :  { %v9013_v30 = vpop.eup %9012  ;;  %8589 = vmatprep.subr.mxu0 %v12126_v51  ;;  %8573 = vmatmul.mubr.msk.f32.vlgmr.msra.gmra.mxu1 %vm1583_vm4, %v3335_v45  ;;  %v12132_v45 = vld [vmem:[#allocation53_spill] sm:$0xff] }
 0x684   :  { %8583 = vmatpush3.msra.mxu1 %v12123_v57  ;;  %v3336_v4 = vmul.f32 %v9013_v30, %v10598_v48  ;;  %v9015_v20 = vpop.eup %9014 }
 0x685   :  { %8584 = vmatprep.subr.mxu1 %v12127_v46  ;;  %v4241_v2 = vpop.permute.xlu0 %4240  ;;  %5779 = vrot.lane.b32.xlu1 %v12128_v10, %s9195_s10  ;;  %v3339_v56 = vmul.f32 %v9015_v20, %v10596_v12 }
 0x686   :  { %v9017_v61 = vpop.eup %9016  ;;  %8585 = vmatpush3.msra.mxu1 %v12127_v46  ;;  %8579 = vmatprep.mubr.msk.f32.mxu0 %vm1583_vm4, %v3336_v4  ;;  %v12135_v4 = vld [vmem:[#allocation55_spill] sm:$0xff] }
 0x687   :  { %8596 = vmatprep.subr.mxu1 %v12129_v38  ;;  %8580 = vmatmul.mubr.msk.f32.vlgmr.msra.gmra.mxu0 %vm1583_vm4, %v3337_v41  ;;  %v3338_v48 = vmul.f32 %v9017_v61, %v10604_v43  ;;  %v9019_v23 = vpop.eup %9018 }
 0x688   :  { %8590 = vmatpush3.msra.mxu0 %v12126_v51  ;;  %v3341_v12 = vmul.f32 %v9019_v23, %v10606_v15  ;;  %v12134_v51 = vld [vmem:[#allocation62_spill] sm:$0xff]  ;;  %v12137_v15 = vld [vmem:[#allocation56_spill] sm:$0xff] }
 0x689   :  { %8591 = vmatprep.subr.mxu0 %v12130_v5  ;;  %v4425_v57 = vpop.permute.xlu0 %4424  ;;  %5967 = vrot.lane.b32.xlu1 %v12131_v60, %s9195_s10 }
 0x68a   :  { %8592 = vmatpush3.msra.mxu0 %v12130_v5  ;;  %8586 = vmatprep.mubr.msk.f32.mxu1 %vm1583_vm4, %v3338_v48 }
 0x68b   :  { %v9021_v58 = vpop.eup %9020  ;;  %8603 = vmatprep.subr.msk.mxu0 %vm806_vm0, %v12132_v45  ;;  %8587 = vmatmul.mubr.msk.f32.vlgmr.msra.gmra.mxu1 %vm1583_vm4, %v3339_v56 }
 0x68c   :  { %8597 = vmatpush3.msra.mxu1 %v12129_v38  ;;  %v3340_v43 = vmul.f32 %v9021_v58, %v10612_v59  ;;  %v12136_v59 = vld [vmem:[#allocation54_spill] sm:$0xff] }
 0x68d   :  { %8598 = vmatprep.subr.mxu1 %v12133_v17  ;;  %v4421_v30 = vpop.permute.xlu0 %4420 }
 0x68e   :  { %8599 = vmatpush3.msra.mxu1 %v12133_v17  ;;  %8593 = vmatprep.mubr.msk.f32.mxu0 %vm1583_vm4, %v3340_v43  ;;  %v12139_v43 = vld [vmem:[#allocation63_spill] sm:$0xff] }
 0x68f   :  { %8610 = vmatprep.subr.msk.mxu1 %vm806_vm0, %v12134_v51  ;;  %8594 = vmatmul.mubr.msk.f32.vlgmr.msra.gmra.mxu0 %vm1583_vm4, %v3341_v12 }
 0x690   :  { %8604 = vmatpush3.xpose.msk.msra.mxu0 %vm806_vm0, %v12132_v45  ;;  %8607 = vmatprep.mubr.msk.f32.mxu0 %vm806_vm0, %v12135_v4  ;;  %v12138_v45 = vld [vmem:[#allocation64_spill] sm:$0xff] }
 0x691   :  { %8605 = vmatprep.subr.msk.mxu0 %vm806_vm0, %v12136_v59  ;;  %v4609_v20 = vpop.permute.xlu0 %4608 }
 0x694   :  { %8606 = vmatpush3.xpose.msk.msra.mxu0 %vm806_vm0, %v12136_v59 }
 0x695   :  { %8617 = vmatprep.subr.msk.mxu0 %vm806_vm0, %v12137_v15  ;;  %v4423_v46 = vpop.permute.xlu0 %4422 }
 0x697   :  { %8608 = vmatmul.mubr.msk.f32.vlgmr.msra.gmra.mxu0 %vm806_vm0, %v10638_v28 }
 0x698   :  { %8618 = vmatpush3.xpose.msk.msra.mxu0 %vm806_vm0, %v12137_v15  ;;  %8621 = vmatprep.mubr.msk.f32.mxu0 %vm806_vm0, %v10654_v44  ;;  %v4518_v44 = vpop.permute.xlu1 %4517 }
 0x699   :  { %8619 = vmatprep.subr.msk.mxu0 %vm806_vm0, %v10642_v26  ;;  %v4607_v10 = vpop.permute.xlu0 %4606 }
 0x69c   :  { %8620 = vmatpush3.xpose.msk.msra.mxu0 %vm806_vm0, %v10642_v26 }
 0x69d   :  { %8631 = vmatprep.subr.msk.mxu0 %vm806_vm0, %v4427_v42  ;;  %v4603_v41 = vpop.permute.xlu0 %4602 }
 0x69f   :  { %8622 = vmatmul.mubr.msk.f32.vlgmr.msra.gmra.mxu0 %vm806_vm0, %v4241_v2 }
 0x6a0   :  { %8632 = vmatpush3.xpose.msk.msra.mxu0 %vm806_vm0, %v4427_v42  ;;  %8635 = vmatprep.mubr.msk.f32.mxu0 %vm806_vm0, %v4421_v30  ;;  %v4332_v42 = vpop.permute.xlu1 %4331 }
 0x6a1   :  { %8633 = vmatprep.subr.msk.mxu0 %vm806_vm0, %v4425_v57  ;;  %v4605_v28 = vpop.permute.xlu0 %4604 }
 0x6a4   :  { %8634 = vmatpush3.xpose.msk.msra.mxu0 %vm806_vm0, %v4425_v57 }
 0x6a5   :  { %8645 = vmatprep.subr.msk.mxu0 %vm806_vm0, %v4609_v20  ;;  %v4995_v26 = vpop.permute.xlu0 %4994 }
 0x6a7   :  { %8636 = vmatmul.mubr.msk.f32.vlgmr.msra.gmra.mxu0 %vm806_vm0, %v4423_v46 }
 0x6a8   :  { %8646 = vmatpush3.xpose.msk.msra.mxu0 %vm806_vm0, %v4609_v20  ;;  %8649 = vmatprep.mubr.msk.f32.mxu0 %vm806_vm0, %v4603_v41 }
 0x6a9   :  { %8647 = vmatprep.subr.msk.mxu0 %vm806_vm0, %v4607_v10 }
 0x6ac   :  { %8648 = vmatpush3.xpose.msk.msra.mxu0 %vm806_vm0, %v4607_v10 }
 0x6ad   :  { %8659 = vmatprep.subr.mxu0 %v4995_v26 }
 0x6af   :  { %8650 = vmatmul.mubr.msk.f32.vlgmr.msra.gmra.mxu0 %vm806_vm0, %v4605_v28  ;;  %v8045_v28 = vld [vmem:[%s11888_s1 + $0x10] sm:$0xff]  }
 0x6b0   :  { %8660 = vmatpush3.msra.mxu0 %v4995_v26  ;;  %v7927_v26 = vunpack.c.h.bf16 %v8045_v28 }
 0x6b1   :  { %v3311_v2 = vpop.xlane.xlu1 %3310 }
 0x6b2   :  { %9022 = vrcp.f32 %v3311_v2  ;;  %v7926_v2 = vunpack.c.l.bf16 %v8045_v28 }
 0x6b5   :  { %v3308_v61 = vpop.xlane.xlu1 %3307 }
 0x6b6   :  { %9024 = vrcp.f32 %v3308_v61 }
 0x6b9   :  { %v4516_v38 = vpop.permute.xlu1 %4515 }
 0x6bd   :  { %v4512_v48 = vpop.permute.xlu1 %4511 }
 0x6bf   :  { %v9023_v57 = vpop.eup %9022 }
 0x6c0   :  { %v3343_v58 = vmul.f32 %v9023_v57, %v10644_v1 }
 0x6c1   :  { %v4700_v5 = vpop.permute.xlu1 %4699 }
 0x6c3   :  { %v9025_v60 = vpop.eup %9024 }
 0x6c4   :  { %v3342_v56 = vmul.f32 %v9025_v60, %v10650_v32  ;;  %v12140_v32 = vld [vmem:[#allocation65_spill] sm:$0xff] }
 0x6c5   :  { %v4514_v23 = vpop.permute.xlu1 %4513 }
 0x6c6   :  { %8600 = vmatprep.mubr.msk.f32.mxu1 %vm1583_vm4, %v3342_v56 }
 0x6c7   :  { %8601 = vmatmul.mubr.msk.f32.vlgmr.msra.gmra.mxu1 %vm1583_vm4, %v3343_v58 }
 0x6c8   :  { %8611 = vmatpush3.xpose.msk.msra.mxu1 %vm806_vm0, %v12134_v51  ;;  %8614 = vmatprep.mubr.msk.f32.mxu1 %vm806_vm0, %v12138_v45 }
 0x6c9   :  { %8612 = vmatprep.subr.msk.mxu1 %vm806_vm0, %v12139_v43  ;;  %v4698_v17 = vpop.permute.xlu1 %4697 }
 0x6cc   :  { %8613 = vmatpush3.xpose.msk.msra.mxu1 %vm806_vm0, %v12139_v43 }
 0x6cd   :  { %8624 = vmatprep.subr.msk.mxu1 %vm806_vm0, %v12140_v32  ;;  %v4694_v1 = vpop.permute.xlu1 %4693 }
 0x6cf   :  { %8615 = vmatmul.mubr.msk.f32.vlgmr.msra.gmra.mxu1 %vm806_vm0, %v10620_v34 }
 0x6d0   :  { %8625 = vmatpush3.xpose.msk.msra.mxu1 %vm806_vm0, %v12140_v32  ;;  %8628 = vmatprep.mubr.msk.f32.mxu1 %vm806_vm0, %v10706_v22  ;;  %v10838_v22 = vpop.permute.xlu0 %5168 }
 0x6d1   :  { %8626 = vmatprep.subr.msk.mxu1 %vm806_vm0, %v10626_v8  ;;  %v4696_v30 = vpop.permute.xlu1 %4695 }
 0x6d4   :  { %8627 = vmatpush3.xpose.msk.msra.mxu1 %vm806_vm0, %v10626_v8 }
 0x6d5   :  { %8638 = vmatprep.subr.msk.mxu1 %vm806_vm0, %v4518_v44  ;;  %v5082_v12 = vpop.permute.xlu1 %5081 }
 0x6d7   :  { %8629 = vmatmul.mubr.msk.f32.vlgmr.msra.gmra.mxu1 %vm806_vm0, %v4332_v42 }
 0x6d8   :  { %8639 = vmatpush3.xpose.msk.msra.mxu1 %vm806_vm0, %v4518_v44  ;;  %8642 = vmatprep.mubr.msk.f32.mxu1 %vm806_vm0, %v4512_v48 }
 0x6d9   :  { %8640 = vmatprep.subr.msk.mxu1 %vm806_vm0, %v4516_v38  ;;  %v4993_v34 = vpop.permute.xlu1 %4992 }
 0x6da   :  { %8661 = vmatprep.subr.mxu0 %v4993_v34 }
 0x6db   :  { %8662 = vmatpush3.msra.mxu0 %v4993_v34  ;;  %v8053_v34 = vld [vmem:[%s11888_s1 + $0x50] sm:$0xff]  }
 0x6dc   :  { %8641 = vmatpush3.xpose.msk.msra.mxu1 %vm806_vm0, %v4516_v38  ;;  %8673 = vmatprep.subr.mxu0 %v10838_v22 }
 0x6dd   :  { %8652 = vmatprep.subr.msk.mxu1 %vm806_vm0, %v4700_v5  ;;  %v5080_v8 = vpop.permute.xlu1 %5079 }
 0x6df   :  { %8643 = vmatmul.mubr.msk.f32.vlgmr.msra.gmra.mxu1 %vm806_vm0, %v4514_v23 }
 0x6e0   :  { %8653 = vmatpush3.xpose.msk.msra.mxu1 %vm806_vm0, %v4700_v5  ;;  %8656 = vmatprep.mubr.msk.f32.mxu1 %vm806_vm0, %v4694_v1 }
 0x6e1   :  { %8654 = vmatprep.subr.msk.mxu1 %vm806_vm0, %v4698_v17  ;;  %v10849_v51 = vpop.permute.xlu1 %5255 }
 0x6e4   :  { %8655 = vmatpush3.xpose.msk.msra.mxu1 %vm806_vm0, %v4698_v17 }
 0x6e5   :  { %8666 = vmatprep.subr.mxu1 %v5082_v12 }
 0x6e7   :  { %8657 = vmatmul.mubr.msk.f32.vlgmr.msra.gmra.mxu1 %vm806_vm0, %v4696_v30 }
 0x6e8   :  { %8667 = vmatpush3.msra.mxu1 %v5082_v12  ;;  %v8049_v12 = vld [vmem:[%s11888_s1 + $0x30] sm:$0xff]  }
 0x6e9   :  { %8668 = vmatprep.subr.mxu1 %v5080_v8 }
 0x6ea   :  { %8669 = vmatpush3.msra.mxu1 %v5080_v8 }
 0x6eb   :  { %8680 = vmatprep.subr.mxu1 %v10849_v51 }
 0x705   :  { %v10852_v4 = vpop.f32.mrf.mxu0 }
 0x706   :  { %12141 = vst [vmem:[#allocation24_spill] sm:$0xff] %v10852_v4 }
 0x707   :  { %v10854_v59 = vpop.f32.mrf.mxu0 }
 0x708   :  { %12142 = vst [vmem:[#allocation23_spill] sm:$0xff] %v10854_v59 }
 0x73a   :  { %v10883_v58 = vpop.f32.mrf.mxu1 }
 0x73b   :  { %12150 = vst [vmem:[#allocation50_spill] sm:$0xff] %v10883_v58 }
 0x73c   :  { %v10885_v45 = vpop.f32.mrf.mxu1 }
 0x73d   :  { %12151 = vst [vmem:[#allocation6_spill] sm:$0xff] %v10885_v45 }
 0x73f   :  { %v10856_v20 = vpop.f32.mrf.mxu0 }
 0x740   :  { %12143 = vst [vmem:[#allocation22_spill] sm:$0xff] %v10856_v20 }
 0x741   :  { %v10858_v15 = vpop.f32.mrf.mxu0 }
 0x742   :  { %12144 = vst [vmem:[#allocation15_spill] sm:$0xff] %v10858_v15 }
 0x743   :  { %v10887_v43 = vpop.f32.mrf.mxu1 }
 0x744   :  { %12152 = vst [vmem:[#allocation51_spill] sm:$0xff] %v10887_v43  ;;  %v8057_v43 = vld [vmem:[%s11888_s1 + $0x70] sm:$0xff]  }
 0x745   :  { %v10889_v17 = vpop.f32.mrf.mxu1  ;;  %v7974_v4 = vunpack.c.l.bf16 %v8057_v43 }
 0x746   :  { %12153 = vst [vmem:[#allocation59_spill] sm:$0xff] %v10889_v17 }
 0x747   :  { %v10860_v46 = vpop.f32.mrf.mxu0 }
 0x748   :  { %12145 = vst [vmem:[#allocation25_spill] sm:$0xff] %v10860_v46 }
 0x749   :  { %v10862_v10 = vpop.f32.mrf.mxu0 }
 0x74a   :  { %12146 = vst [vmem:[#allocation57_spill] sm:$0xff] %v10862_v10 }
 0x74b   :  { %v10891_v32 = vpop.f32.mrf.mxu1 }
 0x74c   :  { %12154 = vst [vmem:[#allocation5_spill] sm:$0xff] %v10891_v32 }
 0x74d   :  { %v10893_v1 = vpop.f32.mrf.mxu1 }
 0x74e   :  { %12155 = vst [vmem:[#allocation60_spill] sm:$0xff] %v10893_v1 }
 0x74f   :  { %v10864_v41 = vpop.f32.mrf.mxu0 }
 0x750   :  { %12147 = vst [vmem:[#allocation9_spill] sm:$0xff] %v10864_v41 }
 0x751   :  { %v10869_v44 = vpop.f32.mrf.mxu0 }
 0x752   :  { %12148 = vst [vmem:[#allocation58_spill] sm:$0xff] %v10869_v44 }
 0x757   :  { %v8609_v42 = vpop.f32.mrf.mxu0 }
 0x758   :  { %v4785_v38 = vsel %vm9827_vm3, -1e+09, %v8609_v42  ;;  %v7959_v42 = vunpack.c.h.bf16 %v8053_v34 }
 0x759   :  { %v10873_v48 = vadd.f32 %v7927_v26, %v4785_v38  ;;  %v4138_v5 = vpop.f32.mrf.mxu0  ;;  %v7943_v26 = vunpack.c.h.bf16 %v8049_v12  ;;  %v7942_v38 = vunpack.c.l.bf16 %v8049_v12  ;;  %v7958_v12 = vunpack.c.l.bf16 %v8053_v34 }
 0x75a   :  { %v4784_v57 = vsel %vm9827_vm3, -1e+09, %v4138_v5 }
 0x75b   :  { %v10877_v60 = vadd.f32 %v7926_v2, %v4784_v57  ;;  %v4819_v56 = vsel %vm1583_vm4, %v10873_v48, -inf }
 0x75c   :  { %4820 = vmax.xlane.f32.xlu0 %v4819_v56 }
 0x75d   :  { %v4816_v23 = vsel %vm1583_vm4, %v10877_v60, -inf }
 0x75f   :  { %v8623_v8 = vpop.f32.mrf.mxu0 }
 0x760   :  { %4817 = vmax.xlane.f32.xlu0 %v4816_v23  ;;  %v4789_v57 = vsel %vm9873_vm8, -1e+09, %v8623_v8 }
 0x761   :  { %v10916_v20 = vadd.f32 %v7959_v42, %v4789_v57  ;;  %v7975_v42 = vunpack.c.h.bf16 %v8057_v43 }
 0x763   :  { %v4831_v57 = vsel %vm1583_vm4, %v10916_v20, -inf }
 0x787   :  { %v10895_v30 = vpop.f32.mrf.mxu1 }
 0x788   :  { %12156 = vst [vmem:[#allocation52_spill] sm:$0xff] %v10895_v30  ;;  %v4320_v30 = vpop.f32.mrf.mxu0 }
 0x789   :  { %v10903_v28 = vpop.f32.mrf.mxu1 }
 0x78a   :  { %12157 = vst [vmem:[#allocation17_spill] sm:$0xff] %v10903_v28 }
 0x78f   :  { %v8616_v2 = vpop.f32.mrf.mxu1 }
 0x790   :  { %v4787_v23 = vsel %vm9849_vm6, -1e+09, %v8616_v2  ;;  %v8061_v2 = vld [vmem:[%s11888_s1 + $0x90] sm:$0xff]  }
 0x791   :  { %v10909_v41 = vadd.f32 %v7943_v26, %v4787_v23  ;;  %v4229_v32 = vpop.f32.mrf.mxu1  ;;  %v4788_v26 = vsel %vm9873_vm8, -1e+09, %v4320_v30 }
 0x792   :  { %v4786_v46 = vsel %vm9849_vm6, -1e+09, %v4229_v32  ;;  %v8637_v32 = vpop.f32.mrf.mxu0  ;;  %v10929_v34 = vadd.f32 %v7958_v12, %v4788_v26  ;;  %v8065_v26 = vld [vmem:[%s11888_s1 + $0xb0] sm:$0xff]  }
 0x793   :  { %v10918_v58 = vadd.f32 %v7942_v38, %v4786_v46  ;;  %v4825_v8 = vsel %vm1583_vm4, %v10909_v41, -inf  ;;  %v7991_v46 = vunpack.c.h.bf16 %v8061_v2  ;;  %v4793_v6 = vsel %vm9921_vm12, -1e+09, %v8637_v32  ;;  %v8069_v32 = vld [vmem:[%s11888_s1 + $0xd0] sm:$0xff]  }
 0x794   :  { %4826 = vmax.xlane.f32.xlu0 %v4825_v8  ;;  %v4502_v44 = vpop.f32.mrf.mxu0  ;;  %v8006_v15 = vunpack.c.l.bf16 %v8065_v26 }
 0x795   :  { %v4822_v23 = vsel %vm1583_vm4, %v10918_v58, -inf  ;;  %v10944_v43 = vadd.f32 %v7991_v46, %v4793_v6  ;;  %v8007_v6 = vunpack.c.h.bf16 %v8065_v26  ;;  %v8023_v46 = vunpack.c.h.bf16 %v8069_v32 }
 0x796   :  { %4823 = vmax.xlane.f32.xlu1 %v4822_v23  ;;  %v7990_v23 = vunpack.c.l.bf16 %v8061_v2  ;;  %v4828_v2 = vsel %vm1583_vm4, %v10929_v34, -inf }
 0x797   :  { %v8630_v38 = vpop.f32.mrf.mxu1 }
 0x798   :  { %v4791_v8 = vsel %vm9897_vm10, -1e+09, %v8630_v38  ;;  %4832 = vmax.xlane.f32.xlu0 %v4831_v57  ;;  %v8651_v57 = vpop.f32.mrf.mxu0 }
 0x799   :  { %v10937_v1 = vadd.f32 %v7975_v42, %v4791_v8  ;;  %v4411_v10 = vpop.f32.mrf.mxu1  ;;  %v4797_v59 = vsel %vm9966_vm15, -1e+09, %v8651_v57 }
 0x79a   :  { %v4790_v12 = vsel %vm9897_vm10, -1e+09, %v4411_v10  ;;  %v4792_v10 = vsel %vm9921_vm12, -1e+09, %v4502_v44  ;;  %v10971_v49 = vadd.f32 %v8023_v46, %v4797_v59 }
 0x79b   :  { %v10949_v38 = vadd.f32 %v7974_v4, %v4790_v12  ;;  %v4837_v42 = vsel %vm1583_vm4, %v10937_v1, -inf  ;;  %v10957_v8 = vadd.f32 %v7990_v23, %v4792_v10  ;;  %v4843_v12 = vsel %vm1583_vm4, %v10944_v43, -inf }
 0x79c   :  { %4838 = vmax.xlane.f32.xlu1 %v4837_v42  ;;  %4829 = vmax.xlane.f32.xlu0 %v4828_v2  ;;  %v4684_v42 = vpop.f32.mrf.mxu0  ;;  %v8022_v10 = vunpack.c.l.bf16 %v8069_v32 }
 0x79d   :  { %v4834_v4 = vsel %vm1583_vm4, %v10949_v38, -inf  ;;  %v4796_v57 = vsel %vm9966_vm15, -1e+09, %v4684_v42  ;;  %v12167_v42 = vld [vmem:[#allocation8_spill] sm:$0xff] }
 0x79f   :  { %v8644_v17 = vpop.f32.mrf.mxu1 }
 0x7a0   :  { %v4795_v44 = vsel %vm9945_vm14, -1e+09, %v8644_v17  ;;  %4835 = vmax.xlane.f32.xlu1 %v4834_v4  ;;  %4844 = vmax.xlane.f32.xlu0 %v4843_v12  ;;  %v4840_v17 = vsel %vm1583_vm4, %v10957_v8, -inf  ;;  %v12164_v4 = vld [vmem:[#allocation11_spill] sm:$0xff] }
 0x7a1   :  { %v10967_v2 = vadd.f32 %v8007_v6, %v4795_v44  ;;  %v4593_v23 = vpop.f32.mrf.mxu1  ;;  %v10981_v6 = vadd.f32 %v8022_v10, %v4796_v57  ;;  %v12166_v44 = vld [vmem:[#allocation20_spill] sm:$0xff]  ;;  %v12169_v10 = vld [vmem:[#allocation14_spill] sm:$0xff] }
 0x7a2   :  { %v4794_v3 = vsel %vm9945_vm14, -1e+09, %v4593_v23 }
 0x7a3   :  { %v10973_v28 = vadd.f32 %v8006_v15, %v4794_v3  ;;  %v4849_v26 = vsel %vm1583_vm4, %v10967_v2, -inf  ;;  %v4855_v3 = vsel %vm1583_vm4, %v10971_v49, -inf  ;;  %v4852_v59 = vsel %vm1583_vm4, %v10981_v6, -inf  ;;  %v10989_v15 = vpop.permute.xlu0 %5166 }
 0x7a4   :  { %4850 = vmax.xlane.f32.xlu1 %v4849_v26  ;;  %4841 = vmax.xlane.f32.xlu0 %v4840_v17  ;;  %v12171_v17 = vld [vmem:[#allocation12_spill] sm:$0xff] }
 0x7a5   :  { %v4846_v32 = vsel %vm1583_vm4, %v10973_v28, -inf }
 0x7a7   :  { %v10991_v46 = vpop.permute.xlu0 %5342 }
 0x7a8   :  { %4847 = vmax.xlane.f32.xlu1 %v4846_v32  ;;  %4856 = vmax.xlane.f32.xlu0 %v4855_v3  ;;  %v8073_v3 = vld [vmem:[%s11888_s1 + $0xf0] sm:$0xff]  }
 0x7a9   :  { %v8038_v30 = vunpack.c.l.bf16 %v8073_v3 }
 0x7ab   :  { %v10995_v12 = vpop.permute.xlu0 %5340 }
 0x7ac   :  { %4853 = vmax.xlane.f32.xlu0 %v4852_v59  ;;  %12165 = vst [vmem:[#allocation53_spill] sm:$0xff] %v10995_v12  ;;  %v8658_v59 = vpop.f32.mrf.mxu1 }
 0x7ae   :  { %v4775_v27 = vpop.f32.mrf.mxu1 }
 0x7af   :  { %v11001_v23 = vpop.permute.xlu0 %5516 }
 0x7b0   :  { %12168 = vst [vmem:[#allocation61_spill] sm:$0xff] %v11001_v23 }
 0x7b3   :  { %v11005_v26 = vpop.permute.xlu0 %5514 }
 0x7b4   :  { %12170 = vst [vmem:[#allocation62_spill] sm:$0xff] %v11005_v26 }
 0x7b7   :  { %v11009_v57 = vpop.permute.xlu0 %5694 }
 0x7b8   :  { %12172 = vst [vmem:[#allocation55_spill] sm:$0xff] %v11009_v57 }
 0x7b9   :  { %5781 = vrot.lane.b32.xlu1 %v12164_v4, %s9195_s10  ;;  %v8039_v4 = vunpack.c.h.bf16 %v8073_v3 }
 0x7bb   :  { %v11011_v32 = vpop.permute.xlu0 %5692 }
 0x7bc   :  { %12173 = vst [vmem:[#allocation54_spill] sm:$0xff] %v11011_v32 }
 0x7bd   :  { %5965 = vrot.lane.b32.xlu1 %v12166_v44, %s9195_s10 }
 0x7c2   :  { %5690 = vrot.lane.b32.xlu0 %v12167_v42, %s9195_s10  ;;  %v4799_v42 = vsel %vm10002_vm2, -1e+09, %v8658_v59 }
 0x7c3   :  { %v11020_v45 = vadd.f32 %v8039_v4, %v4799_v42 }
 0x7c5   :  { %v4861_v5 = vsel %vm1583_vm4, %v11020_v45, -inf }
 0x7c6   :  { %5874 = vrot.lane.b32.xlu0 %v12169_v10, %s9195_s10  ;;  %v11018_v10 = vpop.permute.xlu0 %5688 }
 0x7c7   :  { %12175 = vst [vmem:[#allocation56_spill] sm:$0xff] %v11018_v10 }
 0x7ca   :  { %5870 = vrot.lane.b32.xlu0 %v12171_v17, %s9195_s10  ;;  %v4798_v17 = vsel %vm10002_vm2, -1e+09, %v4775_v27  ;;  %v11028_v61 = vpop.permute.xlu0 %5876 }
 0x7cb   :  { %v11024_v56 = vadd.f32 %v8038_v30, %v4798_v17  ;;  %12176 = vst [vmem:[#allocation64_spill] sm:$0xff] %v11028_v61  ;;  %v11034_v30 = vpop.permute.xlu1 %5253 }
 0x7cd   :  { %v4858_v59 = vsel %vm1583_vm4, %v11024_v56, -inf }
 0x7cf   :  { %v11036_v44 = vpop.permute.xlu1 %5429 }
 0x7d3   :  { %v11042_v10 = vpop.permute.xlu1 %5427 }
 0x7d4   :  { %12178 = vst [vmem:[#allocation63_spill] sm:$0xff] %v11042_v10 }
 0x7e1   :  { %4862 = vmax.xlane.f32.xlu1 %v4861_v5  ;;  %v12177_v5 = vld [vmem:[#allocation19_spill] sm:$0xff] }
 0x7e5   :  { %v4821_v32 = vpop.xlane.xlu0 %4820  ;;  %4859 = vmax.xlane.f32.xlu1 %v4858_v59  ;;  %v11050_v59 = vpop.permute.xlu1 %5603 }
 0x7e6   :  { %v4865_v4 = vsub.f32 %v10873_v48, %v4821_v32  ;;  %12179 = vst [vmem:[#allocation65_spill] sm:$0xff] %v11050_v59 }
 0x7e8   :  { %v4882_v42 = vmul.f32 1.442695, %v4865_v4 }
 0x7e9   :  { %v4818_v3 = vpop.xlane.xlu0 %4817  ;;  %v11052_v4 = vpop.permute.xlu1 %5601 }
 0x7ea   :  { %9026 = vpow2.f32 %v4882_v42  ;;  %v4864_v27 = vsub.f32 %v10877_v60, %v4818_v3  ;;  %12180 = vst [vmem:[#allocation11_spill] sm:$0xff] %v11052_v4 }
 0x7ec   :  { %v4880_v17 = vmul.f32 1.442695, %v4864_v27 }
 0x7ed   :  { %v11054_v42 = vpop.permute.xlu1 %5785 }
 0x7ee   :  { %9028 = vpow2.f32 %v4880_v17  ;;  %12181 = vst [vmem:[#allocation20_spill] sm:$0xff] %v11054_v42 }
 0x7f1   :  { %v11056_v3 = vpop.permute.xlu1 %5783 }
 0x7f2   :  { %12182 = vst [vmem:[#allocation8_spill] sm:$0xff] %v11056_v3 }
 0x7f5   :  { %v11058_v27 = vpop.permute.xlu1 %5779 }
 0x7f6   :  { %5961 = vrot.lane.b32.xlu1 %v12177_v5, %s9195_s10  ;;  %12183 = vst [vmem:[#allocation14_spill] sm:$0xff] %v11058_v27 }
 0x7f7   :  { %v11040_v61 = vpop.eup %9026 }
 0x7f8   :  { %v4915_v48 = vsel %vm1583_vm4, %v11040_v61, 0.0 }
 0x7f9   :  { %4916 = vadd.xlane.f32.xlu0 %v4915_v48  ;;  %v11060_v17 = vpop.permute.xlu1 %5967 }
 0x7fa   :  { %12184 = vst [vmem:[#allocation12_spill] sm:$0xff] %v11060_v17 }
 0x7fb   :  { %v11046_v32 = vpop.eup %9028 }
 0x7fc   :  { %v4912_v60 = vsel %vm1583_vm4, %v11046_v32, 0.0 }
 0x7fd   :  { %4913 = vadd.xlane.f32.xlu0 %v4912_v60 }
 0x81d   :  { %v4827_v5 = vpop.xlane.xlu0 %4826 }
 0x81e   :  { %v4867_v48 = vsub.f32 %v10909_v41, %v4827_v5 }
 0x81f   :  { %v4824_v57 = vpop.xlane.xlu1 %4823 }
 0x820   :  { %v4886_v26 = vmul.f32 1.442695, %v4867_v48  ;;  %v4866_v10 = vsub.f32 %v10918_v58, %v4824_v57 }
 0x821   :  { %v4833_v23 = vpop.xlane.xlu0 %4832 }
 0x822   :  { %9030 = vpow2.f32 %v4886_v26  ;;  %v4884_v60 = vmul.f32 1.442695, %v4866_v10  ;;  %v4869_v4 = vsub.f32 %v10916_v20, %v4833_v23 }
 0x824   :  { %9032 = vpow2.f32 %v4884_v60  ;;  %v4890_v42 = vmul.f32 1.442695, %v4869_v4 }
 0x825   :  { %v4839_v59 = vpop.xlane.xlu1 %4838  ;;  %v4830_v3 = vpop.xlane.xlu0 %4829 }
 0x826   :  { %9034 = vpow2.f32 %v4890_v42  ;;  %v4871_v27 = vsub.f32 %v10937_v1, %v4839_v59  ;;  %v4868_v17 = vsub.f32 %v10929_v34, %v4830_v3 }
 0x828   :  { %v4894_v12 = vmul.f32 1.442695, %v4871_v27  ;;  %v4888_v41 = vmul.f32 1.442695, %v4868_v17 }
 0x829   :  { %v4836_v5 = vpop.xlane.xlu1 %4835  ;;  %v4845_v48 = vpop.xlane.xlu0 %4844 }
 0x82a   :  { %9036 = vpow2.f32 %v4894_v12  ;;  %v4870_v58 = vsub.f32 %v10949_v38, %v4836_v5  ;;  %v4873_v26 = vsub.f32 %v10944_v43, %v4845_v48 }
 0x82b   :  { %9038 = vpow2.f32 %v4888_v41 }
 0x82c   :  { %v4892_v20 = vmul.f32 1.442695, %v4870_v58  ;;  %v4898_v23 = vmul.f32 1.442695, %v4873_v26 }
 0x82d   :  { %v4851_v57 = vpop.xlane.xlu1 %4850  ;;  %v4842_v10 = vpop.xlane.xlu0 %4841 }
 0x82e   :  { %9040 = vpow2.f32 %v4892_v20  ;;  %v4875_v4 = vsub.f32 %v10967_v2, %v4851_v57  ;;  %v4872_v1 = vsub.f32 %v10957_v8, %v4842_v10 }
 0x82f   :  { %v11071_v34 = vpop.eup %9030  ;;  %9042 = vpow2.f32 %v4898_v23 }
 0x830   :  { %v4902_v59 = vmul.f32 1.442695, %v4875_v4  ;;  %v4896_v42 = vmul.f32 1.442695, %v4872_v1  ;;  %v4921_v38 = vsel %vm1583_vm4, %v11071_v34, 0.0 }
 0x831   :  { %v11075_v12 = vpop.eup %9032  ;;  %v4848_v43 = vpop.xlane.xlu1 %4847  ;;  %4922 = vadd.xlane.f32.xlu1 %v4921_v38 }
 0x832   :  { %v4857_v3 = vpop.xlane.xlu0 %4856  ;;  %9044 = vpow2.f32 %v4902_v59  ;;  %v4874_v27 = vsub.f32 %v10973_v28, %v4848_v43  ;;  %v4918_v41 = vsel %vm1583_vm4, %v11075_v12, 0.0 }
 0x833   :  { %v4877_v2 = vsub.f32 %v10971_v49, %v4857_v3  ;;  %v11079_v17 = vpop.eup %9034  ;;  %9046 = vpow2.f32 %v4896_v42 }
 0x834   :  { %v4900_v8 = vmul.f32 1.442695, %v4874_v27  ;;  %v4927_v5 = vsel %vm1583_vm4, %v11079_v17, 0.0 }
 0x835   :  { %v4906_v60 = vmul.f32 1.442695, %v4877_v2  ;;  %4919 = vadd.xlane.f32.xlu1 %v4918_v41  ;;  %4928 = vadd.xlane.f32.xlu0 %v4927_v5  ;;  %v11126_v41 = vpop.permute.xlu1 %5781 }
 0x836   :  { %v4854_v48 = vpop.xlane.xlu0 %4853  ;;  %9048 = vpow2.f32 %v4900_v8 }
 0x837   :  { %v4876_v58 = vsub.f32 %v10981_v6, %v4854_v48  ;;  %v11086_v28 = vpop.eup %9036  ;;  %9050 = vpow2.f32 %v4906_v60 }
 0x838   :  { %v11088_v49 = vpop.eup %9038  ;;  %v4933_v20 = vsel %vm1583_vm4, %v11086_v28, 0.0 }
 0x839   :  { %v4904_v26 = vmul.f32 1.442695, %v4876_v58  ;;  %4934 = vadd.xlane.f32.xlu1 %v4933_v20  ;;  %v4924_v23 = vsel %vm1583_vm4, %v11088_v49, 0.0  ;;  %v11132_v5 = vpop.permute.xlu1 %5965 }
 0x83a   :  { %4925 = vadd.xlane.f32.xlu0 %v4924_v23 }
 0x83b   :  { %9052 = vpow2.f32 %v4904_v26  ;;  %v11094_v57 = vpop.eup %9040 }
 0x83c   :  { %v11096_v10 = vpop.eup %9042  ;;  %v4930_v6 = vsel %vm1583_vm4, %v11094_v57, 0.0 }
 0x83d   :  { %4931 = vadd.xlane.f32.xlu1 %v4930_v6  ;;  %v4939_v4 = vsel %vm1583_vm4, %v11096_v10, 0.0 }
 0x83e   :  { %4940 = vadd.xlane.f32.xlu0 %v4939_v4  ;;  %v12185_v4 = vld [vmem:[#allocation53_spill] sm:$0xff] }
 0x83f   :  { %v11102_v1 = vpop.eup %9044 }
 0x840   :  { %v11104_v59 = vpop.eup %9046  ;;  %v4945_v42 = vsel %vm1583_vm4, %v11102_v1, 0.0 }
 0x841   :  { %4946 = vadd.xlane.f32.xlu1 %v4945_v42  ;;  %v4936_v38 = vsel %vm1583_vm4, %v11104_v59, 0.0 }
 0x842   :  { %4937 = vadd.xlane.f32.xlu0 %v4936_v38  ;;  %v12186_v38 = vld [vmem:[#allocation61_spill] sm:$0xff] }
 0x843   :  { %v11110_v43 = vpop.eup %9048 }
 0x844   :  { %v11112_v3 = vpop.eup %9050  ;;  %v4942_v27 = vsel %vm1583_vm4, %v11110_v43, 0.0 }
 0x845   :  { %4943 = vadd.xlane.f32.xlu1 %v4942_v27  ;;  %v4951_v2 = vsel %vm1583_vm4, %v11112_v3, 0.0 }
 0x846   :  { %4952 = vadd.xlane.f32.xlu0 %v4951_v2 }
 0x848   :  { %v11118_v8 = vpop.eup %9052 }
 0x849   :  { %v4948_v60 = vsel %vm1583_vm4, %v11118_v8, 0.0 }
 0x84a   :  { %4949 = vadd.xlane.f32.xlu0 %v4948_v60 }
 0x856   :  { %6149 = vrot.lane.b32.xlu1 %v9712_v47, %s9195_s10 }
 0x85a   :  { %5963 = vrot.lane.b32.xlu1 %v9688_v9, %s9195_s10 }
 0x860   :  { %6058 = vrot.lane.b32.xlu0 %v9683_v7, %s9195_s10  ;;  %v11142_v7 = vpop.permute.xlu0 %5690 }
 0x864   :  { %5872 = vrot.lane.b32.xlu0 %v9651_v19, %s9195_s10 }
 0x868   :  { %6056 = vrot.lane.b32.xlu0 %v9691_v39, %s9195_s10  ;;  %v11146_v39 = vpop.permute.xlu0 %5874 }
 0x86a   :  { %v4863_v48 = vpop.xlane.xlu1 %4862 }
 0x86b   :  { %v4879_v58 = vsub.f32 %v11020_v45, %v4863_v48  ;;  %v12188_v48 = vld [vmem:[#allocation65_spill] sm:$0xff] }
 0x86c   :  { %6052 = vrot.lane.b32.xlu0 %v9660_v62, %s9195_s10  ;;  %v11156_v45 = vpop.permute.xlu0 %5870 }
 0x86d   :  { %v4910_v9 = vmul.f32 1.442695, %v4879_v58 }
 0x86e   :  { %v4860_v47 = vpop.xlane.xlu1 %4859 }
 0x86f   :  { %9054 = vpow2.f32 %v4910_v9  ;;  %v4878_v26 = vsub.f32 %v11024_v56, %v4860_v47 }
 0x870   :  { %6240 = vrot.lane.b32.xlu0 %v9736_v52, %s9195_s10 }
 0x871   :  { %v4908_v19 = vmul.f32 1.442695, %v4878_v26  ;;  %v12190_v26 = vld [vmem:[#allocation55_spill] sm:$0xff] }
 0x873   :  { %9056 = vpow2.f32 %v4908_v19 }
 0x874   :  { %6054 = vrot.lane.b32.xlu0 %v9709_v35, %s9195_s10 }
 0x878   :  { %6238 = vrot.lane.b32.xlu0 %v9739_v53, %s9195_s10 }
 0x87c   :  { %v11150_v62 = vpop.eup %9054  ;;  %6234 = vrot.lane.b32.xlu0 %v9718_v40, %s9195_s10 }
 0x87d   :  { %v4957_v52 = vsel %vm1583_vm4, %v11150_v62, 0.0 }
 0x87e   :  { %4958 = vadd.xlane.f32.xlu1 %v4957_v52 }
 0x880   :  { %v11158_v56 = vpop.eup %9056  ;;  %6236 = vrot.lane.b32.xlu0 %v9761_v0, %s9195_s10 }
 0x881   :  { %v4954_v35 = vsel %vm1583_vm4, %v11158_v56, 0.0 }
 0x882   :  { %v4917_v53 = vpop.xlane.xlu0 %4916  ;;  %4955 = vadd.xlane.f32.xlu1 %v4954_v35  ;;  %v12192_v35 = vld [vmem:[#allocation20_spill] sm:$0xff] }
 0x883   :  { %9058 = vrcp.f32 %v4917_v53  ;;  %v12193_v53 = vld [vmem:[#allocation56_spill] sm:$0xff] }
 0x884   :  { %6626 = vrot.lane.b32.xlu0 %v9756_v29, %s9195_s10 }
 0x886   :  { %v4914_v40 = vpop.xlane.xlu0 %4913 }
 0x887   :  { %9060 = vrcp.f32 %v4914_v40  ;;  %v12194_v40 = vld [vmem:[#allocation54_spill] sm:$0xff] }
 0x888   :  { %6800 = vrot.lane.b32.xlu0 %v9783_v24, %s9195_s10 }
 0x88c   :  { %6798 = vrot.lane.b32.xlu0 %v9586_v14, %s9195_s10  ;;  %v11198_v14 = vpop.permute.xlu1 %5961 }
 0x890   :  { %6974 = vrot.lane.b32.xlu0 %v9638_v18, %s9195_s10  ;;  %v9059_v0 = vpop.eup %9058 }
 0x891   :  { %v4977_v29 = vmul.f32 %v9059_v0, %v11040_v61 }
 0x893   :  { %6147 = vrot.lane.b32.xlu1 %v9715_v37, %s9195_s10 }
 0x894   :  { %v9061_v20 = vpop.eup %9060 }
 0x895   :  { %v4976_v23 = vmul.f32 %v9061_v20, %v11046_v32 }
 0x897   :  { %8663 = vmatprep.mubr.msk.f32.mxu0 %vm1583_vm4, %v4976_v23  ;;  %6143 = vrot.lane.b32.xlu1 %v9694_v21, %s9195_s10 }
 0x898   :  { %8664 = vmatmul.mubr.msk.f32.vlgmr.msra.gmra.mxu0 %vm1583_vm4, %v4977_v29 }
 0x899   :  { %8674 = vmatpush3.msra.mxu0 %v10838_v22 }
 0x89a   :  { %8675 = vmatprep.subr.mxu0 %v10989_v15 }
 0x89b   :  { %8676 = vmatpush3.msra.mxu0 %v10989_v15  ;;  %6331 = vrot.lane.b32.xlu1 %v9764_v31, %s9195_s10 }
 0x89c   :  { %8687 = vmatprep.subr.mxu0 %v10991_v46 }
 0x89f   :  { %6145 = vrot.lane.b32.xlu1 %v9733_v50, %s9195_s10 }
 0x8a3   :  { %6329 = vrot.lane.b32.xlu1 %v9772_v11, %s9195_s10 }
 0x8a7   :  { %6325 = vrot.lane.b32.xlu1 %v9742_v54, %s9195_s10 }
 0x8ab   :  { %6327 = vrot.lane.b32.xlu1 %v12113_v33, %s9195_s10 }
 0x8af   :  { %6713 = vrot.lane.b32.xlu1 %v12114_v16, %s9195_s10 }
 0x8b3   :  { %6624 = vrot.lane.b32.xlu1 %v12115_v25, %s9195_s10 }
 0x8b7   :  { %6711 = vrot.lane.b32.xlu1 %v12052_v55, %s9195_s10 }
 0x8ba   :  { %v4923_v18 = vpop.xlane.xlu1 %4922 }
 0x8bb   :  { %6887 = vrot.lane.b32.xlu1 %v12053_v63, %s9195_s10  ;;  %9062 = vrcp.f32 %v4923_v18 }
 0x8be   :  { %v4920_v21 = vpop.xlane.xlu1 %4919  ;;  %v4929_v37 = vpop.xlane.xlu0 %4928 }
 0x8bf   :  { %9064 = vrcp.f32 %v4920_v21  ;;  %6885 = vrot.lane.b32.xlu1 %v12054_v36, %s9195_s10 }
 0x8c0   :  { %9066 = vrcp.f32 %v4929_v37 }
 0x8c2   :  { %v4935_v50 = vpop.xlane.xlu1 %4934 }
 0x8c3   :  { %v4926_v54 = vpop.xlane.xlu0 %4925  ;;  %7061 = vrot.lane.b32.xlu1 %v12116_v13, %s9195_s10 }
 0x8c4   :  { %9068 = vrcp.f32 %v4926_v54 }
 0x8c5   :  { %9070 = vrcp.f32 %v4935_v50 }
 0x8c6   :  { %v4932_v31 = vpop.xlane.xlu1 %4931 }
 0x8c7   :  { %9072 = vrcp.f32 %v4932_v31  ;;  %v4941_v11 = vpop.xlane.xlu0 %4940 }
 0x8c8   :  { %v9063_v55 = vpop.eup %9062  ;;  %9074 = vrcp.f32 %v4941_v11 }
 0x8c9   :  { %v4979_v25 = vmul.f32 %v9063_v55, %v11071_v34 }
 0x8ca   :  { %v4947_v24 = vpop.xlane.xlu1 %4946 }
 0x8cb   :  { %v4938_v63 = vpop.xlane.xlu0 %4937 }
 0x8cc   :  { %v9065_v33 = vpop.eup %9064  ;;  %9076 = vrcp.f32 %v4938_v63 }
 0x8cd   :  { %v4978_v16 = vmul.f32 %v9065_v33, %v11075_v12  ;;  %9078 = vrcp.f32 %v4947_v24  ;;  %v9067_v13 = vpop.eup %9066  ;;  %v12196_v33 = vld [vmem:[#allocation14_spill] sm:$0xff] }
 0x8ce   :  { %v4944_v36 = vpop.xlane.xlu1 %4943  ;;  %v4981_v34 = vmul.f32 %v9067_v13, %v11079_v17 }
 0x8cf   :  { %9080 = vrcp.f32 %v4944_v36  ;;  %v4953_v22 = vpop.xlane.xlu0 %4952  ;;  %8670 = vmatprep.mubr.msk.f32.mxu1 %vm1583_vm4, %v4978_v16  ;;  %v12197_v16 = vld [vmem:[#allocation8_spill] sm:$0xff] }
 0x8d0   :  { %8671 = vmatmul.mubr.msk.f32.vlgmr.msra.gmra.mxu1 %vm1583_vm4, %v4979_v25  ;;  %9082 = vrcp.f32 %v4953_v22 }
 0x8d1   :  { %v9069_v61 = vpop.eup %9068  ;;  %8681 = vmatpush3.msra.mxu1 %v10849_v51 }
 0x8d2   :  { %8682 = vmatprep.subr.mxu1 %v11034_v30  ;;  %v4980_v15 = vmul.f32 %v9069_v61, %v11088_v49  ;;  %v9071_v32 = vpop.eup %9070 }
 0x8d3   :  { %8683 = vmatpush3.msra.mxu1 %v11034_v30  ;;  %v4950_v12 = vpop.xlane.xlu0 %4949  ;;  %v4983_v49 = vmul.f32 %v9071_v32, %v11086_v28 }
 0x8d4   :  { %v9073_v6 = vpop.eup %9072  ;;  %9084 = vrcp.f32 %v4950_v12  ;;  %8677 = vmatprep.mubr.msk.f32.mxu0 %vm1583_vm4, %v4980_v15  ;;  %8694 = vmatprep.subr.mxu1 %v11036_v44 }
 0x8d5   :  { %8678 = vmatmul.mubr.msk.f32.vlgmr.msra.gmra.mxu0 %vm1583_vm4, %v4981_v34  ;;  %v4982_v51 = vmul.f32 %v9073_v6, %v11094_v57  ;;  %v9075_v17 = vpop.eup %9074  ;;  %v12187_v57 = vld [vmem:[#allocation63_spill] sm:$0xff] }
 0x8d6   :  { %8688 = vmatpush3.msra.mxu0 %v10991_v46  ;;  %v4985_v2 = vmul.f32 %v9075_v17, %v11096_v10 }
 0x8d7   :  { %8689 = vmatprep.subr.mxu0 %v12185_v4  ;;  %v6059_v30 = vpop.permute.xlu0 %6058  ;;  %8684 = vmatprep.mubr.msk.f32.mxu1 %vm1583_vm4, %v4982_v51 }
 0x8d8   :  { %8690 = vmatpush3.msra.mxu0 %v12185_v4  ;;  %8685 = vmatmul.mubr.msk.f32.vlgmr.msra.gmra.mxu1 %vm1583_vm4, %v4983_v49  ;;  %v8046_v49 = vld [vmem:[%s11888_s1 + $0x18] sm:$0xff]  }
 0x8d9   :  { %v9077_v42 = vpop.eup %9076  ;;  %8701 = vmatprep.subr.mxu0 %v12186_v38  ;;  %8695 = vmatpush3.msra.mxu1 %v11036_v44 }
 0x8da   :  { %8696 = vmatprep.subr.mxu1 %v12187_v57  ;;  %v4984_v46 = vmul.f32 %v9077_v42, %v11104_v59  ;;  %v9079_v28 = vpop.eup %9078  ;;  %v12189_v59 = vld [vmem:[#allocation62_spill] sm:$0xff]  ;;  %v7930_v42 = vunpack.c.l.bf16 %v8046_v49 }
 0x8db   :  { %8697 = vmatpush3.msra.mxu1 %v12187_v57  ;;  %v5873_v27 = vpop.permute.xlu0 %5872  ;;  %v4987_v44 = vmul.f32 %v9079_v28, %v11102_v1 }
 0x8dc   :  { %v9081_v60 = vpop.eup %9080  ;;  %8691 = vmatprep.mubr.msk.f32.mxu0 %vm1583_vm4, %v4984_v46  ;;  %8708 = vmatprep.subr.mxu1 %v12188_v48 }
 0x8dd   :  { %8692 = vmatmul.mubr.msk.f32.vlgmr.msra.gmra.mxu0 %vm1583_vm4, %v4985_v2  ;;  %v4986_v58 = vmul.f32 %v9081_v60, %v11110_v43  ;;  %v9083_v47 = vpop.eup %9082  ;;  %v12191_v43 = vld [vmem:[#allocation11_spill] sm:$0xff] }
 0x8de   :  { %8702 = vmatpush3.msra.mxu0 %v12186_v38  ;;  %v4989_v52 = vmul.f32 %v9083_v47, %v11112_v3  ;;  %v12195_v3 = vld [vmem:[#allocation64_spill] sm:$0xff] }
 0x8df   :  { %8703 = vmatprep.subr.mxu0 %v12189_v59  ;;  %v6057_v9 = vpop.permute.xlu0 %6056  ;;  %8698 = vmatprep.mubr.msk.f32.mxu1 %vm1583_vm4, %v4986_v58 }
 0x8e0   :  { %8704 = vmatpush3.msra.mxu0 %v12189_v59  ;;  %8699 = vmatmul.mubr.msk.f32.vlgmr.msra.gmra.mxu1 %vm1583_vm4, %v4987_v44 }
 0x8e1   :  { %v9085_v10 = vpop.eup %9084  ;;  %8715 = vmatprep.subr.msk.mxu0 %vm806_vm0, %v12190_v26  ;;  %8709 = vmatpush3.msra.mxu1 %v12188_v48 }
 0x8e2   :  { %8710 = vmatprep.subr.mxu1 %v12191_v43  ;;  %v4988_v1 = vmul.f32 %v9085_v10, %v11118_v8 }
 0x8e3   :  { %8711 = vmatpush3.msra.mxu1 %v12191_v43  ;;  %v6053_v19 = vpop.permute.xlu0 %6052  ;;  %v8050_v43 = vld [vmem:[%s11888_s1 + $0x38] sm:$0xff]  }
 0x8e4   :  { %8705 = vmatprep.mubr.msk.f32.mxu0 %vm1583_vm4, %v4988_v1  ;;  %8722 = vmatprep.subr.msk.mxu1 %vm806_vm0, %v12192_v35  ;;  %v8054_v1 = vld [vmem:[%s11888_s1 + $0x58] sm:$0xff]  }
 0x8e5   :  { %8706 = vmatmul.mubr.msk.f32.vlgmr.msra.gmra.mxu0 %vm1583_vm4, %v4989_v52 }
 0x8e6   :  { %8716 = vmatpush3.xpose.msk.msra.mxu0 %vm806_vm0, %v12190_v26  ;;  %8719 = vmatprep.mubr.msk.f32.mxu0 %vm806_vm0, %v12193_v53  ;;  %v7963_v53 = vunpack.c.h.bf16 %v8054_v1 }
 0x8e7   :  { %8717 = vmatprep.subr.msk.mxu0 %vm806_vm0, %v12194_v40  ;;  %v6241_v8 = vpop.permute.xlu0 %6240 }
 0x8ea   :  { %8718 = vmatpush3.xpose.msk.msra.mxu0 %vm806_vm0, %v12194_v40 }
 0x8eb   :  { %8729 = vmatprep.subr.msk.mxu0 %vm806_vm0, %v12195_v3  ;;  %v6055_v0 = vpop.permute.xlu0 %6054 }
 0x8ed   :  { %8720 = vmatmul.mubr.msk.f32.vlgmr.msra.gmra.mxu0 %vm806_vm0, %v11142_v7 }
 0x8ee   :  { %8730 = vmatpush3.xpose.msk.msra.mxu0 %vm806_vm0, %v12195_v3  ;;  %8733 = vmatprep.mubr.msk.f32.mxu0 %vm806_vm0, %v11156_v45  ;;  %v6150_v45 = vpop.permute.xlu1 %6149 }
 0x8ef   :  { %8731 = vmatprep.subr.msk.mxu0 %vm806_vm0, %v11146_v39  ;;  %v6239_v20 = vpop.permute.xlu0 %6238 }
 0x8f2   :  { %8732 = vmatpush3.xpose.msk.msra.mxu0 %vm806_vm0, %v11146_v39  ;;  %v5964_v29 = vpop.permute.xlu1 %5963 }
 0x8f3   :  { %8743 = vmatprep.subr.msk.mxu0 %vm806_vm0, %v6059_v30  ;;  %v6235_v23 = vpop.permute.xlu0 %6234 }
 0x8f5   :  { %8734 = vmatmul.mubr.msk.f32.vlgmr.msra.gmra.mxu0 %vm806_vm0, %v5873_v27 }
 0x8f6   :  { %8744 = vmatpush3.xpose.msk.msra.mxu0 %vm806_vm0, %v6059_v30  ;;  %8747 = vmatprep.mubr.msk.f32.mxu0 %vm806_vm0, %v6053_v19  ;;  %v7931_v30 = vunpack.c.h.bf16 %v8046_v49 }
 0x8f7   :  { %8745 = vmatprep.subr.msk.mxu0 %vm806_vm0, %v6057_v9  ;;  %v6237_v7 = vpop.permute.xlu0 %6236 }
 0x8fa   :  { %8746 = vmatpush3.xpose.msk.msra.mxu0 %vm806_vm0, %v6057_v9 }
 0x8fb   :  { %8757 = vmatprep.subr.msk.mxu0 %vm806_vm0, %v6241_v8  ;;  %v6627_v39 = vpop.permute.xlu0 %6626 }
 0x8fd   :  { %8748 = vmatmul.mubr.msk.f32.vlgmr.msra.gmra.mxu0 %vm806_vm0, %v6055_v0 }
 0x8fe   :  { %8758 = vmatpush3.xpose.msk.msra.mxu0 %vm806_vm0, %v6241_v8  ;;  %8761 = vmatprep.mubr.msk.f32.mxu0 %vm806_vm0, %v6235_v23  ;;  %v7946_v8 = vunpack.c.l.bf16 %v8050_v43 }
 0x8ff   :  { %8759 = vmatprep.subr.msk.mxu0 %vm806_vm0, %v6239_v20 }
 0x902   :  { %8760 = vmatpush3.xpose.msk.msra.mxu0 %vm806_vm0, %v6239_v20 }
 0x903   :  { %8771 = vmatprep.subr.mxu0 %v6627_v39 }
 0x905   :  { %8762 = vmatmul.mubr.msk.f32.vlgmr.msra.gmra.mxu0 %vm806_vm0, %v6237_v7 }
 0x906   :  { %8772 = vmatpush3.msra.mxu0 %v6627_v39 }
 0x907   :  { %v4959_v18 = vpop.xlane.xlu1 %4958 }
 0x908   :  { %9086 = vrcp.f32 %v4959_v18  ;;  %v8058_v18 = vld [vmem:[%s11888_s1 + $0x78] sm:$0xff]  }
 0x90b   :  { %v4956_v21 = vpop.xlane.xlu1 %4955 }
 0x90c   :  { %9088 = vrcp.f32 %v4956_v21 }
 0x90f   :  { %v6148_v37 = vpop.permute.xlu1 %6147 }
 0x913   :  { %v6144_v50 = vpop.permute.xlu1 %6143 }
 0x915   :  { %v9087_v31 = vpop.eup %9086 }
 0x916   :  { %v4991_v63 = vmul.f32 %v9087_v31, %v11150_v62 }
 0x917   :  { %v6332_v54 = vpop.permute.xlu1 %6331 }
 0x919   :  { %v9089_v11 = vpop.eup %9088 }
 0x91a   :  { %v4990_v24 = vmul.f32 %v9089_v11, %v11158_v56  ;;  %v12198_v56 = vld [vmem:[#allocation12_spill] sm:$0xff] }
 0x91b   :  { %v6146_v55 = vpop.permute.xlu1 %6145  ;;  %v8062_v11 = vld [vmem:[%s11888_s1 + $0x98] sm:$0xff]  }
 0x91c   :  { %8712 = vmatprep.mubr.msk.f32.mxu1 %vm1583_vm4, %v4990_v24 }
 0x91d   :  { %8713 = vmatmul.mubr.msk.f32.vlgmr.msra.gmra.mxu1 %vm1583_vm4, %v4991_v63  ;;  %v7979_v63 = vunpack.c.h.bf16 %v8058_v18 }
 0x91e   :  { %8723 = vmatpush3.xpose.msk.msra.mxu1 %vm806_vm0, %v12192_v35  ;;  %8726 = vmatprep.mubr.msk.f32.mxu1 %vm806_vm0, %v12196_v33  ;;  %v7947_v35 = vunpack.c.h.bf16 %v8050_v43 }
 0x91f   :  { %8724 = vmatprep.subr.msk.mxu1 %vm806_vm0, %v12197_v16  ;;  %v6330_v36 = vpop.permute.xlu1 %6329 }
 0x922   :  { %8725 = vmatpush3.xpose.msk.msra.mxu1 %vm806_vm0, %v12197_v16  ;;  %v7995_v16 = vunpack.c.h.bf16 %v8062_v11 }
 0x923   :  { %8736 = vmatprep.subr.msk.mxu1 %vm806_vm0, %v12198_v56  ;;  %v6326_v62 = vpop.permute.xlu1 %6325 }
 0x925   :  { %8727 = vmatmul.mubr.msk.f32.vlgmr.msra.gmra.mxu1 %vm806_vm0, %v11126_v41 }
 0x926   :  { %8737 = vmatpush3.xpose.msk.msra.mxu1 %vm806_vm0, %v12198_v56  ;;  %8740 = vmatprep.mubr.msk.f32.mxu1 %vm806_vm0, %v11198_v14  ;;  %v11316_v14 = vpop.permute.xlu0 %6800 }
 0x927   :  { %8738 = vmatprep.subr.msk.mxu1 %vm806_vm0, %v11132_v5  ;;  %v6328_v25 = vpop.permute.xlu1 %6327 }
 0x92a   :  { %8739 = vmatpush3.xpose.msk.msra.mxu1 %vm806_vm0, %v11132_v5 }
 0x92b   :  { %8750 = vmatprep.subr.msk.mxu1 %vm806_vm0, %v6150_v45  ;;  %v6714_v22 = vpop.permute.xlu1 %6713 }
 0x92d   :  { %8741 = vmatmul.mubr.msk.f32.vlgmr.msra.gmra.mxu1 %vm806_vm0, %v5964_v29 }
 0x92e   :  { %8751 = vmatpush3.xpose.msk.msra.mxu1 %vm806_vm0, %v6150_v45  ;;  %8754 = vmatprep.mubr.msk.f32.mxu1 %vm806_vm0, %v6144_v50 }
 0x92f   :  { %8752 = vmatprep.subr.msk.mxu1 %vm806_vm0, %v6148_v37  ;;  %v6625_v41 = vpop.permute.xlu1 %6624 }
 0x930   :  { %8773 = vmatprep.subr.mxu0 %v6625_v41 }
 0x931   :  { %8774 = vmatpush3.msra.mxu0 %v6625_v41  ;;  %v12206_v41 = vld [vmem:[#allocation10_spill] sm:$0xff] }
 0x932   :  { %8753 = vmatpush3.xpose.msk.msra.mxu1 %vm806_vm0, %v6148_v37  ;;  %8785 = vmatprep.subr.mxu0 %v11316_v14  ;;  %v7962_v37 = vunpack.c.l.bf16 %v8054_v1 }
 0x933   :  { %8764 = vmatprep.subr.msk.mxu1 %vm806_vm0, %v6332_v54  ;;  %v6712_v5 = vpop.permute.xlu1 %6711 }
 0x935   :  { %8755 = vmatmul.mubr.msk.f32.vlgmr.msra.gmra.mxu1 %vm806_vm0, %v6146_v55 }
 0x936   :  { %8765 = vmatpush3.xpose.msk.msra.mxu1 %vm806_vm0, %v6332_v54  ;;  %8768 = vmatprep.mubr.msk.f32.mxu1 %vm806_vm0, %v6326_v62  ;;  %v7978_v62 = vunpack.c.l.bf16 %v8058_v18 }
 0x937   :  { %8766 = vmatprep.subr.msk.mxu1 %vm806_vm0, %v6330_v36  ;;  %v11327_v13 = vpop.permute.xlu1 %6887 }
 0x93a   :  { %8767 = vmatpush3.xpose.msk.msra.mxu1 %vm806_vm0, %v6330_v36 }
 0x93b   :  { %8778 = vmatprep.subr.mxu1 %v6714_v22 }
 0x93d   :  { %8769 = vmatmul.mubr.msk.f32.vlgmr.msra.gmra.mxu1 %vm806_vm0, %v6328_v25 }
 0x93e   :  { %8779 = vmatpush3.msra.mxu1 %v6714_v22 }
 0x93f   :  { %8780 = vmatprep.subr.mxu1 %v6712_v5 }
 0x940   :  { %8781 = vmatpush3.msra.mxu1 %v6712_v5 }
 0x941   :  { %8792 = vmatprep.subr.mxu1 %v11327_v13 }
 0x958   :  { %v11330_v61 = vpop.f32.mrf.mxu0 }
 0x95a   :  { %v11332_v15 = vpop.f32.mrf.mxu0 }
 0x990   :  { %v11361_v58 = vpop.f32.mrf.mxu1 }
 0x992   :  { %v11363_v44 = vpop.f32.mrf.mxu1 }
 0x995   :  { %v11334_v32 = vpop.f32.mrf.mxu0 }
 0x997   :  { %v11336_v12 = vpop.f32.mrf.mxu0 }
 0x998   :  { %v11365_v59 = vpop.f32.mrf.mxu1 }
 0x99a   :  { %v11367_v9 = vpop.f32.mrf.mxu1 }
 0x99d   :  { %v11338_v34 = vpop.f32.mrf.mxu0 }
 0x99f   :  { %v11340_v6 = vpop.f32.mrf.mxu0 }
 0x9a0   :  { %v11369_v47 = vpop.f32.mrf.mxu1 }
 0x9a2   :  { %v11371_v10 = vpop.f32.mrf.mxu1 }
 0x9a5   :  { %v11342_v51 = vpop.f32.mrf.mxu0 }
 0x9a7   :  { %v11347_v4 = vpop.f32.mrf.mxu0 }
 0x9ad   :  { %v8721_v17 = vpop.f32.mrf.mxu0 }
 0x9ae   :  { %v6417_v57 = vsel %vm9827_vm3, -1e+09, %v8721_v17 }
 0x9af   :  { %v11351_v46 = vadd.f32 %v7931_v30, %v6417_v57  ;;  %v5770_v28 = vpop.f32.mrf.mxu0  ;;  %v8066_v57 = vld [vmem:[%s11888_s1 + $0xb8] sm:$0xff]  }
 0x9b0   :  { %v6416_v27 = vsel %vm9827_vm3, -1e+09, %v5770_v28  ;;  %v8010_v20 = vunpack.c.l.bf16 %v8066_v57  ;;  %vm7528_vm3 = vcmask 523264  }
 0x9b1   :  { %v11355_v2 = vadd.f32 %v7930_v42, %v6416_v27  ;;  %v6451_v60 = vsel %vm1583_vm4, %v11351_v46, -inf  ;;  %v7994_v42 = vunpack.c.l.bf16 %v8062_v11  ;;  %v8070_v27 = vld [vmem:[%s11888_s1 + $0xd8] sm:$0xff]  }
 0x9b2   :  { %6452 = vmax.xlane.f32.xlu0 %v6451_v60 }
 0x9b3   :  { %v6448_v48 = vsel %vm1583_vm4, %v11355_v2, -inf }
 0x9b5   :  { %v8735_v19 = vpop.f32.mrf.mxu0 }
 0x9b6   :  { %6449 = vmax.xlane.f32.xlu0 %v6448_v48  ;;  %v6421_v0 = vsel %vm9873_vm8, -1e+09, %v8735_v19 }
 0x9b7   :  { %v5952_v7 = vpop.f32.mrf.mxu0  ;;  %v11394_v21 = vadd.f32 %v7963_v53, %v6421_v0  ;;  %v8027_v53 = vunpack.c.h.bf16 %v8070_v27 }
 0x9b8   :  { %v6420_v31 = vsel %vm9873_vm8, -1e+09, %v5952_v7 }
 0x9b9   :  { %v11407_v33 = vadd.f32 %v7962_v37, %v6420_v31  ;;  %v6463_v56 = vsel %vm1583_vm4, %v11394_v21, -inf  ;;  %v8026_v31 = vunpack.c.l.bf16 %v8070_v27 }
 0x9bb   :  { %v6460_v43 = vsel %vm1583_vm4, %v11407_v33, -inf }
 0x9bd   :  { %v8749_v24 = vpop.f32.mrf.mxu0 }
 0x9be   :  { %v6425_v22 = vsel %vm9921_vm12, -1e+09, %v8749_v24 }
 0x9bf   :  { %v6134_v49 = vpop.f32.mrf.mxu0  ;;  %v11422_v28 = vadd.f32 %v7995_v16, %v6425_v22 }
 0x9c0   :  { %v6424_v1 = vsel %vm9921_vm12, -1e+09, %v6134_v49  ;;  %v12208_v49 = vld [vmem:[#allocation38_spill] sm:$0xff] }
 0x9c1   :  { %v6475_v0 = vsel %vm1583_vm4, %v11422_v28, -inf }
 0x9c5   :  { %v8763_v19 = vpop.f32.mrf.mxu0 }
 0x9c6   :  { %v6429_v7 = vsel %vm9966_vm15, -1e+09, %v8763_v19 }
 0x9c7   :  { %v6316_v18 = vpop.f32.mrf.mxu0  ;;  %v11449_v24 = vadd.f32 %v8027_v53, %v6429_v7 }
 0x9c9   :  { %v6487_v25 = vsel %vm1583_vm4, %v11449_v24, -inf }
 0x9dd   :  { %v11373_v26 = vpop.f32.mrf.mxu1 }
 0x9df   :  { %v11381_v52 = vpop.f32.mrf.mxu1 }
 0x9e5   :  { %v8728_v40 = vpop.f32.mrf.mxu1 }
 0x9e6   :  { %v6419_v23 = vsel %vm9849_vm6, -1e+09, %v8728_v40  ;;  %v11435_v40 = vadd.f32 %v7994_v42, %v6424_v1 }
 0x9e7   :  { %v11387_v45 = vadd.f32 %v7947_v35, %v6419_v23  ;;  %v5861_v39 = vpop.f32.mrf.mxu1  ;;  %v8011_v35 = vunpack.c.h.bf16 %v8066_v57 }
 0x9e8   :  { %v6418_v29 = vsel %vm9849_vm6, -1e+09, %v5861_v39  ;;  %v6472_v16 = vsel %vm1583_vm4, %v11435_v40, -inf }
 0x9e9   :  { %v11396_v50 = vadd.f32 %v7946_v8, %v6418_v29  ;;  %v6457_v54 = vsel %vm1583_vm4, %v11387_v45, -inf }
 0x9ea   :  { %6458 = vmax.xlane.f32.xlu0 %v6457_v54 }
 0x9eb   :  { %v6454_v55 = vsel %vm1583_vm4, %v11396_v50, -inf }
 0x9ec   :  { %6455 = vmax.xlane.f32.xlu1 %v6454_v55 }
 0x9ed   :  { %v8742_v36 = vpop.f32.mrf.mxu1 }
 0x9ee   :  { %v6423_v5 = vsel %vm9897_vm10, -1e+09, %v8742_v36  ;;  %6464 = vmax.xlane.f32.xlu0 %v6463_v56  ;;  %v6428_v36 = vsel %vm9966_vm15, -1e+09, %v6316_v18 }
 0x9ef   :  { %v11415_v30 = vadd.f32 %v7979_v63, %v6423_v5  ;;  %v6043_v17 = vpop.f32.mrf.mxu1  ;;  %v11459_v56 = vadd.f32 %v8026_v31, %v6428_v36  ;;  %v12207_v5 = vld [vmem:[#allocation13_spill] sm:$0xff] }
 0x9f0   :  { %v6422_v38 = vsel %vm9897_vm10, -1e+09, %v6043_v17  ;;  %v8074_v17 = vld [vmem:[%s11888_s1 + $0xf8] sm:$0xff]  }
 0x9f1   :  { %v11427_v60 = vadd.f32 %v7978_v62, %v6422_v38  ;;  %v6469_v48 = vsel %vm1583_vm4, %v11415_v30, -inf  ;;  %v6484_v22 = vsel %vm1583_vm4, %v11459_v56, -inf  ;;  %v8043_v38 = vunpack.c.h.bf16 %v8074_v17 }
 0x9f2   :  { %6470 = vmax.xlane.f32.xlu1 %v6469_v48  ;;  %6461 = vmax.xlane.f32.xlu0 %v6460_v43  ;;  %v8042_v1 = vunpack.c.l.bf16 %v8074_v17 }
 0x9f3   :  { %v6466_v3 = vsel %vm1583_vm4, %v11427_v60, -inf }
 0x9f5   :  { %v8756_v8 = vpop.f32.mrf.mxu1 }
 0x9f6   :  { %v6427_v29 = vsel %vm9945_vm14, -1e+09, %v8756_v8  ;;  %6467 = vmax.xlane.f32.xlu1 %v6466_v3  ;;  %6476 = vmax.xlane.f32.xlu0 %v6475_v0 }
 0x9f7   :  { %v11445_v37 = vadd.f32 %v8011_v35, %v6427_v29  ;;  %v6225_v54 = vpop.f32.mrf.mxu1  ;;  %v11482_v35 = vpop.permute.xlu0 %6798 }
 0x9f8   :  { %v6426_v11 = vsel %vm9945_vm14, -1e+09, %v6225_v54  ;;  %v12210_v54 = vld [vmem:[#allocation21_spill] sm:$0xff] }
 0x9f9   :  { %v11451_v55 = vadd.f32 %v8010_v20, %v6426_v11  ;;  %v6481_v63 = vsel %vm1583_vm4, %v11445_v37, -inf }
 0x9fa   :  { %6482 = vmax.xlane.f32.xlu1 %v6481_v63  ;;  %6473 = vmax.xlane.f32.xlu0 %v6472_v16  ;;  %v11504_v16 = vpop.permute.xlu1 %6885 }
 0x9fb   :  { %v6478_v62 = vsel %vm1583_vm4, %v11451_v55, -inf  ;;  %v11490_v0 = vpop.permute.xlu0 %6974 }
 0x9fd   :  { %v8770_v42 = vpop.f32.mrf.mxu1 }
 0x9fe   :  { %6479 = vmax.xlane.f32.xlu1 %v6478_v62  ;;  %6488 = vmax.xlane.f32.xlu0 %v6487_v25  ;;  %v6431_v27 = vsel %vm10002_vm2, -1e+09, %v8770_v42 }
 0x9ff   :  { %v6407_v48 = vpop.f32.mrf.mxu1  ;;  %v11478_v43 = vadd.f32 %v8043_v38, %v6431_v27 }
 0xa00   :  { %v6430_v19 = vsel %vm10002_vm2, -1e+09, %v6407_v48 }
 0xa01   :  { %v11484_v53 = vadd.f32 %v8042_v1, %v6430_v19  ;;  %v6493_v8 = vsel %vm1583_vm4, %v11478_v43, -inf }
 0xa02   :  { %6485 = vmax.xlane.f32.xlu0 %v6484_v22 }
 0xa03   :  { %v6490_v3 = vsel %vm1583_vm4, %v11484_v53, -inf }
 0xa0f   :  { %7059 = vrot.lane.b32.xlu1 %v12206_v41, %s9195_s10 }
 0xa18   :  { %6972 = vrot.lane.b32.xlu0 %v12207_v5, %s9195_s10 }
 0xa1c   :  { %7148 = vrot.lane.b32.xlu0 %v12208_v49, %s9195_s10 }
 0xa33   :  { %6494 = vmax.xlane.f32.xlu1 %v6493_v8 }
 0xa37   :  { %6491 = vmax.xlane.f32.xlu1 %v6490_v3 }
 0xa3b   :  { %v6453_v20 = vpop.xlane.xlu0 %6452 }
 0xa3c   :  { %v6497_v23 = vsub.f32 %v11351_v46, %v6453_v20 }
 0xa3e   :  { %v6514_v7 = vmul.f32 1.442695, %v6497_v23 }
 0xa3f   :  { %v6450_v39 = vpop.xlane.xlu0 %6449 }
 0xa40   :  { %9090 = vpow2.f32 %v6514_v7  ;;  %v6496_v29 = vsub.f32 %v11355_v2, %v6450_v39  ;;  %v11506_v2 = vpop.permute.xlu1 %7061 }
 0xa42   :  { %v6512_v18 = vmul.f32 1.442695, %v6496_v29 }
 0xa44   :  { %9092 = vpow2.f32 %v6512_v18 }
 0xa48   :  { %7235 = vrot.lane.b32.xlu1 %v12210_v54, %s9195_s10 }
 0xa4d   :  { %v11496_v31 = vpop.eup %9090 }
 0xa4e   :  { %v6547_v11 = vsel %vm1583_vm4, %v11496_v31, 0.0 }
 0xa4f   :  { %6548 = vadd.xlane.f32.xlu0 %v6547_v11 }
 0xa51   :  { %v11500_v63 = vpop.eup %9092 }
 0xa52   :  { %v6544_v46 = vsel %vm1583_vm4, %v11500_v63, 0.0 }
 0xa53   :  { %6545 = vadd.xlane.f32.xlu0 %v6544_v46 }
 0xa73   :  { %v6459_v36 = vpop.xlane.xlu0 %6458 }
 0xa74   :  { %v6499_v62 = vsub.f32 %v11387_v45, %v6459_v36 }
 0xa75   :  { %v6456_v25 = vpop.xlane.xlu1 %6455 }
 0xa76   :  { %v6518_v22 = vmul.f32 1.442695, %v6499_v62  ;;  %v6498_v41 = vsub.f32 %v11396_v50, %v6456_v25 }
 0xa77   :  { %v6465_v5 = vpop.xlane.xlu0 %6464 }
 0xa78   :  { %9094 = vpow2.f32 %v6518_v22  ;;  %v6516_v49 = vmul.f32 1.442695, %v6498_v41  ;;  %v6501_v17 = vsub.f32 %v11394_v21, %v6465_v5 }
 0xa7a   :  { %9096 = vpow2.f32 %v6516_v49  ;;  %v6522_v42 = vmul.f32 1.442695, %v6501_v17 }
 0xa7b   :  { %v6471_v38 = vpop.xlane.xlu1 %6470  ;;  %v6462_v57 = vpop.xlane.xlu0 %6461 }
 0xa7c   :  { %9098 = vpow2.f32 %v6522_v42  ;;  %v6503_v27 = vsub.f32 %v11415_v30, %v6471_v38  ;;  %v6500_v48 = vsub.f32 %v11407_v33, %v6462_v57 }
 0xa7e   :  { %v6526_v1 = vmul.f32 1.442695, %v6503_v27  ;;  %v6520_v45 = vmul.f32 1.442695, %v6500_v48 }
 0xa7f   :  { %v6468_v19 = vpop.xlane.xlu1 %6467  ;;  %v6477_v8 = vpop.xlane.xlu0 %6476 }
 0xa80   :  { %9100 = vpow2.f32 %v6526_v1  ;;  %v6502_v50 = vsub.f32 %v11427_v60, %v6468_v19  ;;  %v6505_v3 = vsub.f32 %v11422_v28, %v6477_v8 }
 0xa81   :  { %9102 = vpow2.f32 %v6520_v45 }
 0xa82   :  { %v6524_v21 = vmul.f32 1.442695, %v6502_v50  ;;  %v6530_v20 = vmul.f32 1.442695, %v6505_v3 }
 0xa83   :  { %v6483_v23 = vpop.xlane.xlu1 %6482  ;;  %v6474_v7 = vpop.xlane.xlu0 %6473 }
 0xa84   :  { %9104 = vpow2.f32 %v6524_v21  ;;  %v6507_v39 = vsub.f32 %v11445_v37, %v6483_v23  ;;  %v6504_v30 = vsub.f32 %v11435_v40, %v6474_v7  ;;  %v12211_v7 = vld [vmem:[#allocation18_spill] sm:$0xff] }
 0xa85   :  { %v11517_v33 = vpop.eup %9094  ;;  %9106 = vpow2.f32 %v6530_v20 }
 0xa86   :  { %v6534_v29 = vmul.f32 1.442695, %v6507_v39  ;;  %v6528_v18 = vmul.f32 1.442695, %v6504_v30  ;;  %v6553_v60 = vsel %vm1583_vm4, %v11517_v33, 0.0  ;;  %v12212_v30 = vld [vmem:[#allocation23_spill] sm:$0xff] }
 0xa87   :  { %v11521_v54 = vpop.eup %9096  ;;  %v6480_v28 = vpop.xlane.xlu1 %6479  ;;  %6554 = vadd.xlane.f32.xlu1 %v6553_v60  ;;  %v12213_v60 = vld [vmem:[#allocation6_spill] sm:$0xff] }
 0xa88   :  { %v6489_v11 = vpop.xlane.xlu0 %6488  ;;  %9108 = vpow2.f32 %v6534_v29  ;;  %v6506_v46 = vsub.f32 %v11451_v55, %v6480_v28  ;;  %v6550_v25 = vsel %vm1583_vm4, %v11521_v54, 0.0 }
 0xa89   :  { %v6509_v37 = vsub.f32 %v11449_v24, %v6489_v11  ;;  %v11525_v36 = vpop.eup %9098  ;;  %9110 = vpow2.f32 %v6528_v18 }
 0xa8a   :  { %v6532_v40 = vmul.f32 1.442695, %v6506_v46  ;;  %v6559_v22 = vsel %vm1583_vm4, %v11525_v36, 0.0 }
 0xa8b   :  { %v6538_v62 = vmul.f32 1.442695, %v6509_v37  ;;  %6551 = vadd.xlane.f32.xlu1 %v6550_v25  ;;  %6560 = vadd.xlane.f32.xlu0 %v6559_v22  ;;  %v11570_v39 = vpop.permute.xlu1 %7059  ;;  %v12214_v37 = vld [vmem:[#allocation15_spill] sm:$0xff]  ;;  %v12216_v25 = vld [vmem:[#allocation57_spill] sm:$0xff] }
 0xa8c   :  { %v6486_v41 = vpop.xlane.xlu0 %6485  ;;  %9112 = vpow2.f32 %v6532_v40 }
 0xa8d   :  { %v6508_v5 = vsub.f32 %v11459_v56, %v6486_v41  ;;  %v11532_v55 = vpop.eup %9100  ;;  %9114 = vpow2.f32 %v6538_v62  ;;  %v12215_v62 = vld [vmem:[#allocation59_spill] sm:$0xff]  ;;  %v12217_v41 = vld [vmem:[#allocation60_spill] sm:$0xff] }
 0xa8e   :  { %v11534_v24 = vpop.eup %9102  ;;  %v6565_v17 = vsel %vm1583_vm4, %v11532_v55, 0.0 }
 0xa8f   :  { %v6536_v49 = vmul.f32 1.442695, %v6508_v5  ;;  %6566 = vadd.xlane.f32.xlu1 %v6565_v17  ;;  %v6556_v42 = vsel %vm1583_vm4, %v11534_v24, 0.0 }
 0xa90   :  { %6557 = vadd.xlane.f32.xlu0 %v6556_v42  ;;  %v11586_v22 = vpop.permute.xlu0 %6972 }
 0xa91   :  { %9116 = vpow2.f32 %v6536_v49  ;;  %v11540_v38 = vpop.eup %9104  ;;  %v12218_v49 = vld [vmem:[#allocation58_spill] sm:$0xff] }
 0xa92   :  { %v11542_v57 = vpop.eup %9106  ;;  %v6562_v56 = vsel %vm1583_vm4, %v11540_v38, 0.0 }
 0xa93   :  { %6563 = vadd.xlane.f32.xlu1 %v6562_v56  ;;  %v6571_v27 = vsel %vm1583_vm4, %v11542_v57, 0.0  ;;  %v12219_v56 = vld [vmem:[#allocation17_spill] sm:$0xff] }
 0xa94   :  { %6572 = vadd.xlane.f32.xlu0 %v6571_v27  ;;  %v11598_v42 = vpop.permute.xlu0 %7148 }
 0xa95   :  { %v11548_v48 = vpop.eup %9108 }
 0xa96   :  { %v11550_v1 = vpop.eup %9110  ;;  %v6577_v45 = vsel %vm1583_vm4, %v11548_v48, 0.0 }
 0xa97   :  { %6578 = vadd.xlane.f32.xlu1 %v6577_v45  ;;  %v6568_v19 = vsel %vm1583_vm4, %v11550_v1, 0.0 }
 0xa98   :  { %6569 = vadd.xlane.f32.xlu0 %v6568_v19  ;;  %v12220_v19 = vld [vmem:[#allocation16_spill] sm:$0xff] }
 0xa99   :  { %v11556_v8 = vpop.eup %9112 }
 0xa9a   :  { %v11558_v50 = vpop.eup %9114  ;;  %v6574_v3 = vsel %vm1583_vm4, %v11556_v8, 0.0 }
 0xa9b   :  { %6575 = vadd.xlane.f32.xlu1 %v6574_v3  ;;  %v6583_v21 = vsel %vm1583_vm4, %v11558_v50, 0.0 }
 0xa9c   :  { %6584 = vadd.xlane.f32.xlu0 %v6583_v21  ;;  %v12221_v21 = vld [vmem:[#allocation24_spill] sm:$0xff] }
 0xa9e   :  { %v11564_v20 = vpop.eup %9116 }
 0xa9f   :  { %v6580_v23 = vsel %vm1583_vm4, %v11564_v20, 0.0 }
 0xaa0   :  { %6581 = vadd.xlane.f32.xlu0 %v6580_v23 }
 0xab6   :  { %7146 = vrot.lane.b32.xlu0 %v12211_v7, %s9195_s10 }
 0xaba   :  { %7336 = vrot.lane.b32.xlu0 %v12212_v30, %s9195_s10 }
 0xabc   :  { %v6495_v29 = vpop.xlane.xlu1 %6494 }
 0xabd   :  { %v6511_v18 = vsub.f32 %v11478_v43, %v6495_v29  ;;  %v11668_v29 = vld [vmem:[%s11889_s2 + $0x2] ss:$0 sm:$0xff] }
 0xabe   :  { %7340 = vrot.lane.b32.xlu0 %v12213_v60, %s9195_s10  ;;  %v11676_v60 = vld [vmem:[%s11889_s2 + $0x3] ss:$0 sm:$0xff] }
 0xabf   :  { %v6542_v28 = vmul.f32 1.442695, %v6511_v18 }
 0xac0   :  { %v6492_v11 = vpop.xlane.xlu1 %6491 }
 0xac1   :  { %9118 = vpow2.f32 %v6542_v28  ;;  %v6510_v46 = vsub.f32 %v11484_v53, %v6492_v11 }
 0xac2   :  { %7344 = vrot.lane.b32.xlu0 %v12214_v37, %s9195_s10 }
 0xac3   :  { %v6540_v40 = vmul.f32 1.442695, %v6510_v46 }
 0xac5   :  { %9120 = vpow2.f32 %v6540_v40 }
 0xac6   :  { %7348 = vrot.lane.b32.xlu0 %v12215_v62, %s9195_s10 }
 0xaca   :  { %7352 = vrot.lane.b32.xlu0 %v12216_v25, %s9195_s10 }
 0xace   :  { %v11584_v43 = vpop.eup %9118  ;;  %7356 = vrot.lane.b32.xlu0 %v12217_v41, %s9195_s10 }
 0xacf   :  { %v6589_v53 = vsel %vm1583_vm4, %v11584_v43, 0.0 }
 0xad0   :  { %6590 = vadd.xlane.f32.xlu1 %v6589_v53 }
 0xad2   :  { %v11592_v5 = vpop.eup %9120  ;;  %7360 = vrot.lane.b32.xlu0 %v12218_v49, %s9195_s10 }
 0xad3   :  { %v6586_v17 = vsel %vm1583_vm4, %v11592_v5, 0.0 }
 0xad4   :  { %6587 = vadd.xlane.f32.xlu1 %v6586_v17 }
 0xad6   :  { %7364 = vrot.lane.b32.xlu0 %v12219_v56, %s9195_s10 }
 0xad8   :  { %v6549_v27 = vpop.xlane.xlu0 %6548 }
 0xad9   :  { %9122 = vrcp.f32 %v6549_v27 }
 0xada   :  { %7400 = vrot.lane.b32.xlu0 %v11332_v15, %s9194_s17 }
 0xadc   :  { %v6546_v45 = vpop.xlane.xlu0 %6545 }
 0xadd   :  { %9124 = vrcp.f32 %v6546_v45 }
 0xade   :  { %7404 = vrot.lane.b32.xlu0 %v11363_v44, %s9194_s17 }
 0xae2   :  { %7408 = vrot.lane.b32.xlu0 %v11336_v12, %s9194_s17  ;;  %v12222_v12 = vld [vmem:[#allocation50_spill] sm:$0xff] }
 0xae5   :  { %7233 = vrot.lane.b32.xlu1 %v12220_v19, %s9195_s10 }
 0xae6   :  { %7412 = vrot.lane.b32.xlu0 %v11367_v9, %s9194_s17  ;;  %v9123_v3 = vpop.eup %9122  ;;  %v12224_v9 = vld [vmem:[#allocation51_spill] sm:$0xff] }
 0xae7   :  { %v6609_v44 = vmul.f32 %v9123_v3, %v11496_v31  ;;  %v12228_v31 = vld [vmem:[#allocation52_spill] sm:$0xff] }
 0xae9   :  { %7338 = vrot.lane.b32.xlu1 %v12221_v21, %s9195_s10 }
 0xaea   :  { %v9125_v15 = vpop.eup %9124  ;;  %7416 = vrot.lane.b32.xlu0 %v11340_v6, %s9194_s17  ;;  %v12223_v6 = vld [vmem:[#allocation22_spill] sm:$0xff] }
 0xaeb   :  { %v6608_v23 = vmul.f32 %v9125_v15, %v11500_v63  ;;  %v9162_v63 = vld [vmem:[%s11889_s2] ss:$0 sm:$0xff] }
 0xaed   :  { %8775 = vmatprep.mubr.msk.f32.mxu0 %vm1583_vm4, %v6608_v23  ;;  %7342 = vrot.lane.b32.xlu1 %v12222_v12, %s9195_s10 }
 0xaee   :  { %7420 = vrot.lane.b32.xlu0 %v11371_v10, %s9194_s17  ;;  %8776 = vmatmul.mubr.msk.f32.vlgmr.msra.gmra.mxu0 %vm1583_vm4, %v6609_v44  ;;  %v12226_v10 = vld [vmem:[#allocation5_spill] sm:$0xff] }
 0xaef   :  { %8786 = vmatpush3.msra.mxu0 %v11316_v14  ;;  %v12225_v14 = vld [vmem:[#allocation25_spill] sm:$0xff] }
 0xaf0   :  { %8787 = vmatprep.subr.mxu0 %v11482_v35 }
 0xaf1   :  { %8788 = vmatpush3.msra.mxu0 %v11482_v35  ;;  %7346 = vrot.lane.b32.xlu1 %v12223_v6, %s9195_s10  ;;  %v12227_v35 = vld [vmem:[#allocation9_spill] sm:$0xff] }
 0xaf2   :  { %8799 = vmatprep.subr.mxu0 %v11490_v0  ;;  %7424 = vrot.lane.b32.xlu0 %v11347_v4, %s9194_s17  ;;  %v11646_v4 = vpop.permute.xlu1 %7235 }
 0xaf5   :  { %7350 = vrot.lane.b32.xlu1 %v12224_v9, %s9195_s10 }
 0xaf6   :  { %7428 = vrot.lane.b32.xlu0 %v11381_v52, %s9194_s17 }
 0xaf9   :  { %7354 = vrot.lane.b32.xlu1 %v12225_v14, %s9195_s10  ;;  %v12230_v14 = vld [vmem:[#allocation35_spill] sm:$0xff] }
 0xafa   :  { %7567 = vbcast.lane.b32.xlu0 %v9162_v63, 256 }
 0xafd   :  { %7358 = vrot.lane.b32.xlu1 %v12226_v10, %s9195_s10 }
 0xb01   :  { %7362 = vrot.lane.b32.xlu1 %v12227_v35, %s9195_s10 }
 0xb05   :  { %7366 = vrot.lane.b32.xlu1 %v12228_v31, %s9195_s10 }
 0xb09   :  { %7402 = vrot.lane.b32.xlu1 %v11330_v61, %s9194_s17  ;;  %v11660_v61 = vld [vmem:[%s11889_s2 + $0x1] ss:$0 sm:$0xff] }
 0xb0a   :  { %7578 = vbcast.lane.b32.xlu0 %v11660_v61, 256 }
 0xb0d   :  { %7406 = vrot.lane.b32.xlu1 %v11361_v58, %s9194_s17 }
 0xb0e   :  { %7589 = vbcast.lane.b32.xlu0 %v11668_v29, 256 }
 0xb10   :  { %v6555_v52 = vpop.xlane.xlu1 %6554 }
 0xb11   :  { %7410 = vrot.lane.b32.xlu1 %v11334_v32, %s9194_s17  ;;  %9126 = vrcp.f32 %v6555_v52  ;;  %v12231_v52 = vld [vmem:[#allocation45_spill] sm:$0xff] }
 0xb12   :  { %7600 = vbcast.lane.b32.xlu0 %v11676_v60, 256 }
 0xb14   :  { %v6552_v7 = vpop.xlane.xlu1 %6551  ;;  %v6561_v30 = vpop.xlane.xlu0 %6560 }
 0xb15   :  { %9128 = vrcp.f32 %v6552_v7  ;;  %7414 = vrot.lane.b32.xlu1 %v11365_v59, %s9194_s17 }
 0xb16   :  { %9130 = vrcp.f32 %v6561_v30 }
 0xb18   :  { %v6567_v58 = vpop.xlane.xlu1 %6566 }
 0xb19   :  { %v6558_v32 = vpop.xlane.xlu0 %6557  ;;  %7418 = vrot.lane.b32.xlu1 %v11338_v34, %s9194_s17 }
 0xb1a   :  { %9132 = vrcp.f32 %v6558_v32 }
 0xb1b   :  { %9134 = vrcp.f32 %v6567_v58  ;;  %v12232_v58 = vld [vmem:[#allocation39_spill] sm:$0xff] }
 0xb1c   :  { %v6564_v59 = vpop.xlane.xlu1 %6563 }
 0xb1d   :  { %9136 = vrcp.f32 %v6564_v59  ;;  %v6573_v18 = vpop.xlane.xlu0 %6572  ;;  %7422 = vrot.lane.b32.xlu1 %v11369_v47, %s9194_s17  ;;  %v11684_v47 = vld [vmem:[%s11889_s2 + $0x4] ss:$0 sm:$0xff] }
 0xb1e   :  { %v9127_v28 = vpop.eup %9126  ;;  %9138 = vrcp.f32 %v6573_v18  ;;  %7611 = vbcast.lane.b32.xlu0 %v11684_v47, 256 }
 0xb1f   :  { %v6611_v62 = vmul.f32 %v9127_v28, %v11517_v33 }
 0xb20   :  { %v6579_v34 = vpop.xlane.xlu1 %6578 }
 0xb21   :  { %v6570_v11 = vpop.xlane.xlu0 %6569  ;;  %7426 = vrot.lane.b32.xlu1 %v11342_v51, %s9194_s17 }
 0xb22   :  { %v9129_v46 = vpop.eup %9128  ;;  %9140 = vrcp.f32 %v6570_v11 }
 0xb23   :  { %v6610_v37 = vmul.f32 %v9129_v46, %v11521_v54  ;;  %9142 = vrcp.f32 %v6579_v34  ;;  %v9131_v51 = vpop.eup %9130  ;;  %v9167_v54 = vld [vmem:[%s11889_s2 + $0x5] ss:$0 sm:$0xff] }
 0xb24   :  { %v6576_v40 = vpop.xlane.xlu1 %6575  ;;  %7622 = vbcast.lane.b32.xlu0 %v9167_v54, 256  ;;  %v6613_v49 = vmul.f32 %v9131_v51, %v11525_v36 }
 0xb25   :  { %9144 = vrcp.f32 %v6576_v40  ;;  %v6585_v25 = vpop.xlane.xlu0 %6584  ;;  %7430 = vrot.lane.b32.xlu1 %v11373_v26, %s9194_s17  ;;  %8782 = vmatprep.mubr.msk.f32.mxu1 %vm1583_vm4, %v6610_v37 }
 0xb26   :  { %8783 = vmatmul.mubr.msk.f32.vlgmr.msra.gmra.mxu1 %vm1583_vm4, %v6611_v62  ;;  %9146 = vrcp.f32 %v6585_v25 }
 0xb27   :  { %v9133_v41 = vpop.eup %9132  ;;  %8793 = vmatpush3.msra.mxu1 %v11327_v13  ;;  %v9168_v13 = vld [vmem:[%s11889_s2 + $0x6] ss:$0 sm:$0xff] }
 0xb28   :  { %8794 = vmatprep.subr.mxu1 %v11504_v16  ;;  %v6612_v33 = vmul.f32 %v9133_v41, %v11534_v24  ;;  %v9135_v53 = vpop.eup %9134  ;;  %7633 = vbcast.lane.b32.xlu0 %v9168_v13, 256 }
 0xb29   :  { %8795 = vmatpush3.msra.mxu1 %v11504_v16  ;;  %v6582_v26 = vpop.xlane.xlu0 %6581  ;;  %7571 = vbcast.lane.b32.xlu1 %v9162_v63, 264  ;;  %v6615_v16 = vmul.f32 %v9135_v53, %v11532_v55 }
 0xb2a   :  { %v9137_v17 = vpop.eup %9136  ;;  %9148 = vrcp.f32 %v6582_v26  ;;  %8789 = vmatprep.mubr.msk.f32.mxu0 %vm1583_vm4, %v6612_v33  ;;  %8806 = vmatprep.subr.mxu1 %v11506_v2  ;;  %v12235_v33 = vld [vmem:[#allocation49_spill] sm:$0xff] }
 0xb2b   :  { %8790 = vmatmul.mubr.msk.f32.vlgmr.msra.gmra.mxu0 %vm1583_vm4, %v6613_v49  ;;  %v6614_v24 = vmul.f32 %v9137_v17, %v11540_v38  ;;  %v9139_v56 = vpop.eup %9138 }
 0xb2c   :  { %8800 = vmatpush3.msra.mxu0 %v11490_v0 }
 0xb2d   :  { %8801 = vmatprep.subr.mxu0 %v11586_v22  ;;  %v7147_v36 = vpop.permute.xlu0 %7146  ;;  %8796 = vmatprep.mubr.msk.f32.mxu1 %vm1583_vm4, %v6614_v24 }
 0xb2e   :  { %8802 = vmatpush3.msra.mxu0 %v11586_v22  ;;  %8797 = vmatmul.mubr.msk.f32.vlgmr.msra.gmra.mxu1 %vm1583_vm4, %v6615_v16  ;;  %v6617_v22 = vmul.f32 %v9139_v56, %v11542_v57 }
 0xb2f   :  { %v9141_v27 = vpop.eup %9140  ;;  %8813 = vmatprep.subr.mxu0 %v11598_v42  ;;  %8807 = vmatpush3.msra.mxu1 %v11506_v2 }
 0xb30   :  { %8808 = vmatprep.subr.mxu1 %v11570_v39  ;;  %v6616_v0 = vmul.f32 %v9141_v27, %v11550_v1  ;;  %7582 = vbcast.lane.b32.xlu1 %v11660_v61, 264  ;;  %v9143_v55 = vpop.eup %9142 }
 0xb31   :  { %8809 = vmatpush3.msra.mxu1 %v11570_v39  ;;  %v11720_v38 = vpop.permute.xlu0 %7336  ;;  %v6619_v1 = vmul.f32 %v9143_v55, %v11548_v48 }
 0xb32   :  { %v9145_v45 = vpop.eup %9144  ;;  %8803 = vmatprep.mubr.msk.f32.mxu0 %vm1583_vm4, %v6616_v0  ;;  %8820 = vmatprep.subr.mxu1 %v11646_v4  ;;  %v12236_v0 = vld [vmem:[#allocation42_spill] sm:$0xff] }
 0xb33   :  { %8804 = vmatmul.mubr.msk.f32.vlgmr.msra.gmra.mxu0 %vm1583_vm4, %v6617_v22  ;;  %v6618_v2 = vmul.f32 %v9145_v45, %v11556_v8  ;;  %v9147_v57 = vpop.eup %9146  ;;  %v12237_v45 = vld [vmem:[#allocation37_spill] sm:$0xff] }
 0xb34   :  { %8814 = vmatpush3.msra.mxu0 %v11598_v42  ;;  %7593 = vbcast.lane.b32.xlu1 %v11668_v29, 264  ;;  %v6621_v48 = vmul.f32 %v9147_v57, %v11558_v50  ;;  %v12238_v57 = vld [vmem:[#allocation44_spill] sm:$0xff] }
 0xb35   :  { %8815 = vmatprep.subr.mxu0 %v7147_v36  ;;  %v7341_v39 = vpop.permute.xlu0 %7340  ;;  %8810 = vmatprep.mubr.msk.f32.mxu1 %vm1583_vm4, %v6618_v2 }
 0xb36   :  { %8816 = vmatpush3.msra.mxu0 %v7147_v36  ;;  %8811 = vmatmul.mubr.msk.f32.vlgmr.msra.gmra.mxu1 %vm1583_vm4, %v6619_v1 }
 0xb37   :  { %v9149_v19 = vpop.eup %9148  ;;  %8821 = vmatpush3.msra.mxu1 %v11646_v4 }
 0xb38   :  { %v6620_v3 = vmul.f32 %v9149_v19, %v11564_v20  ;;  %7604 = vbcast.lane.b32.xlu1 %v11676_v60, 264  ;;  %v12229_v20 = vld [vmem:[#allocation43_spill] sm:$0xff] }
 0xb39   :  { %v7345_v8 = vpop.permute.xlu0 %7344  ;;  %v7514_v6 = vsel %vm806_vm0, %v12229_v20, %v7341_v39  ;;  %v12233_v60 = vld [vmem:[#allocation47_spill] sm:$0xff] }
 0xb3a   :  { %8817 = vmatprep.mubr.msk.f32.mxu0 %vm1583_vm4, %v6620_v3  ;;  %v7516_v10 = vsel %vm806_vm0, %v12230_v14, %v7345_v8 }
 0xb3b   :  { %8818 = vmatmul.mubr.msk.f32.vlgmr.msra.gmra.mxu0 %vm1583_vm4, %v6621_v48  ;;  %v12239_v48 = vld [vmem:[#allocation36_spill] sm:$0xff] }
 0xb3c   :  { %7615 = vbcast.lane.b32.xlu1 %v11684_v47, 264  ;;  %v12234_v47 = vld [vmem:[#allocation41_spill] sm:$0xff] }
 0xb3d   :  { %v7349_v42 = vpop.permute.xlu0 %7348 }
 0xb3e   :  { %v7518_v63 = vsel %vm806_vm0, %v12231_v52, %v7349_v42 }
 0xb40   :  { %7626 = vbcast.lane.b32.xlu1 %v9167_v54, 264 }
 0xb41   :  { %v7353_v21 = vpop.permute.xlu0 %7352 }
 0xb42   :  { %v7520_v32 = vsel %vm806_vm0, %v12232_v58, %v7353_v21 }
 0xb44   :  { %7637 = vbcast.lane.b32.xlu1 %v9168_v13, 264 }
 0xb45   :  { %v7357_v15 = vpop.permute.xlu0 %7356 }
 0xb46   :  { %v7522_v34 = vsel %vm806_vm0, %v12233_v60, %v7357_v15 }
 0xb49   :  { %v7361_v23 = vpop.permute.xlu0 %7360 }
 0xb4a   :  { %v7524_v37 = vsel %vm806_vm0, %v12234_v47, %v7361_v23  ;;  %v12240_v23 = vld [vmem:[#allocation46_spill] sm:$0xff] }
 0xb4d   :  { %v7365_v44 = vpop.permute.xlu0 %7364 }
 0xb4e   :  { %v7526_v53 = vsel %vm806_vm0, %v12235_v33, %v7365_v44 }
 0xb51   :  { %v11739_v12 = vpop.permute.xlu0 %7400 }
 0xb55   :  { %v7405_v50 = vpop.permute.xlu0 %7404 }
 0xb56   :  { %v11744_v9 = vsel %vm7528_vm3, %v7514_v6, %v7405_v50  ;;  %v12241_v50 = vld [vmem:[#allocation40_spill] sm:$0xff] }
 0xb59   :  { %v7409_v35 = vpop.permute.xlu0 %7408  ;;  %v6591_v31 = vpop.xlane.xlu1 %6590 }
 0xb5a   :  { %v11749_v4 = vsel %vm7528_vm3, %v7516_v10, %v7409_v35  ;;  %9150 = vrcp.f32 %v6591_v31  ;;  %v12242_v31 = vld [vmem:[#allocation48_spill] sm:$0xff] }
 0xb5d   :  { %v7413_v7 = vpop.permute.xlu0 %7412  ;;  %v6588_v30 = vpop.xlane.xlu1 %6587 }
 0xb5e   :  { %v11754_v61 = vsel %vm7528_vm3, %v7518_v63, %v7413_v7  ;;  %9152 = vrcp.f32 %v6588_v30 }
 0xb61   :  { %v7417_v29 = vpop.permute.xlu0 %7416  ;;  %v7234_v59 = vpop.permute.xlu1 %7233 }
 0xb62   :  { %v11759_v18 = vsel %vm7528_vm3, %v7520_v32, %v7417_v29  ;;  %8822 = vmatprep.subr.mxu1 %v7234_v59 }
 0xb63   :  { %8823 = vmatpush3.msra.mxu1 %v7234_v59 }
 0xb65   :  { %v7421_v28 = vpop.permute.xlu0 %7420  ;;  %v11763_v11 = vpop.permute.xlu1 %7338 }
 0xb66   :  { %v11766_v46 = vsel %vm7528_vm3, %v7522_v34, %v7421_v28 }
 0xb67   :  { %v9151_v25 = vpop.eup %9150 }
 0xb68   :  { %v6623_v17 = vmul.f32 %v9151_v25, %v11584_v43 }
 0xb69   :  { %v7425_v40 = vpop.permute.xlu0 %7424  ;;  %v7343_v62 = vpop.permute.xlu1 %7342 }
 0xb6a   :  { %v11771_v51 = vsel %vm7528_vm3, %v7524_v37, %v7425_v40  ;;  %v7515_v55 = vsel %vm806_vm0, %v12236_v0, %v7343_v62 }
 0xb6b   :  { %v9153_v54 = vpop.eup %9152 }
 0xb6c   :  { %v6622_v41 = vmul.f32 %v9153_v54, %v11592_v5 }
 0xb6d   :  { %v7429_v26 = vpop.permute.xlu0 %7428  ;;  %v7347_v49 = vpop.permute.xlu1 %7346 }
 0xb6e   :  { %v11778_v13 = vsel %vm7528_vm3, %v7526_v53, %v7429_v26  ;;  %8824 = vmatprep.mubr.msk.f32.mxu1 %vm1583_vm4, %v6622_v41  ;;  %v7517_v2 = vsel %vm806_vm0, %v12237_v45, %v7347_v49  ;;  %v12243_v45 = vld [vmem:[#allocation26_spill] sm:$0xff] }
 0xb6f   :  { %8825 = vmatmul.mubr.msk.f32.vlgmr.msra.gmra.mxu1 %vm1583_vm4, %v6623_v17  ;;  %vm7545_vm4 = vcmask 785408  }
 0xb71   :  { %v7351_v24 = vpop.permute.xlu1 %7350  ;;  %v7568_v54 = vpop.permute.xlu0 %7567 }
 0xb72   :  { %v7519_v19 = vsel %vm806_vm0, %v12238_v57, %v7351_v24 }
 0xb75   :  { %v7355_v16 = vpop.permute.xlu1 %7354 }
 0xb76   :  { %v7521_v42 = vsel %vm806_vm0, %v12239_v48, %v7355_v16 }
 0xb79   :  { %v7359_v36 = vpop.permute.xlu1 %7358 }
 0xb7a   :  { %v7523_v44 = vsel %vm806_vm0, %v12240_v23, %v7359_v36 }
 0xb7c   :  { %v7579_v26 = vpop.permute.xlu0 %7578 }
 0xb7d   :  { %v7363_v56 = vpop.permute.xlu1 %7362 }
 0xb7e   :  { %v7525_v14 = vsel %vm806_vm0, %v12241_v50, %v7363_v56 }
 0xb80   :  { %v7590_v17 = vpop.permute.xlu0 %7589 }
 0xb81   :  { %v7367_v27 = vpop.permute.xlu1 %7366 }
 0xb82   :  { %v7527_v52 = vsel %vm806_vm0, %v12242_v31, %v7367_v27 }
 0xb84   :  { %v7601_v16 = vpop.permute.xlu0 %7600 }
 0xb85   :  { %v11782_v5 = vpop.permute.xlu1 %7402 }
 0xb89   :  { %v7407_v22 = vpop.permute.xlu1 %7406 }
 0xb8a   :  { %v11787_v43 = vsel %vm7528_vm3, %v7515_v55, %v7407_v22 }
 0xb8d   :  { %v7411_v1 = vpop.permute.xlu1 %7410 }
 0xb8e   :  { %v11792_v39 = vsel %vm7528_vm3, %v7517_v2, %v7411_v1  ;;  %v7513_v2 = vsel %vm806_vm0, %v12243_v45, %v11763_v11 }
 0xb8f   :  { %v7530_v1 = vsel %vm7528_vm3, %v7513_v2, %v11782_v5  ;;  %v9169_v5 = vld [vmem:[%s11889_s2 + $0x7] ss:$0 sm:$0xff]  ;;  %s9196_s2 = smov [#allocation2]  }
 0xb90   :  { %v7612_v56 = vpop.permute.xlu0 %7611 }
 0xb91   :  { %v7415_v3 = vpop.permute.xlu1 %7414 }
 0xb92   :  { %v11797_v8 = vsel %vm7528_vm3, %v7519_v19, %v7415_v3  ;;  %v12244_v19 = vld [vmem:[#allocation7_spill] sm:$0xff] }
 0xb93   :  { %v7512_v3 = vsel %vm806_vm0, %v12244_v19, %v11720_v38 }
 0xb95   :  { %v7419_v21 = vpop.permute.xlu1 %7418 }
 0xb96   :  { %v11802_v15 = vsel %vm7528_vm3, %v7521_v42, %v7419_v21  ;;  %v7623_v0 = vpop.permute.xlu0 %7622  ;;  %v7529_v42 = vsel %vm7528_vm3, %v7512_v3, %v11739_v12 }
 0xb99   :  { %v7423_v20 = vpop.permute.xlu1 %7422 }
 0xb9a   :  { %v11807_v6 = vsel %vm7528_vm3, %v7523_v44, %v7423_v20  ;;  %v11835_v22 = vpop.permute.xlu0 %7633 }
 0xb9d   :  { %v7427_v10 = vpop.permute.xlu1 %7426 }
 0xb9e   :  { %v11812_v35 = vsel %vm7528_vm3, %v7525_v14, %v7427_v10 }
 0xba1   :  { %v7431_v63 = vpop.permute.xlu1 %7430 }
 0xba2   :  { %v11817_v7 = vsel %vm7528_vm3, %v7527_v52, %v7431_v63 }
 0xba5   :  { %v7572_v62 = vpop.permute.xlu1 %7571 }
 0xba9   :  { %v7583_v53 = vpop.permute.xlu1 %7582 }
 0xbad   :  { %v7594_v49 = vpop.permute.xlu1 %7593 }
 0xbae   :  { %v8777_v30 = vpop.f32.mrf.mxu0 }
 0xbaf   :  { %7466 = vrot.lane.b32.xlu1 %v8777_v30, %s9193_s13 }
 0xbb0   :  { %v6702_v58 = vpop.f32.mrf.mxu0 }
 0xbb1   :  { %7464 = vrot.lane.b32.xlu0 %v6702_v58, %s9193_s13  ;;  %v7605_v24 = vpop.permute.xlu1 %7604 }
 0xbb5   :  { %v7616_v36 = vpop.permute.xlu1 %7615 }
 0xbb9   :  { %v7627_v27 = vpop.permute.xlu1 %7626 }
 0xbbd   :  { %v11833_v55 = vpop.permute.xlu1 %7637 }
 0xbe6   :  { %v8784_v32 = vpop.f32.mrf.mxu1 }
 0xbe7   :  { %7470 = vrot.lane.b32.xlu1 %v8784_v32, %s9193_s13 }
 0xbe8   :  { %v6789_v29 = vpop.f32.mrf.mxu1 }
 0xbe9   :  { %7468 = vrot.lane.b32.xlu0 %v6789_v29, %s9193_s13 }
 0xbeb   :  { %v8791_v59 = vpop.f32.mrf.mxu0 }
 0xbec   :  { %7474 = vrot.lane.b32.xlu1 %v8791_v59, %s9193_s13 }
 0xbed   :  { %v6876_v60 = vpop.f32.mrf.mxu0 }
 0xbee   :  { %7472 = vrot.lane.b32.xlu0 %v6876_v60, %s9193_s13  ;;  %v8798_v34 = vpop.f32.mrf.mxu1 }
 0xbf0   :  { %7478 = vrot.lane.b32.xlu1 %v8798_v34, %s9193_s13  ;;  %v6963_v28 = vpop.f32.mrf.mxu1 }
 0xbf2   :  { %7476 = vrot.lane.b32.xlu0 %v6963_v28, %s9193_s13 }
 0xbf3   :  { %v8805_v47 = vpop.f32.mrf.mxu0 }
 0xbf4   :  { %7482 = vrot.lane.b32.xlu1 %v8805_v47, %s9193_s13 }
 0xbf5   :  { %v7050_v37 = vpop.f32.mrf.mxu0 }
 0xbf6   :  { %7480 = vrot.lane.b32.xlu0 %v7050_v37, %s9193_s13  ;;  %v8812_v40 = vpop.f32.mrf.mxu1 }
 0xbf8   :  { %7486 = vrot.lane.b32.xlu1 %v8812_v40, %s9193_s13  ;;  %v7137_v25 = vpop.f32.mrf.mxu1 }
 0xbfa   :  { %7484 = vrot.lane.b32.xlu0 %v7137_v25, %s9193_s13 }
 0xbfb   :  { %v8819_v41 = vpop.f32.mrf.mxu0 }
 0xbfc   :  { %7490 = vrot.lane.b32.xlu1 %v8819_v41, %s9193_s13 }
 0xbfd   :  { %v7224_v33 = vpop.f32.mrf.mxu0 }
 0xbfe   :  { %7488 = vrot.lane.b32.xlu0 %v7224_v33, %s9193_s13 }
 0xc21   :  { %v7467_v57 = vpop.permute.xlu1 %7466 }
 0xc22   :  { %v7547_v48 = vsel %vm7545_vm4, %v7530_v1, %v7467_v57 }
 0xc23   :  { %v7651_v21 = vmul.f32 %v7572_v62, %v7547_v48  ;;  %v7465_v23 = vpop.permute.xlu0 %7464 }
 0xc24   :  { %v7546_v44 = vsel %vm7545_vm4, %v7529_v42, %v7465_v23 }
 0xc25   :  { %7667 = vst [vmem:[#allocation2 + $0x8] sm:$0xff] %v7651_v21  ;;  %v7650_v20 = vmul.f32 %v7568_v54, %v7546_v44 }
 0xc27   :  { %7666 = vst [vmem:[#allocation2] sm:$0xff] %v7650_v20 }
 0xc2f   :  { %v8826_v11 = vpop.f32.mrf.mxu1 }
 0xc30   :  { %7494 = vrot.lane.b32.xlu1 %v8826_v11, %s9193_s13 }
 0xc31   :  { %v7311_v38 = vpop.f32.mrf.mxu1 }
 0xc32   :  { %7492 = vrot.lane.b32.xlu0 %v7311_v38, %s9193_s13  ;;  %s7687_s13 = sshll.u32 %s9196_s2, 4  ;;  %s7688_s13 = int_to_ptr.vmem [resolvable:$true] %s7687_s13 }
 0xc33   :  { %s9170_s29 = scalar_lea.vmem %s7688_s13, 2048  ;;  %p9175_p1 = scmp.lt.s32.totalorder %s7688_s13, %s7688_s13 }
 0xc34   :  { %7648 = vbcast.lane.b32.xlu1 %v9169_v5, 264  ;;  %p9171_p0 = scmp.ne.s32.totalorder %s7688_s13, %s9170_s29  ;;  %p9176_p2 = scmp.lt.s32.totalorder %s9170_s29, %s9170_s29 }
 0xc36   :  { %7644 = vbcast.lane.b32.xlu0 %v9169_v5, 256  ;;  %p9177_p3 = por %p9176_p2, %p9175_p1 }
 0xc38   :  { %p9178_p4 = pnand %p9177_p3, %p9171_p0 }
 0xc59   :  { %v7471_v12 = vpop.permute.xlu1 %7470 }
 0xc5a   :  { %v7549_v50 = vsel %vm7545_vm4, %v11787_v43, %v7471_v12 }
 0xc5b   :  { %v7653_v14 = vmul.f32 %v7583_v53, %v7549_v50  ;;  %v7469_v10 = vpop.permute.xlu0 %7468 }
 0xc5c   :  { %v7548_v31 = vsel %vm7545_vm4, %v11744_v9, %v7469_v10 }
 0xc5d   :  { %7669 = vst [vmem:[#allocation2 + $0x18] sm:$0xff] %v7653_v14  ;;  %v7652_v52 = vmul.f32 %v7579_v26, %v7548_v31 }
 0xc5e   :  { %v7475_v63 = vpop.permute.xlu1 %7474 }
 0xc5f   :  { %7668 = vst [vmem:[#allocation2 + $0x10] sm:$0xff] %v7652_v52  ;;  %v7551_v30 = vsel %vm7545_vm4, %v11792_v39, %v7475_v63 }
 0xc60   :  { %v7655_v58 = vmul.f32 %v7594_v49, %v7551_v30  ;;  %v7473_v32 = vpop.permute.xlu0 %7472 }
 0xc61   :  { %v7550_v29 = vsel %vm7545_vm4, %v11749_v4, %v7473_v32 }
 0xc62   :  { %7671 = vst [vmem:[#allocation2 + $0x28] sm:$0xff] %v7655_v58  ;;  %v7654_v59 = vmul.f32 %v7590_v17, %v7550_v29  ;;  %v7479_v43 = vpop.permute.xlu1 %7478 }
 0xc63   :  { %v7553_v60 = vsel %vm7545_vm4, %v11797_v8, %v7479_v43 }
 0xc64   :  { %7670 = vst [vmem:[#allocation2 + $0x20] sm:$0xff] %v7654_v59  ;;  %v7657_v9 = vmul.f32 %v7605_v24, %v7553_v60  ;;  %v7477_v34 = vpop.permute.xlu0 %7476 }
 0xc65   :  { %v7552_v28 = vsel %vm7545_vm4, %v11754_v61, %v7477_v34 }
 0xc66   :  { %7673 = vst [vmem:[#allocation2 + $0x38] sm:$0xff] %v7657_v9  ;;  %v7656_v47 = vmul.f32 %v7601_v16, %v7552_v28  ;;  %v7483_v39 = vpop.permute.xlu1 %7482 }
 0xc67   :  { %v7555_v37 = vsel %vm7545_vm4, %v11802_v15, %v7483_v39 }
 0xc68   :  { %7672 = vst [vmem:[#allocation2 + $0x30] sm:$0xff] %v7656_v47  ;;  %v7659_v4 = vmul.f32 %v7616_v36, %v7555_v37  ;;  %v7481_v40 = vpop.permute.xlu0 %7480 }
 0xc69   :  { %v7554_v62 = vsel %vm7545_vm4, %v11759_v18, %v7481_v40 }
 0xc6a   :  { %7675 = vst [vmem:[#allocation2 + $0x48] sm:$0xff] %v7659_v4  ;;  %v7658_v8 = vmul.f32 %v7612_v56, %v7554_v62  ;;  %v7487_v25 = vpop.permute.xlu1 %7486 }
 0xc6b   :  { %v7557_v54 = vsel %vm7545_vm4, %v11807_v6, %v7487_v25 }
 0xc6c   :  { %7674 = vst [vmem:[#allocation2 + $0x40] sm:$0xff] %v7658_v8  ;;  %v7661_v61 = vmul.f32 %v7627_v27, %v7557_v54  ;;  %v7485_v41 = vpop.permute.xlu0 %7484 }
 0xc6d   :  { %v7556_v33 = vsel %vm7545_vm4, %v11766_v46, %v7485_v41 }
 0xc6e   :  { %7677 = vst [vmem:[#allocation2 + $0x58] sm:$0xff] %v7661_v61  ;;  %v7660_v15 = vmul.f32 %v7623_v0, %v7556_v33  ;;  %v7491_v53 = vpop.permute.xlu1 %7490 }
 0xc6f   :  { %v7559_v26 = vsel %vm7545_vm4, %v11812_v35, %v7491_v53 }
 0xc70   :  { %7676 = vst [vmem:[#allocation2 + $0x50] sm:$0xff] %v7660_v15  ;;  %v7663_v18 = vmul.f32 %v11833_v55, %v7559_v26  ;;  %v7489_v49 = vpop.permute.xlu0 %7488 }
 0xc71   :  { %v7558_v17 = vsel %vm7545_vm4, %v11771_v51, %v7489_v49 }
 0xc72   :  { %7679 = vst [vmem:[#allocation2 + $0x68] sm:$0xff] %v7663_v18  ;;  %v7662_v6 = vmul.f32 %v11835_v22, %v7558_v17 }
 0xc74   :  { %7678 = vst [vmem:[#allocation2 + $0x60] sm:$0xff] %v7662_v6 }
 0xca2   :  { %v7495_v24 = vpop.permute.xlu1 %7494 }
 0xca3   :  { %v7561_v46 = vsel %vm7545_vm4, %v11817_v7, %v7495_v24 }
 0xca4   :  { %v7493_v16 = vpop.permute.xlu0 %7492 }
 0xca5   :  { %v7560_v56 = vsel %vm7545_vm4, %v11778_v13, %v7493_v16 }
 0xca6   :  { %v7649_v36 = vpop.permute.xlu1 %7648 }
 0xca7   :  { %v7665_v35 = vmul.f32 %v7649_v36, %v7561_v46 }
 0xca8   :  { %v7645_v27 = vpop.permute.xlu0 %7644 }
 0xca9   :  { %7681 = vst [vmem:[#allocation2 + $0x78] sm:$0xff] %v7665_v35  ;;  %v7664_v0 = vmul.f32 %v7645_v27, %v7560_v56 }
 0xcab   :  { %7680 = vst [vmem:[#allocation2 + $0x70] sm:$0xff] %v7664_v0 }
 0xcac   :  { %9181 = shalt.err (!%p9178_p4)
}
 0xcad   :  { %s9197_s30 = smov 128   ;;  %s9198_s8 = smov 8  }
 0xcae   :  { %7693 = dma.vmem_to_hbm [thread:$0]  %s7688_s13, 2048, %s11894_s7, [#allocation3], %s9197_s30, %s9197_s30, %s9198_s8  }
 0xcaf   :  { %9190 = dma.done.wait [#allocation3], 2048  }
 0xcb0   :  { %9191 = vsyncadd [#allocation3], 4294965248 }
 0xcb1   :  { %7697 = vsyncpa [#allocation3], 1 }

</bundles_post_ra>
